<compile_context>
chip_gen: v5e
topology: v5e:2x2
jax: 0.10.0
libtpu: 0.0.40
codegen_flags: <defaults>
</compile_context>

<pallas_src>
import math

import jax
import jax.numpy as jnp
from jax.experimental import pallas as pl
from jax.experimental.pallas import tpu as pltpu


def _make_decoder_kernel(heads, d_k, seq_len, block_b, d_model, matmul_dtype):
    L, D = seq_len, d_model
    scale = 1.0 / math.sqrt(d_k)          # Python float -> jaxpr literal

    def mm(a):
        # cast MXU operands only; accumulation stays f32 via preferred_element_type
        return a.astype(matmul_dtype)

    def kernel(x_ref, enc_ref, tbias_ref, sbias_ref,
               wqkv_ref, wo_ref, bqkv_ref, vecs_ref,
               w1_ref, b1_ref, w2_ref, out_ref, ctx_ref):
        x = x_ref[...]      # (block_b*L, D) f32
        enc = enc_ref[...]  # (block_b*L, D) f32

        gamma = vecs_ref[0:1, :]   # (1, D)
        beta = vecs_ref[1:2, :]
        b2 = vecs_ref[4:5, :]

        def layernorm(v):
            mu = jnp.mean(v, axis=-1, keepdims=True)
            ctr = v - mu
            var = jnp.mean(ctr * ctr, axis=-1, keepdims=True)
            return ctr * jax.lax.rsqrt(var + 1e-5) * gamma + beta

        def mha(q_in, kv_in, bias_ref, p, self_attn):
            # Fused input projections (1 matmul for self-attn, 2 for cross-attn).
            if self_attn:
                qkv = jnp.dot(mm(q_in), wqkv_ref[p],
                              preferred_element_type=jnp.float32)
                qkv = qkv + bqkv_ref[p:p + 1, :]
                q = qkv[:, 0:D]
                k = qkv[:, D:2 * D]
                v = qkv[:, 2 * D:3 * D]
            else:
                q = jnp.dot(mm(q_in), wqkv_ref[p, :, 0:D],
                            preferred_element_type=jnp.float32)
                q = q + bqkv_ref[p:p + 1, 0:D]
                kv = jnp.dot(mm(kv_in), wqkv_ref[p, :, D:3 * D],
                             preferred_element_type=jnp.float32)
                kv = kv + bqkv_ref[p:p + 1, D:3 * D]
                k = kv[:, 0:D]
                v = kv[:, D:2 * D]
            q = q * scale                   # fold 1/sqrt(d_k) once into Q

            # Per-(batch-row, head) attention; contexts land in lane slices of the
            # (block_b*L, D) VMEM scratch (bounds vreg pressure, no concatenate).
            for bb in range(block_b):       # small static loops (block_b, heads)
                r0 = bb * L
                bias_b = bias_ref[bb, :, :]     # additive mask bias, precomputed
                for h in range(heads):
                    lo = h * d_k
                    qh = q[r0:r0 + L, lo:lo + d_k]
                    kh = k[r0:r0 + L, lo:lo + d_k]
                    vh = v[r0:r0 + L, lo:lo + d_k]
                    # contract last dims of both operands (no explicit K transpose)
                    s = jax.lax.dot_general(
                        mm(qh), mm(kh), (((1,), (1,)), ((), ())),
                        preferred_element_type=jnp.float32)
                    s = s + bias_b
                    s = s - jnp.max(s, axis=-1, keepdims=True)
                    e = jnp.exp(s)
                    pr = e * pl.reciprocal(jnp.sum(e, axis=-1, keepdims=True),
                                           approx=True)
                    ctx_ref[r0:r0 + L, lo:lo + d_k] = jnp.dot(
                        mm(pr), mm(vh), preferred_element_type=jnp.float32)

            # single full-width output projection: (block_b*L, D) @ (D, D)
            attn = jnp.dot(mm(ctx_ref[...]), wo_ref[p],
                           preferred_element_type=jnp.float32)
            return attn + vecs_ref[2 + p:3 + p, :]   # output-projection bias

        # 1) masked self-attention + residual + LayerNorm
        q1 = layernorm(mha(x, x, tbias_ref, 0, True) + x)
        # 2) encoder-decoder attention + residual + LayerNorm
        inter = layernorm(mha(q1, enc, sbias_ref, 1, False) + q1)
        # 3) position-wise feed-forward + residual + LayerNorm
        h1 = jnp.dot(mm(inter), w1_ref[...],
                     preferred_element_type=jnp.float32) + b1_ref[...]
        h1 = jnp.maximum(h1, 0.0)
        ff = jnp.dot(mm(h1), w2_ref[...],
                     preferred_element_type=jnp.float32) + b2
        out_ref[...] = layernorm(ff + inter)

    return kernel


def decoder_layer_pallas(embeddings, encoded, src_mask, target_mask, params, heads,
                         *, block_b=None, matmul_dtype=jnp.bfloat16):
    """Fused decoder layer. All dropout is identity (eval mode)."""
    B, L, D = embeddings.shape
    assert D % heads == 0
    d_k = D // heads
    middle = params["w1"].shape[1]

    divisors = [d for d in range(1, B + 1) if B % d == 0]
    if block_b is None:
        # Target an MXU-sized M = block_b*L (>= 256 rows); if the whole batch is
        # smaller than that (the test case), take it in a single grid step.
        block_b = B
        for d in divisors:
            if d * L >= 256:
                block_b = d
                break

        # Cap the per-step f32-intermediate footprint (h1 is M x middle) so the
        # block also fits comfortably under v7x's 64 MiB physical VMEM.
        def step_bytes(bb):
            m = bb * L
            return 4 * m * (2 * middle + 8 * D)

        while block_b > 1 and step_bytes(block_b) > (24 << 20):
            block_b = max(d for d in divisors if d < block_b)
    assert B % block_b == 0
    grid_b = B // block_b
    M = block_b * L

    wdt = matmul_dtype
    # ---- pack the 22 small parameters into 7 slabs (fewer DMAs / VMEM buffers) ----
    wqkv = jnp.stack([
        jnp.concatenate([params["wq1"], params["wk1"], params["wv1"]], axis=1),
        jnp.concatenate([params["wq2"], params["wk2"], params["wv2"]], axis=1),
    ]).astype(wdt)                                                  # (2, D, 3D)
    wo = jnp.stack([params["wo1"], params["wo2"]]).astype(wdt)      # (2, D, D)
    bqkv = jnp.stack([
        jnp.concatenate([params["bq1"], params["bk1"], params["bv1"]], axis=1)[0],
        jnp.concatenate([params["bq2"], params["bk2"], params["bv2"]], axis=1)[0],
    ]).astype(jnp.float32)                                          # (2, 3D)
    vecs = jnp.concatenate(
        [params["gamma"], params["beta"], params["bo1"], params["bo2"], params["b2"]],
        axis=0).astype(jnp.float32)                                 # (5, D)
    w1 = params["w1"].astype(wdt)                                   # (D, middle)
    b1 = params["b1"].astype(jnp.float32)                           # (1, middle)
    w2 = params["w2"].astype(wdt)                                   # (middle, D)

    # additive mask bias precomputed wrapper-side: 0 where allowed, -1e9 where masked
    tbias = jnp.where(target_mask == 0, -1e9, 0.0).astype(jnp.float32)
    sbias = jnp.where(src_mask == 0, -1e9, 0.0).astype(jnp.float32)

    # flatten batch/seq so every matmul sees M = block_b*L rows
    x2d = embeddings.reshape(B * L, D).astype(jnp.float32)
    enc2d = encoded.reshape(B * L, D).astype(jnp.float32)

    act_spec = pl.BlockSpec((M, D), lambda b: (b, 0))
    bias_spec = pl.BlockSpec((block_b, L, L), lambda b: (b, 0, 0))

    def full(arr):
        n = arr.ndim
        return pl.BlockSpec(arr.shape, lambda b: (0,) * n)

    # Per-step VMEM footprint estimate: double-buffered I/O blocks + weight slabs
    # (double-buffered by default) + big f32 intermediates; clamp to [16, 48] MiB.
    wbytes = jnp.dtype(wdt).itemsize
    est = (
        2 * 2 * M * D * 4                               # x/enc blocks (double-buffered)
        + 2 * M * D * 4                                 # out block
        + 2 * 2 * block_b * L * L * 4                   # mask-bias blocks
        + 2 * (wqkv.size + wo.size + w1.size + w2.size) * wbytes
        + 2 * (bqkv.size + vecs.size + b1.size) * 4
        + M * D * 4                                     # ctx scratch
        + 2 * M * (3 * D + middle) * 4                  # qkv / h1 / ff temporaries
    )
    vmem_limit = int(min(max(2 * est, 16 << 20), 48 << 20))

    kernel = _make_decoder_kernel(heads, d_k, L, block_b, D, matmul_dtype)

    out2d = pl.pallas_call(
        kernel,
        out_shape=jax.ShapeDtypeStruct((B * L, D), jnp.float32),
        grid_spec=pltpu.PrefetchScalarGridSpec(
            num_scalar_prefetch=0,
            grid=(grid_b,),
            in_specs=[act_spec, act_spec, bias_spec, bias_spec,
                      full(wqkv), full(wo), full(bqkv), full(vecs),
                      full(w1), full(b1), full(w2)],
            out_specs=act_spec,
            scratch_shapes=[pltpu.VMEM((M, D), jnp.float32)],
        ),
        compiler_params=pltpu.CompilerParams(
            # "parallel" only pays off on v7x (2 TCs) with grid_b >= 2 and MXU-sized
            # blocks; it is a no-op on single-TC v5e/v6e and harmless at grid_b == 1.
            dimension_semantics=("parallel",),
            vmem_limit_bytes=vmem_limit,
        ),
    )(x2d, enc2d, tbias, sbias, wqkv, wo, bqkv, vecs, w1, b1, w2)

    return out2d.reshape(B, L, D)


def decoder_layer_ref(embeddings, encoded, src_mask, target_mask, params, heads):
    """Pure-JAX reference matching the PyTorch forward (dropout = identity)."""
    B, L, D = embeddings.shape
    d_k = D // heads

    def linear(x, w, b):
        return x @ w + b[0]

    def mha(q_in, kv_in, mask, p):
        q = linear(q_in, params[f"wq{p}"], params[f"bq{p}"])
        k = linear(kv_in, params[f"wk{p}"], params[f"bk{p}"])
        v = linear(kv_in, params[f"wv{p}"], params[f"bv{p}"])
        q = q.reshape(B, L, heads, d_k).transpose(0, 2, 1, 3)
        k = k.reshape(B, L, heads, d_k).transpose(0, 2, 1, 3)
        v = v.reshape(B, L, heads, d_k).transpose(0, 2, 1, 3)
        s = jnp.einsum("bhqd,bhkd->bhqk", q, k) / math.sqrt(d_k)
        s = jnp.where(mask[:, None, :, :] == 0, -1e9, s)
        w = jax.nn.softmax(s, axis=-1)
        ctx = jnp.einsum("bhqk,bhkd->bhqd", w, v).transpose(0, 2, 1, 3).reshape(B, L, D)
        return linear(ctx, params[f"wo{p}"], params[f"bo{p}"])

    def ln(x):
        mu = jnp.mean(x, axis=-1, keepdims=True)
        var = jnp.mean((x - mu) ** 2, axis=-1, keepdims=True)
        return (x - mu) * jax.lax.rsqrt(var + 1e-5) * params["gamma"][0] + params["beta"][0]

    q = mha(embeddings, embeddings, target_mask, 1)
    q = ln(q + embeddings)
    inter = mha(q, encoded, src_mask, 2)
    inter = ln(inter + q)
    ff = linear(jax.nn.relu(linear(inter, params["w1"], params["b1"])),
                params["w2"], params["b2"])
    return ln(ff + inter)


def init_params(key, d_model, middle_dim):
    ks = jax.random.split(key, 32)
    i = 0
    params = {}

    def nxt():
        nonlocal i
        k = ks[i]
        i += 1
        return k

    def lin(din, dout):
        w = (jax.random.normal(nxt(), (din, dout), jnp.float32) * 0.05)
        b = (jax.random.normal(nxt(), (1, dout), jnp.float32) * 0.02)
        return w, b

    for p in (1, 2):  # self-attn (1) and cross-attn (2)
        for name in ("q", "k", "v", "o"):
            w, b = lin(d_model, d_model)
            params[f"w{name}{p}"] = w
            params[f"b{name}{p}"] = b
    params["gamma"] = jnp.ones((1, d_model), jnp.float32)
    params["beta"] = jnp.zeros((1, d_model), jnp.float32)
    params["w1"], params["b1"] = lin(d_model, middle_dim)
    params["w2"], params["b2"] = lin(middle_dim, d_model)
    return params


if __name__ == "__main__":
    B, L, D, HEADS = 2, 8, 32, 4
    MIDDLE = 2048  # FeedForward default middle_dim in the PyTorch module

    key = jax.random.PRNGKey(0)
    k_emb, k_enc, k_params = jax.random.split(key, 3)

    embeddings = jax.random.normal(k_emb, (B, L, D), jnp.float32)
    encoded = jax.random.normal(k_enc, (B, L, D), jnp.float32)
    # target mask: causal (lower-triangular); src mask: all-ones
    target_mask = jnp.tril(jnp.ones((L, L), jnp.float32))[None].repeat(B, axis=0)
    src_mask = jnp.ones((B, L, L), jnp.float32)

    params = init_params(k_params, D, MIDDLE)

    ref = decoder_layer_ref(embeddings, encoded, src_mask, target_mask, params, HEADS)

    # Default path: bf16 MXU operands, f32 accumulation / softmax / LayerNorm.
    out = decoder_layer_pallas(embeddings, encoded, src_mask, target_mask, params, HEADS)
    out = jax.block_until_ready(out)
    assert out.shape == (B, L, D)
    err_bf16 = float(jnp.max(jnp.abs(out - ref)))
    assert err_bf16 < 5e-2, err_bf16

    # f32 MXU operands (reference semantics; only the approximate EUP reciprocal
    # in the softmax denominator differs from the pure-JAX reference).
    out_f32 = decoder_layer_pallas(embeddings, encoded, src_mask, target_mask,
                                   params, HEADS, matmul_dtype=jnp.float32)
    out_f32 = jax.block_until_ready(out_f32)
    err_f32 = float(jnp.max(jnp.abs(out_f32 - ref)))
    assert err_f32 < 1e-2, err_f32

    print("KERNEL_OK")
</pallas_src>

<mosaic_0001>
module attributes {stable_mosaic.version = 11 : i64} {
  func.func @kernel(%arg0: i32, %arg1: memref<16x32xf32, #tpu.memory_space<vmem>>, %arg2: memref<16x32xf32, #tpu.memory_space<vmem>>, %arg3: memref<2x8x8xf32, #tpu.memory_space<vmem>>, %arg4: memref<2x8x8xf32, #tpu.memory_space<vmem>>, %arg5: memref<2x32x96xbf16, #tpu.memory_space<vmem>>, %arg6: memref<2x32x32xbf16, #tpu.memory_space<vmem>>, %arg7: memref<2x96xf32, #tpu.memory_space<vmem>>, %arg8: memref<5x32xf32, #tpu.memory_space<vmem>>, %arg9: memref<32x2048xbf16, #tpu.memory_space<vmem>>, %arg10: memref<1x2048xf32, #tpu.memory_space<vmem>>, %arg11: memref<2048x32xbf16, #tpu.memory_space<vmem>>, %arg12: memref<16x32xf32, #tpu.memory_space<vmem>>, %arg13: memref<16x32xf32, #tpu.memory_space<vmem>>) attributes {dimension_semantics = [#tpu.dimension_semantics<parallel>], iteration_bounds = array<i64: 1>, scalar_prefetch = 0 : i64, scratch_operands = 1 : i64, tpu.core_type = #tpu.core_type<tc>, window_params = [{transform_indices = @transform_0, window_bounds = array<i64: 16, 32>}, {transform_indices = @transform_1, window_bounds = array<i64: 16, 32>}, {transform_indices = @transform_2, window_bounds = array<i64: 2, 8, 8>}, {transform_indices = @transform_3, window_bounds = array<i64: 2, 8, 8>}, {pipeline_mode = #tpu.pipeline_mode<synchronous>, transform_indices = @transform_4, window_bounds = array<i64: 2, 32, 96>}, {pipeline_mode = #tpu.pipeline_mode<synchronous>, transform_indices = @transform_5, window_bounds = array<i64: 2, 32, 32>}, {pipeline_mode = #tpu.pipeline_mode<synchronous>, transform_indices = @transform_6, window_bounds = array<i64: 2, 96>}, {pipeline_mode = #tpu.pipeline_mode<synchronous>, transform_indices = @transform_7, window_bounds = array<i64: 5, 32>}, {pipeline_mode = #tpu.pipeline_mode<synchronous>, transform_indices = @transform_8, window_bounds = array<i64: 32, 2048>}, {pipeline_mode = #tpu.pipeline_mode<synchronous>, transform_indices = @transform_9, window_bounds = array<i64: 1, 2048>}, {pipeline_mode = #tpu.pipeline_mode<synchronous>, transform_indices = @transform_10, window_bounds = array<i64: 2048, 32>}, {transform_indices = @transform_11, window_bounds = array<i64: 16, 32>}]} {
    %c0 = arith.constant 0 : index
    %c0_0 = arith.constant 0 : index
    %0 = vector.load %arg1[%c0, %c0_0] : memref<16x32xf32, #tpu.memory_space<vmem>>, vector<16x32xf32>
    %c0_1 = arith.constant 0 : index
    %c0_2 = arith.constant 0 : index
    %1 = vector.load %arg2[%c0_1, %c0_2] : memref<16x32xf32, #tpu.memory_space<vmem>>, vector<16x32xf32>
    %c0_3 = arith.constant 0 : index
    %c0_4 = arith.constant 0 : index
    %2 = vector.load %arg8[%c0_3, %c0_4] : memref<5x32xf32, #tpu.memory_space<vmem>>, vector<1x32xf32>
    %c1 = arith.constant 1 : index
    %c0_5 = arith.constant 0 : index
    %3 = vector.load %arg8[%c1, %c0_5] : memref<5x32xf32, #tpu.memory_space<vmem>>, vector<1x32xf32>
    %c4 = arith.constant 4 : index
    %c0_6 = arith.constant 0 : index
    %4 = vector.load %arg8[%c4, %c0_6] : memref<5x32xf32, #tpu.memory_space<vmem>>, vector<1x32xf32>
    %5 = arith.truncf %0 : vector<16x32xf32> to vector<16x32xbf16>
    %c0_7 = arith.constant 0 : index
    %c0_8 = arith.constant 0 : index
    %c0_9 = arith.constant 0 : index
    %6 = vector.load %arg5[%c0_7, %c0_8, %c0_9] : memref<2x32x96xbf16, #tpu.memory_space<vmem>>, vector<1x32x96xbf16>
    %7 = vector.shape_cast %6 : vector<1x32x96xbf16> to vector<32x96xbf16>
    %cst = arith.constant dense<0.000000e+00> : vector<16x96xf32>
    %8 = tpu.matmul %5, %7, %cst {dimension_numbers = #tpu.dot_dimension_numbers<[1], [0], [0], [1], [0, 0, 1, 1], [], []>} : vector<16x32xbf16>, vector<32x96xbf16>, vector<16x96xf32> -> vector<16x96xf32>
    %c0_10 = arith.constant 0 : index
    %c0_11 = arith.constant 0 : index
    %9 = vector.load %arg7[%c0_10, %c0_11] : memref<2x96xf32, #tpu.memory_space<vmem>>, vector<1x96xf32>
    %10 = vector.broadcast %9 : vector<1x96xf32> to vector<16x96xf32>
    %11 = arith.addf %8, %10 : vector<16x96xf32>
    %12 = vector.extract_strided_slice %11 {offsets = [0, 0], sizes = [16, 32], strides = [1, 1]} : vector<16x96xf32> to vector<16x32xf32>
    %13 = vector.extract_strided_slice %11 {offsets = [0, 32], sizes = [16, 32], strides = [1, 1]} : vector<16x96xf32> to vector<16x32xf32>
    %14 = vector.extract_strided_slice %11 {offsets = [0, 64], sizes = [16, 32], strides = [1, 1]} : vector<16x96xf32> to vector<16x32xf32>
    %cst_12 = arith.constant 0.353553385 : f32
    %15 = vector.broadcast %cst_12 : f32 to vector<16x32xf32>
    %16 = arith.mulf %12, %15 : vector<16x32xf32>
    %c0_13 = arith.constant 0 : index
    %c0_14 = arith.constant 0 : index
    %c0_15 = arith.constant 0 : index
    %17 = vector.load %arg3[%c0_13, %c0_14, %c0_15] : memref<2x8x8xf32, #tpu.memory_space<vmem>>, vector<1x8x8xf32>
    %18 = vector.shape_cast %17 : vector<1x8x8xf32> to vector<8x8xf32>
    %19 = vector.extract_strided_slice %16 {offsets = [0, 0], sizes = [8, 8], strides = [1, 1]} : vector<16x32xf32> to vector<8x8xf32>
    %20 = vector.extract_strided_slice %13 {offsets = [0, 0], sizes = [8, 8], strides = [1, 1]} : vector<16x32xf32> to vector<8x8xf32>
    %21 = vector.extract_strided_slice %14 {offsets = [0, 0], sizes = [8, 8], strides = [1, 1]} : vector<16x32xf32> to vector<8x8xf32>
    %22 = arith.truncf %19 : vector<8x8xf32> to vector<8x8xbf16>
    %23 = arith.truncf %20 : vector<8x8xf32> to vector<8x8xbf16>
    %cst_16 = arith.constant dense<0.000000e+00> : vector<8x8xf32>
    %24 = tpu.matmul %22, %23, %cst_16 {dimension_numbers = #tpu.dot_dimension_numbers<[1], [1], [0], [0], [0, 0, 1, 0], [], []>} : vector<8x8xbf16>, vector<8x8xbf16>, vector<8x8xf32> -> vector<8x8xf32>
    %25 = arith.addf %24, %18 : vector<8x8xf32>
    %cst_17 = arith.constant dense<0xFF800000> : vector<8xf32>
    %26 = vector.multi_reduction <maximumf>, %25, %cst_17 [1] : vector<8x8xf32> to vector<8xf32>
    %27 = vector.shape_cast %26 : vector<8xf32> to vector<8x1xf32>
    %28 = vector.broadcast %27 : vector<8x1xf32> to vector<8x8xf32>
    %29 = arith.subf %25, %28 : vector<8x8xf32>
    %30 = math.exp %29 : vector<8x8xf32>
    %cst_18 = arith.constant dense<0.000000e+00> : vector<8xf32>
    %31 = vector.multi_reduction <add>, %30, %cst_18 [1] : vector<8x8xf32> to vector<8xf32>
    %32 = vector.shape_cast %31 : vector<8xf32> to vector<8x1xf32>
    %33 = tpu.reciprocal %32 {approx = true} : vector<8x1xf32> -> vector<8x1xf32>
    %34 = vector.broadcast %33 : vector<8x1xf32> to vector<8x8xf32>
    %35 = arith.mulf %30, %34 : vector<8x8xf32>
    %36 = arith.truncf %35 : vector<8x8xf32> to vector<8x8xbf16>
    %37 = arith.truncf %21 : vector<8x8xf32> to vector<8x8xbf16>
    %cst_19 = arith.constant dense<0.000000e+00> : vector<8x8xf32>
    %38 = tpu.matmul %36, %37, %cst_19 {dimension_numbers = #tpu.dot_dimension_numbers<[1], [0], [0], [1], [0, 0, 1, 1], [], []>} : vector<8x8xbf16>, vector<8x8xbf16>, vector<8x8xf32> -> vector<8x8xf32>
    %c0_20 = arith.constant 0 : index
    %c0_21 = arith.constant 0 : index
    %39 = vector.load %arg13[%c0_20, %c0_21] : memref<16x32xf32, #tpu.memory_space<vmem>>, vector<8x8xf32>
    tpu.vector_store %arg13[%c0_20, %c0_21], %38 {strides = array<i32>} : memref<16x32xf32, #tpu.memory_space<vmem>>, vector<8x8xf32>,
    %40 = vector.extract_strided_slice %16 {offsets = [0, 8], sizes = [8, 8], strides = [1, 1]} : vector<16x32xf32> to vector<8x8xf32>
    %41 = vector.extract_strided_slice %13 {offsets = [0, 8], sizes = [8, 8], strides = [1, 1]} : vector<16x32xf32> to vector<8x8xf32>
    %42 = vector.extract_strided_slice %14 {offsets = [0, 8], sizes = [8, 8], strides = [1, 1]} : vector<16x32xf32> to vector<8x8xf32>
    %43 = arith.truncf %40 : vector<8x8xf32> to vector<8x8xbf16>
    %44 = arith.truncf %41 : vector<8x8xf32> to vector<8x8xbf16>
    %cst_22 = arith.constant dense<0.000000e+00> : vector<8x8xf32>
    %45 = tpu.matmul %43, %44, %cst_22 {dimension_numbers = #tpu.dot_dimension_numbers<[1], [1], [0], [0], [0, 0, 1, 0], [], []>} : vector<8x8xbf16>, vector<8x8xbf16>, vector<8x8xf32> -> vector<8x8xf32>
    %46 = arith.addf %45, %18 : vector<8x8xf32>
    %cst_23 = arith.constant dense<0xFF800000> : vector<8xf32>
    %47 = vector.multi_reduction <maximumf>, %46, %cst_23 [1] : vector<8x8xf32> to vector<8xf32>
    %48 = vector.shape_cast %47 : vector<8xf32> to vector<8x1xf32>
    %49 = vector.broadcast %48 : vector<8x1xf32> to vector<8x8xf32>
    %50 = arith.subf %46, %49 : vector<8x8xf32>
    %51 = math.exp %50 : vector<8x8xf32>
    %cst_24 = arith.constant dense<0.000000e+00> : vector<8xf32>
    %52 = vector.multi_reduction <add>, %51, %cst_24 [1] : vector<8x8xf32> to vector<8xf32>
    %53 = vector.shape_cast %52 : vector<8xf32> to vector<8x1xf32>
    %54 = tpu.reciprocal %53 {approx = true} : vector<8x1xf32> -> vector<8x1xf32>
    %55 = vector.broadcast %54 : vector<8x1xf32> to vector<8x8xf32>
    %56 = arith.mulf %51, %55 : vector<8x8xf32>
    %57 = arith.truncf %56 : vector<8x8xf32> to vector<8x8xbf16>
    %58 = arith.truncf %42 : vector<8x8xf32> to vector<8x8xbf16>
    %cst_25 = arith.constant dense<0.000000e+00> : vector<8x8xf32>
    %59 = tpu.matmul %57, %58, %cst_25 {dimension_numbers = #tpu.dot_dimension_numbers<[1], [0], [0], [1], [0, 0, 1, 1], [], []>} : vector<8x8xbf16>, vector<8x8xbf16>, vector<8x8xf32> -> vector<8x8xf32>
    %c0_26 = arith.constant 0 : index
    %c8 = arith.constant 8 : index
    %60 = vector.load %arg13[%c0_26, %c8] : memref<16x32xf32, #tpu.memory_space<vmem>>, vector<8x8xf32>
    tpu.vector_store %arg13[%c0_26, %c8], %59 {strides = array<i32>} : memref<16x32xf32, #tpu.memory_space<vmem>>, vector<8x8xf32>,
    %61 = vector.extract_strided_slice %16 {offsets = [0, 16], sizes = [8, 8], strides = [1, 1]} : vector<16x32xf32> to vector<8x8xf32>
    %62 = vector.extract_strided_slice %13 {offsets = [0, 16], sizes = [8, 8], strides = [1, 1]} : vector<16x32xf32> to vector<8x8xf32>
    %63 = vector.extract_strided_slice %14 {offsets = [0, 16], sizes = [8, 8], strides = [1, 1]} : vector<16x32xf32> to vector<8x8xf32>
    %64 = arith.truncf %61 : vector<8x8xf32> to vector<8x8xbf16>
    %65 = arith.truncf %62 : vector<8x8xf32> to vector<8x8xbf16>
    %cst_27 = arith.constant dense<0.000000e+00> : vector<8x8xf32>
    %66 = tpu.matmul %64, %65, %cst_27 {dimension_numbers = #tpu.dot_dimension_numbers<[1], [1], [0], [0], [0, 0, 1, 0], [], []>} : vector<8x8xbf16>, vector<8x8xbf16>, vector<8x8xf32> -> vector<8x8xf32>
    %67 = arith.addf %66, %18 : vector<8x8xf32>
    %cst_28 = arith.constant dense<0xFF800000> : vector<8xf32>
    %68 = vector.multi_reduction <maximumf>, %67, %cst_28 [1] : vector<8x8xf32> to vector<8xf32>
    %69 = vector.shape_cast %68 : vector<8xf32> to vector<8x1xf32>
    %70 = vector.broadcast %69 : vector<8x1xf32> to vector<8x8xf32>
    %71 = arith.subf %67, %70 : vector<8x8xf32>
    %72 = math.exp %71 : vector<8x8xf32>
    %cst_29 = arith.constant dense<0.000000e+00> : vector<8xf32>
    %73 = vector.multi_reduction <add>, %72, %cst_29 [1] : vector<8x8xf32> to vector<8xf32>
    %74 = vector.shape_cast %73 : vector<8xf32> to vector<8x1xf32>
    %75 = tpu.reciprocal %74 {approx = true} : vector<8x1xf32> -> vector<8x1xf32>
    %76 = vector.broadcast %75 : vector<8x1xf32> to vector<8x8xf32>
    %77 = arith.mulf %72, %76 : vector<8x8xf32>
    %78 = arith.truncf %77 : vector<8x8xf32> to vector<8x8xbf16>
    %79 = arith.truncf %63 : vector<8x8xf32> to vector<8x8xbf16>
    %cst_30 = arith.constant dense<0.000000e+00> : vector<8x8xf32>
    %80 = tpu.matmul %78, %79, %cst_30 {dimension_numbers = #tpu.dot_dimension_numbers<[1], [0], [0], [1], [0, 0, 1, 1], [], []>} : vector<8x8xbf16>, vector<8x8xbf16>, vector<8x8xf32> -> vector<8x8xf32>
    %c0_31 = arith.constant 0 : index
    %c16 = arith.constant 16 : index
    %81 = vector.load %arg13[%c0_31, %c16] : memref<16x32xf32, #tpu.memory_space<vmem>>, vector<8x8xf32>
    tpu.vector_store %arg13[%c0_31, %c16], %80 {strides = array<i32>} : memref<16x32xf32, #tpu.memory_space<vmem>>, vector<8x8xf32>,
    %82 = vector.extract_strided_slice %16 {offsets = [0, 24], sizes = [8, 8], strides = [1, 1]} : vector<16x32xf32> to vector<8x8xf32>
    %83 = vector.extract_strided_slice %13 {offsets = [0, 24], sizes = [8, 8], strides = [1, 1]} : vector<16x32xf32> to vector<8x8xf32>
    %84 = vector.extract_strided_slice %14 {offsets = [0, 24], sizes = [8, 8], strides = [1, 1]} : vector<16x32xf32> to vector<8x8xf32>
    %85 = arith.truncf %82 : vector<8x8xf32> to vector<8x8xbf16>
    %86 = arith.truncf %83 : vector<8x8xf32> to vector<8x8xbf16>
    %cst_32 = arith.constant dense<0.000000e+00> : vector<8x8xf32>
    %87 = tpu.matmul %85, %86, %cst_32 {dimension_numbers = #tpu.dot_dimension_numbers<[1], [1], [0], [0], [0, 0, 1, 0], [], []>} : vector<8x8xbf16>, vector<8x8xbf16>, vector<8x8xf32> -> vector<8x8xf32>
    %88 = arith.addf %87, %18 : vector<8x8xf32>
    %cst_33 = arith.constant dense<0xFF800000> : vector<8xf32>
    %89 = vector.multi_reduction <maximumf>, %88, %cst_33 [1] : vector<8x8xf32> to vector<8xf32>
    %90 = vector.shape_cast %89 : vector<8xf32> to vector<8x1xf32>
    %91 = vector.broadcast %90 : vector<8x1xf32> to vector<8x8xf32>
    %92 = arith.subf %88, %91 : vector<8x8xf32>
    %93 = math.exp %92 : vector<8x8xf32>
    %cst_34 = arith.constant dense<0.000000e+00> : vector<8xf32>
    %94 = vector.multi_reduction <add>, %93, %cst_34 [1] : vector<8x8xf32> to vector<8xf32>
    %95 = vector.shape_cast %94 : vector<8xf32> to vector<8x1xf32>
    %96 = tpu.reciprocal %95 {approx = true} : vector<8x1xf32> -> vector<8x1xf32>
    %97 = vector.broadcast %96 : vector<8x1xf32> to vector<8x8xf32>
    %98 = arith.mulf %93, %97 : vector<8x8xf32>
    %99 = arith.truncf %98 : vector<8x8xf32> to vector<8x8xbf16>
    %100 = arith.truncf %84 : vector<8x8xf32> to vector<8x8xbf16>
    %cst_35 = arith.constant dense<0.000000e+00> : vector<8x8xf32>
    %101 = tpu.matmul %99, %100, %cst_35 {dimension_numbers = #tpu.dot_dimension_numbers<[1], [0], [0], [1], [0, 0, 1, 1], [], []>} : vector<8x8xbf16>, vector<8x8xbf16>, vector<8x8xf32> -> vector<8x8xf32>
    %c0_36 = arith.constant 0 : index
    %c24 = arith.constant 24 : index
    %102 = vector.load %arg13[%c0_36, %c24] : memref<16x32xf32, #tpu.memory_space<vmem>>, vector<8x8xf32>
    tpu.vector_store %arg13[%c0_36, %c24], %101 {strides = array<i32>} : memref<16x32xf32, #tpu.memory_space<vmem>>, vector<8x8xf32>,
    %c1_37 = arith.constant 1 : index
    %c0_38 = arith.constant 0 : index
    %c0_39 = arith.constant 0 : index
    %103 = vector.load %arg3[%c1_37, %c0_38, %c0_39] : memref<2x8x8xf32, #tpu.memory_space<vmem>>, vector<1x8x8xf32>
    %104 = vector.shape_cast %103 : vector<1x8x8xf32> to vector<8x8xf32>
    %105 = vector.extract_strided_slice %16 {offsets = [8, 0], sizes = [8, 8], strides = [1, 1]} : vector<16x32xf32> to vector<8x8xf32>
    %106 = vector.extract_strided_slice %13 {offsets = [8, 0], sizes = [8, 8], strides = [1, 1]} : vector<16x32xf32> to vector<8x8xf32>
    %107 = vector.extract_strided_slice %14 {offsets = [8, 0], sizes = [8, 8], strides = [1, 1]} : vector<16x32xf32> to vector<8x8xf32>
    %108 = arith.truncf %105 : vector<8x8xf32> to vector<8x8xbf16>
    %109 = arith.truncf %106 : vector<8x8xf32> to vector<8x8xbf16>
    %cst_40 = arith.constant dense<0.000000e+00> : vector<8x8xf32>
    %110 = tpu.matmul %108, %109, %cst_40 {dimension_numbers = #tpu.dot_dimension_numbers<[1], [1], [0], [0], [0, 0, 1, 0], [], []>} : vector<8x8xbf16>, vector<8x8xbf16>, vector<8x8xf32> -> vector<8x8xf32>
    %111 = arith.addf %110, %104 : vector<8x8xf32>
    %cst_41 = arith.constant dense<0xFF800000> : vector<8xf32>
    %112 = vector.multi_reduction <maximumf>, %111, %cst_41 [1] : vector<8x8xf32> to vector<8xf32>
    %113 = vector.shape_cast %112 : vector<8xf32> to vector<8x1xf32>
    %114 = vector.broadcast %113 : vector<8x1xf32> to vector<8x8xf32>
    %115 = arith.subf %111, %114 : vector<8x8xf32>
    %116 = math.exp %115 : vector<8x8xf32>
    %cst_42 = arith.constant dense<0.000000e+00> : vector<8xf32>
    %117 = vector.multi_reduction <add>, %116, %cst_42 [1] : vector<8x8xf32> to vector<8xf32>
    %118 = vector.shape_cast %117 : vector<8xf32> to vector<8x1xf32>
    %119 = tpu.reciprocal %118 {approx = true} : vector<8x1xf32> -> vector<8x1xf32>
    %120 = vector.broadcast %119 : vector<8x1xf32> to vector<8x8xf32>
    %121 = arith.mulf %116, %120 : vector<8x8xf32>
    %122 = arith.truncf %121 : vector<8x8xf32> to vector<8x8xbf16>
    %123 = arith.truncf %107 : vector<8x8xf32> to vector<8x8xbf16>
    %cst_43 = arith.constant dense<0.000000e+00> : vector<8x8xf32>
    %124 = tpu.matmul %122, %123, %cst_43 {dimension_numbers = #tpu.dot_dimension_numbers<[1], [0], [0], [1], [0, 0, 1, 1], [], []>} : vector<8x8xbf16>, vector<8x8xbf16>, vector<8x8xf32> -> vector<8x8xf32>
    %c8_44 = arith.constant 8 : index
    %c0_45 = arith.constant 0 : index
    %125 = vector.load %arg13[%c8_44, %c0_45] : memref<16x32xf32, #tpu.memory_space<vmem>>, vector<8x8xf32>
    tpu.vector_store %arg13[%c8_44, %c0_45], %124 {strides = array<i32>} : memref<16x32xf32, #tpu.memory_space<vmem>>, vector<8x8xf32>,
    %126 = vector.extract_strided_slice %16 {offsets = [8, 8], sizes = [8, 8], strides = [1, 1]} : vector<16x32xf32> to vector<8x8xf32>
    %127 = vector.extract_strided_slice %13 {offsets = [8, 8], sizes = [8, 8], strides = [1, 1]} : vector<16x32xf32> to vector<8x8xf32>
    %128 = vector.extract_strided_slice %14 {offsets = [8, 8], sizes = [8, 8], strides = [1, 1]} : vector<16x32xf32> to vector<8x8xf32>
    %129 = arith.truncf %126 : vector<8x8xf32> to vector<8x8xbf16>
    %130 = arith.truncf %127 : vector<8x8xf32> to vector<8x8xbf16>
    %cst_46 = arith.constant dense<0.000000e+00> : vector<8x8xf32>
    %131 = tpu.matmul %129, %130, %cst_46 {dimension_numbers = #tpu.dot_dimension_numbers<[1], [1], [0], [0], [0, 0, 1, 0], [], []>} : vector<8x8xbf16>, vector<8x8xbf16>, vector<8x8xf32> -> vector<8x8xf32>
    %132 = arith.addf %131, %104 : vector<8x8xf32>
    %cst_47 = arith.constant dense<0xFF800000> : vector<8xf32>
    %133 = vector.multi_reduction <maximumf>, %132, %cst_47 [1] : vector<8x8xf32> to vector<8xf32>
    %134 = vector.shape_cast %133 : vector<8xf32> to vector<8x1xf32>
    %135 = vector.broadcast %134 : vector<8x1xf32> to vector<8x8xf32>
    %136 = arith.subf %132, %135 : vector<8x8xf32>
    %137 = math.exp %136 : vector<8x8xf32>
    %cst_48 = arith.constant dense<0.000000e+00> : vector<8xf32>
    %138 = vector.multi_reduction <add>, %137, %cst_48 [1] : vector<8x8xf32> to vector<8xf32>
    %139 = vector.shape_cast %138 : vector<8xf32> to vector<8x1xf32>
    %140 = tpu.reciprocal %139 {approx = true} : vector<8x1xf32> -> vector<8x1xf32>
    %141 = vector.broadcast %140 : vector<8x1xf32> to vector<8x8xf32>
    %142 = arith.mulf %137, %141 : vector<8x8xf32>
    %143 = arith.truncf %142 : vector<8x8xf32> to vector<8x8xbf16>
    %144 = arith.truncf %128 : vector<8x8xf32> to vector<8x8xbf16>
    %cst_49 = arith.constant dense<0.000000e+00> : vector<8x8xf32>
    %145 = tpu.matmul %143, %144, %cst_49 {dimension_numbers = #tpu.dot_dimension_numbers<[1], [0], [0], [1], [0, 0, 1, 1], [], []>} : vector<8x8xbf16>, vector<8x8xbf16>, vector<8x8xf32> -> vector<8x8xf32>
    %c8_50 = arith.constant 8 : index
    %c8_51 = arith.constant 8 : index
    %146 = vector.load %arg13[%c8_50, %c8_51] : memref<16x32xf32, #tpu.memory_space<vmem>>, vector<8x8xf32>
    tpu.vector_store %arg13[%c8_50, %c8_51], %145 {strides = array<i32>} : memref<16x32xf32, #tpu.memory_space<vmem>>, vector<8x8xf32>,
    %147 = vector.extract_strided_slice %16 {offsets = [8, 16], sizes = [8, 8], strides = [1, 1]} : vector<16x32xf32> to vector<8x8xf32>
    %148 = vector.extract_strided_slice %13 {offsets = [8, 16], sizes = [8, 8], strides = [1, 1]} : vector<16x32xf32> to vector<8x8xf32>
    %149 = vector.extract_strided_slice %14 {offsets = [8, 16], sizes = [8, 8], strides = [1, 1]} : vector<16x32xf32> to vector<8x8xf32>
    %150 = arith.truncf %147 : vector<8x8xf32> to vector<8x8xbf16>
    %151 = arith.truncf %148 : vector<8x8xf32> to vector<8x8xbf16>
    %cst_52 = arith.constant dense<0.000000e+00> : vector<8x8xf32>
    %152 = tpu.matmul %150, %151, %cst_52 {dimension_numbers = #tpu.dot_dimension_numbers<[1], [1], [0], [0], [0, 0, 1, 0], [], []>} : vector<8x8xbf16>, vector<8x8xbf16>, vector<8x8xf32> -> vector<8x8xf32>
    %153 = arith.addf %152, %104 : vector<8x8xf32>
    %cst_53 = arith.constant dense<0xFF800000> : vector<8xf32>
    %154 = vector.multi_reduction <maximumf>, %153, %cst_53 [1] : vector<8x8xf32> to vector<8xf32>
    %155 = vector.shape_cast %154 : vector<8xf32> to vector<8x1xf32>
    %156 = vector.broadcast %155 : vector<8x1xf32> to vector<8x8xf32>
    %157 = arith.subf %153, %156 : vector<8x8xf32>
    %158 = math.exp %157 : vector<8x8xf32>
    %cst_54 = arith.constant dense<0.000000e+00> : vector<8xf32>
    %159 = vector.multi_reduction <add>, %158, %cst_54 [1] : vector<8x8xf32> to vector<8xf32>
    %160 = vector.shape_cast %159 : vector<8xf32> to vector<8x1xf32>
    %161 = tpu.reciprocal %160 {approx = true} : vector<8x1xf32> -> vector<8x1xf32>
    %162 = vector.broadcast %161 : vector<8x1xf32> to vector<8x8xf32>
    %163 = arith.mulf %158, %162 : vector<8x8xf32>
    %164 = arith.truncf %163 : vector<8x8xf32> to vector<8x8xbf16>
    %165 = arith.truncf %149 : vector<8x8xf32> to vector<8x8xbf16>
    %cst_55 = arith.constant dense<0.000000e+00> : vector<8x8xf32>
    %166 = tpu.matmul %164, %165, %cst_55 {dimension_numbers = #tpu.dot_dimension_numbers<[1], [0], [0], [1], [0, 0, 1, 1], [], []>} : vector<8x8xbf16>, vector<8x8xbf16>, vector<8x8xf32> -> vector<8x8xf32>
    %c8_56 = arith.constant 8 : index
    %c16_57 = arith.constant 16 : index
    %167 = vector.load %arg13[%c8_56, %c16_57] : memref<16x32xf32, #tpu.memory_space<vmem>>, vector<8x8xf32>
    tpu.vector_store %arg13[%c8_56, %c16_57], %166 {strides = array<i32>} : memref<16x32xf32, #tpu.memory_space<vmem>>, vector<8x8xf32>,
    %168 = vector.extract_strided_slice %16 {offsets = [8, 24], sizes = [8, 8], strides = [1, 1]} : vector<16x32xf32> to vector<8x8xf32>
    %169 = vector.extract_strided_slice %13 {offsets = [8, 24], sizes = [8, 8], strides = [1, 1]} : vector<16x32xf32> to vector<8x8xf32>
    %170 = vector.extract_strided_slice %14 {offsets = [8, 24], sizes = [8, 8], strides = [1, 1]} : vector<16x32xf32> to vector<8x8xf32>
    %171 = arith.truncf %168 : vector<8x8xf32> to vector<8x8xbf16>
    %172 = arith.truncf %169 : vector<8x8xf32> to vector<8x8xbf16>
    %cst_58 = arith.constant dense<0.000000e+00> : vector<8x8xf32>
    %173 = tpu.matmul %171, %172, %cst_58 {dimension_numbers = #tpu.dot_dimension_numbers<[1], [1], [0], [0], [0, 0, 1, 0], [], []>} : vector<8x8xbf16>, vector<8x8xbf16>, vector<8x8xf32> -> vector<8x8xf32>
    %174 = arith.addf %173, %104 : vector<8x8xf32>
    %cst_59 = arith.constant dense<0xFF800000> : vector<8xf32>
    %175 = vector.multi_reduction <maximumf>, %174, %cst_59 [1] : vector<8x8xf32> to vector<8xf32>
    %176 = vector.shape_cast %175 : vector<8xf32> to vector<8x1xf32>
    %177 = vector.broadcast %176 : vector<8x1xf32> to vector<8x8xf32>
    %178 = arith.subf %174, %177 : vector<8x8xf32>
    %179 = math.exp %178 : vector<8x8xf32>
    %cst_60 = arith.constant dense<0.000000e+00> : vector<8xf32>
    %180 = vector.multi_reduction <add>, %179, %cst_60 [1] : vector<8x8xf32> to vector<8xf32>
    %181 = vector.shape_cast %180 : vector<8xf32> to vector<8x1xf32>
    %182 = tpu.reciprocal %181 {approx = true} : vector<8x1xf32> -> vector<8x1xf32>
    %183 = vector.broadcast %182 : vector<8x1xf32> to vector<8x8xf32>
    %184 = arith.mulf %179, %183 : vector<8x8xf32>
    %185 = arith.truncf %184 : vector<8x8xf32> to vector<8x8xbf16>
    %186 = arith.truncf %170 : vector<8x8xf32> to vector<8x8xbf16>
    %cst_61 = arith.constant dense<0.000000e+00> : vector<8x8xf32>
    %187 = tpu.matmul %185, %186, %cst_61 {dimension_numbers = #tpu.dot_dimension_numbers<[1], [0], [0], [1], [0, 0, 1, 1], [], []>} : vector<8x8xbf16>, vector<8x8xbf16>, vector<8x8xf32> -> vector<8x8xf32>
    %c8_62 = arith.constant 8 : index
    %c24_63 = arith.constant 24 : index
    %188 = vector.load %arg13[%c8_62, %c24_63] : memref<16x32xf32, #tpu.memory_space<vmem>>, vector<8x8xf32>
    tpu.vector_store %arg13[%c8_62, %c24_63], %187 {strides = array<i32>} : memref<16x32xf32, #tpu.memory_space<vmem>>, vector<8x8xf32>,
    %c0_64 = arith.constant 0 : index
    %c0_65 = arith.constant 0 : index
    %189 = vector.load %arg13[%c0_64, %c0_65] : memref<16x32xf32, #tpu.memory_space<vmem>>, vector<16x32xf32>
    %190 = arith.truncf %189 : vector<16x32xf32> to vector<16x32xbf16>
    %c0_66 = arith.constant 0 : index
    %c0_67 = arith.constant 0 : index
    %c0_68 = arith.constant 0 : index
    %191 = vector.load %arg6[%c0_66, %c0_67, %c0_68] : memref<2x32x32xbf16, #tpu.memory_space<vmem>>, vector<1x32x32xbf16>
    %192 = vector.shape_cast %191 : vector<1x32x32xbf16> to vector<32x32xbf16>
    %cst_69 = arith.constant dense<0.000000e+00> : vector<16x32xf32>
    %193 = tpu.matmul %190, %192, %cst_69 {dimension_numbers = #tpu.dot_dimension_numbers<[1], [0], [0], [1], [0, 0, 1, 1], [], []>} : vector<16x32xbf16>, vector<32x32xbf16>, vector<16x32xf32> -> vector<16x32xf32>
    %c2 = arith.constant 2 : index
    %c0_70 = arith.constant 0 : index
    %194 = vector.load %arg8[%c2, %c0_70] : memref<5x32xf32, #tpu.memory_space<vmem>>, vector<1x32xf32>
    %195 = vector.broadcast %194 : vector<1x32xf32> to vector<16x32xf32>
    %196 = arith.addf %193, %195 : vector<16x32xf32>
    %197 = arith.addf %196, %0 : vector<16x32xf32>
    %cst_71 = arith.constant dense<0.000000e+00> : vector<16xf32>
    %198 = vector.multi_reduction <add>, %197, %cst_71 [1] : vector<16x32xf32> to vector<16xf32>
    %199 = vector.shape_cast %198 : vector<16xf32> to vector<16x1xf32>
    %cst_72 = arith.constant 3.200000e+01 : f32
    %200 = vector.broadcast %cst_72 : f32 to vector<16x1xf32>
    %201 = arith.divf %199, %200 : vector<16x1xf32>
    %202 = vector.broadcast %201 : vector<16x1xf32> to vector<16x32xf32>
    %203 = arith.subf %197, %202 : vector<16x32xf32>
    %204 = arith.mulf %203, %203 : vector<16x32xf32>
    %cst_73 = arith.constant dense<0.000000e+00> : vector<16xf32>
    %205 = vector.multi_reduction <add>, %204, %cst_73 [1] : vector<16x32xf32> to vector<16xf32>
    %206 = vector.shape_cast %205 : vector<16xf32> to vector<16x1xf32>
    %cst_74 = arith.constant 3.200000e+01 : f32
    %207 = vector.broadcast %cst_74 : f32 to vector<16x1xf32>
    %208 = arith.divf %206, %207 : vector<16x1xf32>
    %cst_75 = arith.constant 9.99999974E-6 : f32
    %209 = vector.broadcast %cst_75 : f32 to vector<16x1xf32>
    %210 = arith.addf %208, %209 : vector<16x1xf32>
    %211 = math.rsqrt %210 : vector<16x1xf32>
    %212 = vector.broadcast %211 : vector<16x1xf32> to vector<16x32xf32>
    %213 = arith.mulf %203, %212 : vector<16x32xf32>
    %214 = vector.broadcast %2 : vector<1x32xf32> to vector<16x32xf32>
    %215 = arith.mulf %213, %214 : vector<16x32xf32>
    %216 = vector.broadcast %3 : vector<1x32xf32> to vector<16x32xf32>
    %217 = arith.addf %215, %216 : vector<16x32xf32>
    %218 = arith.truncf %217 : vector<16x32xf32> to vector<16x32xbf16>
    %c1_76 = arith.constant 1 : index
    %c0_77 = arith.constant 0 : index
    %c0_78 = arith.constant 0 : index
    %219 = vector.load %arg5[%c1_76, %c0_77, %c0_78] : memref<2x32x96xbf16, #tpu.memory_space<vmem>>, vector<1x32x32xbf16>
    %220 = vector.shape_cast %219 : vector<1x32x32xbf16> to vector<32x32xbf16>
    %cst_79 = arith.constant dense<0.000000e+00> : vector<16x32xf32>
    %221 = tpu.matmul %218, %220, %cst_79 {dimension_numbers = #tpu.dot_dimension_numbers<[1], [0], [0], [1], [0, 0, 1, 1], [], []>} : vector<16x32xbf16>, vector<32x32xbf16>, vector<16x32xf32> -> vector<16x32xf32>
    %c1_80 = arith.constant 1 : index
    %c0_81 = arith.constant 0 : index
    %222 = vector.load %arg7[%c1_80, %c0_81] : memref<2x96xf32, #tpu.memory_space<vmem>>, vector<1x32xf32>
    %223 = vector.broadcast %222 : vector<1x32xf32> to vector<16x32xf32>
    %224 = arith.addf %221, %223 : vector<16x32xf32>
    %225 = arith.truncf %1 : vector<16x32xf32> to vector<16x32xbf16>
    %c1_82 = arith.constant 1 : index
    %c0_83 = arith.constant 0 : index
    %c32 = arith.constant 32 : index
    %226 = vector.load %arg5[%c1_82, %c0_83, %c32] : memref<2x32x96xbf16, #tpu.memory_space<vmem>>, vector<1x32x64xbf16>
    %227 = vector.shape_cast %226 : vector<1x32x64xbf16> to vector<32x64xbf16>
    %cst_84 = arith.constant dense<0.000000e+00> : vector<16x64xf32>
    %228 = tpu.matmul %225, %227, %cst_84 {dimension_numbers = #tpu.dot_dimension_numbers<[1], [0], [0], [1], [0, 0, 1, 1], [], []>} : vector<16x32xbf16>, vector<32x64xbf16>, vector<16x64xf32> -> vector<16x64xf32>
    %c1_85 = arith.constant 1 : index
    %c32_86 = arith.constant 32 : index
    %229 = vector.load %arg7[%c1_85, %c32_86] : memref<2x96xf32, #tpu.memory_space<vmem>>, vector<1x64xf32>
    %230 = vector.broadcast %229 : vector<1x64xf32> to vector<16x64xf32>
    %231 = arith.addf %228, %230 : vector<16x64xf32>
    %232 = vector.extract_strided_slice %231 {offsets = [0, 0], sizes = [16, 32], strides = [1, 1]} : vector<16x64xf32> to vector<16x32xf32>
    %233 = vector.extract_strided_slice %231 {offsets = [0, 32], sizes = [16, 32], strides = [1, 1]} : vector<16x64xf32> to vector<16x32xf32>
    %cst_87 = arith.constant 0.353553385 : f32
    %234 = vector.broadcast %cst_87 : f32 to vector<16x32xf32>
    %235 = arith.mulf %224, %234 : vector<16x32xf32>
    %c0_88 = arith.constant 0 : index
    %c0_89 = arith.constant 0 : index
    %c0_90 = arith.constant 0 : index
    %236 = vector.load %arg4[%c0_88, %c0_89, %c0_90] : memref<2x8x8xf32, #tpu.memory_space<vmem>>, vector<1x8x8xf32>
    %237 = vector.shape_cast %236 : vector<1x8x8xf32> to vector<8x8xf32>
    %238 = vector.extract_strided_slice %235 {offsets = [0, 0], sizes = [8, 8], strides = [1, 1]} : vector<16x32xf32> to vector<8x8xf32>
    %239 = vector.extract_strided_slice %232 {offsets = [0, 0], sizes = [8, 8], strides = [1, 1]} : vector<16x32xf32> to vector<8x8xf32>
    %240 = vector.extract_strided_slice %233 {offsets = [0, 0], sizes = [8, 8], strides = [1, 1]} : vector<16x32xf32> to vector<8x8xf32>
    %241 = arith.truncf %238 : vector<8x8xf32> to vector<8x8xbf16>
    %242 = arith.truncf %239 : vector<8x8xf32> to vector<8x8xbf16>
    %cst_91 = arith.constant dense<0.000000e+00> : vector<8x8xf32>
    %243 = tpu.matmul %241, %242, %cst_91 {dimension_numbers = #tpu.dot_dimension_numbers<[1], [1], [0], [0], [0, 0, 1, 0], [], []>} : vector<8x8xbf16>, vector<8x8xbf16>, vector<8x8xf32> -> vector<8x8xf32>
    %244 = arith.addf %243, %237 : vector<8x8xf32>
    %cst_92 = arith.constant dense<0xFF800000> : vector<8xf32>
    %245 = vector.multi_reduction <maximumf>, %244, %cst_92 [1] : vector<8x8xf32> to vector<8xf32>
    %246 = vector.shape_cast %245 : vector<8xf32> to vector<8x1xf32>
    %247 = vector.broadcast %246 : vector<8x1xf32> to vector<8x8xf32>
    %248 = arith.subf %244, %247 : vector<8x8xf32>
    %249 = math.exp %248 : vector<8x8xf32>
    %cst_93 = arith.constant dense<0.000000e+00> : vector<8xf32>
    %250 = vector.multi_reduction <add>, %249, %cst_93 [1] : vector<8x8xf32> to vector<8xf32>
    %251 = vector.shape_cast %250 : vector<8xf32> to vector<8x1xf32>
    %252 = tpu.reciprocal %251 {approx = true} : vector<8x1xf32> -> vector<8x1xf32>
    %253 = vector.broadcast %252 : vector<8x1xf32> to vector<8x8xf32>
    %254 = arith.mulf %249, %253 : vector<8x8xf32>
    %255 = arith.truncf %254 : vector<8x8xf32> to vector<8x8xbf16>
    %256 = arith.truncf %240 : vector<8x8xf32> to vector<8x8xbf16>
    %cst_94 = arith.constant dense<0.000000e+00> : vector<8x8xf32>
    %257 = tpu.matmul %255, %256, %cst_94 {dimension_numbers = #tpu.dot_dimension_numbers<[1], [0], [0], [1], [0, 0, 1, 1], [], []>} : vector<8x8xbf16>, vector<8x8xbf16>, vector<8x8xf32> -> vector<8x8xf32>
    %c0_95 = arith.constant 0 : index
    %c0_96 = arith.constant 0 : index
    %258 = vector.load %arg13[%c0_95, %c0_96] : memref<16x32xf32, #tpu.memory_space<vmem>>, vector<8x8xf32>
    tpu.vector_store %arg13[%c0_95, %c0_96], %257 {strides = array<i32>} : memref<16x32xf32, #tpu.memory_space<vmem>>, vector<8x8xf32>,
    %259 = vector.extract_strided_slice %235 {offsets = [0, 8], sizes = [8, 8], strides = [1, 1]} : vector<16x32xf32> to vector<8x8xf32>
    %260 = vector.extract_strided_slice %232 {offsets = [0, 8], sizes = [8, 8], strides = [1, 1]} : vector<16x32xf32> to vector<8x8xf32>
    %261 = vector.extract_strided_slice %233 {offsets = [0, 8], sizes = [8, 8], strides = [1, 1]} : vector<16x32xf32> to vector<8x8xf32>
    %262 = arith.truncf %259 : vector<8x8xf32> to vector<8x8xbf16>
    %263 = arith.truncf %260 : vector<8x8xf32> to vector<8x8xbf16>
    %cst_97 = arith.constant dense<0.000000e+00> : vector<8x8xf32>
    %264 = tpu.matmul %262, %263, %cst_97 {dimension_numbers = #tpu.dot_dimension_numbers<[1], [1], [0], [0], [0, 0, 1, 0], [], []>} : vector<8x8xbf16>, vector<8x8xbf16>, vector<8x8xf32> -> vector<8x8xf32>
    %265 = arith.addf %264, %237 : vector<8x8xf32>
    %cst_98 = arith.constant dense<0xFF800000> : vector<8xf32>
    %266 = vector.multi_reduction <maximumf>, %265, %cst_98 [1] : vector<8x8xf32> to vector<8xf32>
    %267 = vector.shape_cast %266 : vector<8xf32> to vector<8x1xf32>
    %268 = vector.broadcast %267 : vector<8x1xf32> to vector<8x8xf32>
    %269 = arith.subf %265, %268 : vector<8x8xf32>
    %270 = math.exp %269 : vector<8x8xf32>
    %cst_99 = arith.constant dense<0.000000e+00> : vector<8xf32>
    %271 = vector.multi_reduction <add>, %270, %cst_99 [1] : vector<8x8xf32> to vector<8xf32>
    %272 = vector.shape_cast %271 : vector<8xf32> to vector<8x1xf32>
    %273 = tpu.reciprocal %272 {approx = true} : vector<8x1xf32> -> vector<8x1xf32>
    %274 = vector.broadcast %273 : vector<8x1xf32> to vector<8x8xf32>
    %275 = arith.mulf %270, %274 : vector<8x8xf32>
    %276 = arith.truncf %275 : vector<8x8xf32> to vector<8x8xbf16>
    %277 = arith.truncf %261 : vector<8x8xf32> to vector<8x8xbf16>
    %cst_100 = arith.constant dense<0.000000e+00> : vector<8x8xf32>
    %278 = tpu.matmul %276, %277, %cst_100 {dimension_numbers = #tpu.dot_dimension_numbers<[1], [0], [0], [1], [0, 0, 1, 1], [], []>} : vector<8x8xbf16>, vector<8x8xbf16>, vector<8x8xf32> -> vector<8x8xf32>
    %c0_101 = arith.constant 0 : index
    %c8_102 = arith.constant 8 : index
    %279 = vector.load %arg13[%c0_101, %c8_102] : memref<16x32xf32, #tpu.memory_space<vmem>>, vector<8x8xf32>
    tpu.vector_store %arg13[%c0_101, %c8_102], %278 {strides = array<i32>} : memref<16x32xf32, #tpu.memory_space<vmem>>, vector<8x8xf32>,
    %280 = vector.extract_strided_slice %235 {offsets = [0, 16], sizes = [8, 8], strides = [1, 1]} : vector<16x32xf32> to vector<8x8xf32>
    %281 = vector.extract_strided_slice %232 {offsets = [0, 16], sizes = [8, 8], strides = [1, 1]} : vector<16x32xf32> to vector<8x8xf32>
    %282 = vector.extract_strided_slice %233 {offsets = [0, 16], sizes = [8, 8], strides = [1, 1]} : vector<16x32xf32> to vector<8x8xf32>
    %283 = arith.truncf %280 : vector<8x8xf32> to vector<8x8xbf16>
    %284 = arith.truncf %281 : vector<8x8xf32> to vector<8x8xbf16>
    %cst_103 = arith.constant dense<0.000000e+00> : vector<8x8xf32>
    %285 = tpu.matmul %283, %284, %cst_103 {dimension_numbers = #tpu.dot_dimension_numbers<[1], [1], [0], [0], [0, 0, 1, 0], [], []>} : vector<8x8xbf16>, vector<8x8xbf16>, vector<8x8xf32> -> vector<8x8xf32>
    %286 = arith.addf %285, %237 : vector<8x8xf32>
    %cst_104 = arith.constant dense<0xFF800000> : vector<8xf32>
    %287 = vector.multi_reduction <maximumf>, %286, %cst_104 [1] : vector<8x8xf32> to vector<8xf32>
    %288 = vector.shape_cast %287 : vector<8xf32> to vector<8x1xf32>
    %289 = vector.broadcast %288 : vector<8x1xf32> to vector<8x8xf32>
    %290 = arith.subf %286, %289 : vector<8x8xf32>
    %291 = math.exp %290 : vector<8x8xf32>
    %cst_105 = arith.constant dense<0.000000e+00> : vector<8xf32>
    %292 = vector.multi_reduction <add>, %291, %cst_105 [1] : vector<8x8xf32> to vector<8xf32>
    %293 = vector.shape_cast %292 : vector<8xf32> to vector<8x1xf32>
    %294 = tpu.reciprocal %293 {approx = true} : vector<8x1xf32> -> vector<8x1xf32>
    %295 = vector.broadcast %294 : vector<8x1xf32> to vector<8x8xf32>
    %296 = arith.mulf %291, %295 : vector<8x8xf32>
    %297 = arith.truncf %296 : vector<8x8xf32> to vector<8x8xbf16>
    %298 = arith.truncf %282 : vector<8x8xf32> to vector<8x8xbf16>
    %cst_106 = arith.constant dense<0.000000e+00> : vector<8x8xf32>
    %299 = tpu.matmul %297, %298, %cst_106 {dimension_numbers = #tpu.dot_dimension_numbers<[1], [0], [0], [1], [0, 0, 1, 1], [], []>} : vector<8x8xbf16>, vector<8x8xbf16>, vector<8x8xf32> -> vector<8x8xf32>
    %c0_107 = arith.constant 0 : index
    %c16_108 = arith.constant 16 : index
    %300 = vector.load %arg13[%c0_107, %c16_108] : memref<16x32xf32, #tpu.memory_space<vmem>>, vector<8x8xf32>
    tpu.vector_store %arg13[%c0_107, %c16_108], %299 {strides = array<i32>} : memref<16x32xf32, #tpu.memory_space<vmem>>, vector<8x8xf32>,
    %301 = vector.extract_strided_slice %235 {offsets = [0, 24], sizes = [8, 8], strides = [1, 1]} : vector<16x32xf32> to vector<8x8xf32>
    %302 = vector.extract_strided_slice %232 {offsets = [0, 24], sizes = [8, 8], strides = [1, 1]} : vector<16x32xf32> to vector<8x8xf32>
    %303 = vector.extract_strided_slice %233 {offsets = [0, 24], sizes = [8, 8], strides = [1, 1]} : vector<16x32xf32> to vector<8x8xf32>
    %304 = arith.truncf %301 : vector<8x8xf32> to vector<8x8xbf16>
    %305 = arith.truncf %302 : vector<8x8xf32> to vector<8x8xbf16>
    %cst_109 = arith.constant dense<0.000000e+00> : vector<8x8xf32>
    %306 = tpu.matmul %304, %305, %cst_109 {dimension_numbers = #tpu.dot_dimension_numbers<[1], [1], [0], [0], [0, 0, 1, 0], [], []>} : vector<8x8xbf16>, vector<8x8xbf16>, vector<8x8xf32> -> vector<8x8xf32>
    %307 = arith.addf %306, %237 : vector<8x8xf32>
    %cst_110 = arith.constant dense<0xFF800000> : vector<8xf32>
    %308 = vector.multi_reduction <maximumf>, %307, %cst_110 [1] : vector<8x8xf32> to vector<8xf32>
    %309 = vector.shape_cast %308 : vector<8xf32> to vector<8x1xf32>
    %310 = vector.broadcast %309 : vector<8x1xf32> to vector<8x8xf32>
    %311 = arith.subf %307, %310 : vector<8x8xf32>
    %312 = math.exp %311 : vector<8x8xf32>
    %cst_111 = arith.constant dense<0.000000e+00> : vector<8xf32>
    %313 = vector.multi_reduction <add>, %312, %cst_111 [1] : vector<8x8xf32> to vector<8xf32>
    %314 = vector.shape_cast %313 : vector<8xf32> to vector<8x1xf32>
    %315 = tpu.reciprocal %314 {approx = true} : vector<8x1xf32> -> vector<8x1xf32>
    %316 = vector.broadcast %315 : vector<8x1xf32> to vector<8x8xf32>
    %317 = arith.mulf %312, %316 : vector<8x8xf32>
    %318 = arith.truncf %317 : vector<8x8xf32> to vector<8x8xbf16>
    %319 = arith.truncf %303 : vector<8x8xf32> to vector<8x8xbf16>
    %cst_112 = arith.constant dense<0.000000e+00> : vector<8x8xf32>
    %320 = tpu.matmul %318, %319, %cst_112 {dimension_numbers = #tpu.dot_dimension_numbers<[1], [0], [0], [1], [0, 0, 1, 1], [], []>} : vector<8x8xbf16>, vector<8x8xbf16>, vector<8x8xf32> -> vector<8x8xf32>
    %c0_113 = arith.constant 0 : index
    %c24_114 = arith.constant 24 : index
    %321 = vector.load %arg13[%c0_113, %c24_114] : memref<16x32xf32, #tpu.memory_space<vmem>>, vector<8x8xf32>
    tpu.vector_store %arg13[%c0_113, %c24_114], %320 {strides = array<i32>} : memref<16x32xf32, #tpu.memory_space<vmem>>, vector<8x8xf32>,
    %c1_115 = arith.constant 1 : index
    %c0_116 = arith.constant 0 : index
    %c0_117 = arith.constant 0 : index
    %322 = vector.load %arg4[%c1_115, %c0_116, %c0_117] : memref<2x8x8xf32, #tpu.memory_space<vmem>>, vector<1x8x8xf32>
    %323 = vector.shape_cast %322 : vector<1x8x8xf32> to vector<8x8xf32>
    %324 = vector.extract_strided_slice %235 {offsets = [8, 0], sizes = [8, 8], strides = [1, 1]} : vector<16x32xf32> to vector<8x8xf32>
    %325 = vector.extract_strided_slice %232 {offsets = [8, 0], sizes = [8, 8], strides = [1, 1]} : vector<16x32xf32> to vector<8x8xf32>
    %326 = vector.extract_strided_slice %233 {offsets = [8, 0], sizes = [8, 8], strides = [1, 1]} : vector<16x32xf32> to vector<8x8xf32>
    %327 = arith.truncf %324 : vector<8x8xf32> to vector<8x8xbf16>
    %328 = arith.truncf %325 : vector<8x8xf32> to vector<8x8xbf16>
    %cst_118 = arith.constant dense<0.000000e+00> : vector<8x8xf32>
    %329 = tpu.matmul %327, %328, %cst_118 {dimension_numbers = #tpu.dot_dimension_numbers<[1], [1], [0], [0], [0, 0, 1, 0], [], []>} : vector<8x8xbf16>, vector<8x8xbf16>, vector<8x8xf32> -> vector<8x8xf32>
    %330 = arith.addf %329, %323 : vector<8x8xf32>
    %cst_119 = arith.constant dense<0xFF800000> : vector<8xf32>
    %331 = vector.multi_reduction <maximumf>, %330, %cst_119 [1] : vector<8x8xf32> to vector<8xf32>
    %332 = vector.shape_cast %331 : vector<8xf32> to vector<8x1xf32>
    %333 = vector.broadcast %332 : vector<8x1xf32> to vector<8x8xf32>
    %334 = arith.subf %330, %333 : vector<8x8xf32>
    %335 = math.exp %334 : vector<8x8xf32>
    %cst_120 = arith.constant dense<0.000000e+00> : vector<8xf32>
    %336 = vector.multi_reduction <add>, %335, %cst_120 [1] : vector<8x8xf32> to vector<8xf32>
    %337 = vector.shape_cast %336 : vector<8xf32> to vector<8x1xf32>
    %338 = tpu.reciprocal %337 {approx = true} : vector<8x1xf32> -> vector<8x1xf32>
    %339 = vector.broadcast %338 : vector<8x1xf32> to vector<8x8xf32>
    %340 = arith.mulf %335, %339 : vector<8x8xf32>
    %341 = arith.truncf %340 : vector<8x8xf32> to vector<8x8xbf16>
    %342 = arith.truncf %326 : vector<8x8xf32> to vector<8x8xbf16>
    %cst_121 = arith.constant dense<0.000000e+00> : vector<8x8xf32>
    %343 = tpu.matmul %341, %342, %cst_121 {dimension_numbers = #tpu.dot_dimension_numbers<[1], [0], [0], [1], [0, 0, 1, 1], [], []>} : vector<8x8xbf16>, vector<8x8xbf16>, vector<8x8xf32> -> vector<8x8xf32>
    %c8_122 = arith.constant 8 : index
    %c0_123 = arith.constant 0 : index
    %344 = vector.load %arg13[%c8_122, %c0_123] : memref<16x32xf32, #tpu.memory_space<vmem>>, vector<8x8xf32>
    tpu.vector_store %arg13[%c8_122, %c0_123], %343 {strides = array<i32>} : memref<16x32xf32, #tpu.memory_space<vmem>>, vector<8x8xf32>,
    %345 = vector.extract_strided_slice %235 {offsets = [8, 8], sizes = [8, 8], strides = [1, 1]} : vector<16x32xf32> to vector<8x8xf32>
    %346 = vector.extract_strided_slice %232 {offsets = [8, 8], sizes = [8, 8], strides = [1, 1]} : vector<16x32xf32> to vector<8x8xf32>
    %347 = vector.extract_strided_slice %233 {offsets = [8, 8], sizes = [8, 8], strides = [1, 1]} : vector<16x32xf32> to vector<8x8xf32>
    %348 = arith.truncf %345 : vector<8x8xf32> to vector<8x8xbf16>
    %349 = arith.truncf %346 : vector<8x8xf32> to vector<8x8xbf16>
    %cst_124 = arith.constant dense<0.000000e+00> : vector<8x8xf32>
    %350 = tpu.matmul %348, %349, %cst_124 {dimension_numbers = #tpu.dot_dimension_numbers<[1], [1], [0], [0], [0, 0, 1, 0], [], []>} : vector<8x8xbf16>, vector<8x8xbf16>, vector<8x8xf32> -> vector<8x8xf32>
    %351 = arith.addf %350, %323 : vector<8x8xf32>
    %cst_125 = arith.constant dense<0xFF800000> : vector<8xf32>
    %352 = vector.multi_reduction <maximumf>, %351, %cst_125 [1] : vector<8x8xf32> to vector<8xf32>
    %353 = vector.shape_cast %352 : vector<8xf32> to vector<8x1xf32>
    %354 = vector.broadcast %353 : vector<8x1xf32> to vector<8x8xf32>
    %355 = arith.subf %351, %354 : vector<8x8xf32>
    %356 = math.exp %355 : vector<8x8xf32>
    %cst_126 = arith.constant dense<0.000000e+00> : vector<8xf32>
    %357 = vector.multi_reduction <add>, %356, %cst_126 [1] : vector<8x8xf32> to vector<8xf32>
    %358 = vector.shape_cast %357 : vector<8xf32> to vector<8x1xf32>
    %359 = tpu.reciprocal %358 {approx = true} : vector<8x1xf32> -> vector<8x1xf32>
    %360 = vector.broadcast %359 : vector<8x1xf32> to vector<8x8xf32>
    %361 = arith.mulf %356, %360 : vector<8x8xf32>
    %362 = arith.truncf %361 : vector<8x8xf32> to vector<8x8xbf16>
    %363 = arith.truncf %347 : vector<8x8xf32> to vector<8x8xbf16>
    %cst_127 = arith.constant dense<0.000000e+00> : vector<8x8xf32>
    %364 = tpu.matmul %362, %363, %cst_127 {dimension_numbers = #tpu.dot_dimension_numbers<[1], [0], [0], [1], [0, 0, 1, 1], [], []>} : vector<8x8xbf16>, vector<8x8xbf16>, vector<8x8xf32> -> vector<8x8xf32>
    %c8_128 = arith.constant 8 : index
    %c8_129 = arith.constant 8 : index
    %365 = vector.load %arg13[%c8_128, %c8_129] : memref<16x32xf32, #tpu.memory_space<vmem>>, vector<8x8xf32>
    tpu.vector_store %arg13[%c8_128, %c8_129], %364 {strides = array<i32>} : memref<16x32xf32, #tpu.memory_space<vmem>>, vector<8x8xf32>,
    %366 = vector.extract_strided_slice %235 {offsets = [8, 16], sizes = [8, 8], strides = [1, 1]} : vector<16x32xf32> to vector<8x8xf32>
    %367 = vector.extract_strided_slice %232 {offsets = [8, 16], sizes = [8, 8], strides = [1, 1]} : vector<16x32xf32> to vector<8x8xf32>
    %368 = vector.extract_strided_slice %233 {offsets = [8, 16], sizes = [8, 8], strides = [1, 1]} : vector<16x32xf32> to vector<8x8xf32>
    %369 = arith.truncf %366 : vector<8x8xf32> to vector<8x8xbf16>
    %370 = arith.truncf %367 : vector<8x8xf32> to vector<8x8xbf16>
    %cst_130 = arith.constant dense<0.000000e+00> : vector<8x8xf32>
    %371 = tpu.matmul %369, %370, %cst_130 {dimension_numbers = #tpu.dot_dimension_numbers<[1], [1], [0], [0], [0, 0, 1, 0], [], []>} : vector<8x8xbf16>, vector<8x8xbf16>, vector<8x8xf32> -> vector<8x8xf32>
    %372 = arith.addf %371, %323 : vector<8x8xf32>
    %cst_131 = arith.constant dense<0xFF800000> : vector<8xf32>
    %373 = vector.multi_reduction <maximumf>, %372, %cst_131 [1] : vector<8x8xf32> to vector<8xf32>
    %374 = vector.shape_cast %373 : vector<8xf32> to vector<8x1xf32>
    %375 = vector.broadcast %374 : vector<8x1xf32> to vector<8x8xf32>
    %376 = arith.subf %372, %375 : vector<8x8xf32>
    %377 = math.exp %376 : vector<8x8xf32>
    %cst_132 = arith.constant dense<0.000000e+00> : vector<8xf32>
    %378 = vector.multi_reduction <add>, %377, %cst_132 [1] : vector<8x8xf32> to vector<8xf32>
    %379 = vector.shape_cast %378 : vector<8xf32> to vector<8x1xf32>
    %380 = tpu.reciprocal %379 {approx = true} : vector<8x1xf32> -> vector<8x1xf32>
    %381 = vector.broadcast %380 : vector<8x1xf32> to vector<8x8xf32>
    %382 = arith.mulf %377, %381 : vector<8x8xf32>
    %383 = arith.truncf %382 : vector<8x8xf32> to vector<8x8xbf16>
    %384 = arith.truncf %368 : vector<8x8xf32> to vector<8x8xbf16>
    %cst_133 = arith.constant dense<0.000000e+00> : vector<8x8xf32>
    %385 = tpu.matmul %383, %384, %cst_133 {dimension_numbers = #tpu.dot_dimension_numbers<[1], [0], [0], [1], [0, 0, 1, 1], [], []>} : vector<8x8xbf16>, vector<8x8xbf16>, vector<8x8xf32> -> vector<8x8xf32>
    %c8_134 = arith.constant 8 : index
    %c16_135 = arith.constant 16 : index
    %386 = vector.load %arg13[%c8_134, %c16_135] : memref<16x32xf32, #tpu.memory_space<vmem>>, vector<8x8xf32>
    tpu.vector_store %arg13[%c8_134, %c16_135], %385 {strides = array<i32>} : memref<16x32xf32, #tpu.memory_space<vmem>>, vector<8x8xf32>,
    %387 = vector.extract_strided_slice %235 {offsets = [8, 24], sizes = [8, 8], strides = [1, 1]} : vector<16x32xf32> to vector<8x8xf32>
    %388 = vector.extract_strided_slice %232 {offsets = [8, 24], sizes = [8, 8], strides = [1, 1]} : vector<16x32xf32> to vector<8x8xf32>
    %389 = vector.extract_strided_slice %233 {offsets = [8, 24], sizes = [8, 8], strides = [1, 1]} : vector<16x32xf32> to vector<8x8xf32>
    %390 = arith.truncf %387 : vector<8x8xf32> to vector<8x8xbf16>
    %391 = arith.truncf %388 : vector<8x8xf32> to vector<8x8xbf16>
    %cst_136 = arith.constant dense<0.000000e+00> : vector<8x8xf32>
    %392 = tpu.matmul %390, %391, %cst_136 {dimension_numbers = #tpu.dot_dimension_numbers<[1], [1], [0], [0], [0, 0, 1, 0], [], []>} : vector<8x8xbf16>, vector<8x8xbf16>, vector<8x8xf32> -> vector<8x8xf32>
    %393 = arith.addf %392, %323 : vector<8x8xf32>
    %cst_137 = arith.constant dense<0xFF800000> : vector<8xf32>
    %394 = vector.multi_reduction <maximumf>, %393, %cst_137 [1] : vector<8x8xf32> to vector<8xf32>
    %395 = vector.shape_cast %394 : vector<8xf32> to vector<8x1xf32>
    %396 = vector.broadcast %395 : vector<8x1xf32> to vector<8x8xf32>
    %397 = arith.subf %393, %396 : vector<8x8xf32>
    %398 = math.exp %397 : vector<8x8xf32>
    %cst_138 = arith.constant dense<0.000000e+00> : vector<8xf32>
    %399 = vector.multi_reduction <add>, %398, %cst_138 [1] : vector<8x8xf32> to vector<8xf32>
    %400 = vector.shape_cast %399 : vector<8xf32> to vector<8x1xf32>
    %401 = tpu.reciprocal %400 {approx = true} : vector<8x1xf32> -> vector<8x1xf32>
    %402 = vector.broadcast %401 : vector<8x1xf32> to vector<8x8xf32>
    %403 = arith.mulf %398, %402 : vector<8x8xf32>
    %404 = arith.truncf %403 : vector<8x8xf32> to vector<8x8xbf16>
    %405 = arith.truncf %389 : vector<8x8xf32> to vector<8x8xbf16>
    %cst_139 = arith.constant dense<0.000000e+00> : vector<8x8xf32>
    %406 = tpu.matmul %404, %405, %cst_139 {dimension_numbers = #tpu.dot_dimension_numbers<[1], [0], [0], [1], [0, 0, 1, 1], [], []>} : vector<8x8xbf16>, vector<8x8xbf16>, vector<8x8xf32> -> vector<8x8xf32>
    %c8_140 = arith.constant 8 : index
    %c24_141 = arith.constant 24 : index
    %407 = vector.load %arg13[%c8_140, %c24_141] : memref<16x32xf32, #tpu.memory_space<vmem>>, vector<8x8xf32>
    tpu.vector_store %arg13[%c8_140, %c24_141], %406 {strides = array<i32>} : memref<16x32xf32, #tpu.memory_space<vmem>>, vector<8x8xf32>,
    %c0_142 = arith.constant 0 : index
    %c0_143 = arith.constant 0 : index
    %408 = vector.load %arg13[%c0_142, %c0_143] : memref<16x32xf32, #tpu.memory_space<vmem>>, vector<16x32xf32>
    %409 = arith.truncf %408 : vector<16x32xf32> to vector<16x32xbf16>
    %c1_144 = arith.constant 1 : index
    %c0_145 = arith.constant 0 : index
    %c0_146 = arith.constant 0 : index
    %410 = vector.load %arg6[%c1_144, %c0_145, %c0_146] : memref<2x32x32xbf16, #tpu.memory_space<vmem>>, vector<1x32x32xbf16>
    %411 = vector.shape_cast %410 : vector<1x32x32xbf16> to vector<32x32xbf16>
    %cst_147 = arith.constant dense<0.000000e+00> : vector<16x32xf32>
    %412 = tpu.matmul %409, %411, %cst_147 {dimension_numbers = #tpu.dot_dimension_numbers<[1], [0], [0], [1], [0, 0, 1, 1], [], []>} : vector<16x32xbf16>, vector<32x32xbf16>, vector<16x32xf32> -> vector<16x32xf32>
    %c3 = arith.constant 3 : index
    %c0_148 = arith.constant 0 : index
    %413 = vector.load %arg8[%c3, %c0_148] : memref<5x32xf32, #tpu.memory_space<vmem>>, vector<1x32xf32>
    %414 = vector.broadcast %413 : vector<1x32xf32> to vector<16x32xf32>
    %415 = arith.addf %412, %414 : vector<16x32xf32>
    %416 = arith.addf %415, %217 : vector<16x32xf32>
    %cst_149 = arith.constant dense<0.000000e+00> : vector<16xf32>
    %417 = vector.multi_reduction <add>, %416, %cst_149 [1] : vector<16x32xf32> to vector<16xf32>
    %418 = vector.shape_cast %417 : vector<16xf32> to vector<16x1xf32>
    %cst_150 = arith.constant 3.200000e+01 : f32
    %419 = vector.broadcast %cst_150 : f32 to vector<16x1xf32>
    %420 = arith.divf %418, %419 : vector<16x1xf32>
    %421 = vector.broadcast %420 : vector<16x1xf32> to vector<16x32xf32>
    %422 = arith.subf %416, %421 : vector<16x32xf32>
    %423 = arith.mulf %422, %422 : vector<16x32xf32>
    %cst_151 = arith.constant dense<0.000000e+00> : vector<16xf32>
    %424 = vector.multi_reduction <add>, %423, %cst_151 [1] : vector<16x32xf32> to vector<16xf32>
    %425 = vector.shape_cast %424 : vector<16xf32> to vector<16x1xf32>
    %cst_152 = arith.constant 3.200000e+01 : f32
    %426 = vector.broadcast %cst_152 : f32 to vector<16x1xf32>
    %427 = arith.divf %425, %426 : vector<16x1xf32>
    %cst_153 = arith.constant 9.99999974E-6 : f32
    %428 = vector.broadcast %cst_153 : f32 to vector<16x1xf32>
    %429 = arith.addf %427, %428 : vector<16x1xf32>
    %430 = math.rsqrt %429 : vector<16x1xf32>
    %431 = vector.broadcast %430 : vector<16x1xf32> to vector<16x32xf32>
    %432 = arith.mulf %422, %431 : vector<16x32xf32>
    %433 = vector.broadcast %2 : vector<1x32xf32> to vector<16x32xf32>
    %434 = arith.mulf %432, %433 : vector<16x32xf32>
    %435 = vector.broadcast %3 : vector<1x32xf32> to vector<16x32xf32>
    %436 = arith.addf %434, %435 : vector<16x32xf32>
    %437 = arith.truncf %436 : vector<16x32xf32> to vector<16x32xbf16>
    %c0_154 = arith.constant 0 : index
    %c0_155 = arith.constant 0 : index
    %438 = vector.load %arg9[%c0_154, %c0_155] : memref<32x2048xbf16, #tpu.memory_space<vmem>>, vector<32x2048xbf16>
    %cst_156 = arith.constant dense<0.000000e+00> : vector<16x2048xf32>
    %439 = tpu.matmul %437, %438, %cst_156 {dimension_numbers = #tpu.dot_dimension_numbers<[1], [0], [0], [1], [0, 0, 1, 1], [], []>} : vector<16x32xbf16>, vector<32x2048xbf16>, vector<16x2048xf32> -> vector<16x2048xf32>
    %c0_157 = arith.constant 0 : index
    %c0_158 = arith.constant 0 : index
    %440 = vector.load %arg10[%c0_157, %c0_158] : memref<1x2048xf32, #tpu.memory_space<vmem>>, vector<1x2048xf32>
    %441 = vector.broadcast %440 : vector<1x2048xf32> to vector<16x2048xf32>
    %442 = arith.addf %439, %441 : vector<16x2048xf32>
    %cst_159 = arith.constant 0.000000e+00 : f32
    %443 = vector.broadcast %cst_159 : f32 to vector<16x2048xf32>
    %444 = arith.maximumf %442, %443 : vector<16x2048xf32>
    %445 = arith.truncf %444 : vector<16x2048xf32> to vector<16x2048xbf16>
    %c0_160 = arith.constant 0 : index
    %c0_161 = arith.constant 0 : index
    %446 = vector.load %arg11[%c0_160, %c0_161] : memref<2048x32xbf16, #tpu.memory_space<vmem>>, vector<2048x32xbf16>
    %cst_162 = arith.constant dense<0.000000e+00> : vector<16x32xf32>
    %447 = tpu.matmul %445, %446, %cst_162 {dimension_numbers = #tpu.dot_dimension_numbers<[1], [0], [0], [1], [0, 0, 1, 1], [], []>} : vector<16x2048xbf16>, vector<2048x32xbf16>, vector<16x32xf32> -> vector<16x32xf32>
    %448 = vector.broadcast %4 : vector<1x32xf32> to vector<16x32xf32>
    %449 = arith.addf %447, %448 : vector<16x32xf32>
    %450 = arith.addf %449, %436 : vector<16x32xf32>
    %cst_163 = arith.constant dense<0.000000e+00> : vector<16xf32>
    %451 = vector.multi_reduction <add>, %450, %cst_163 [1] : vector<16x32xf32> to vector<16xf32>
    %452 = vector.shape_cast %451 : vector<16xf32> to vector<16x1xf32>
    %cst_164 = arith.constant 3.200000e+01 : f32
    %453 = vector.broadcast %cst_164 : f32 to vector<16x1xf32>
    %454 = arith.divf %452, %453 : vector<16x1xf32>
    %455 = vector.broadcast %454 : vector<16x1xf32> to vector<16x32xf32>
    %456 = arith.subf %450, %455 : vector<16x32xf32>
    %457 = arith.mulf %456, %456 : vector<16x32xf32>
    %cst_165 = arith.constant dense<0.000000e+00> : vector<16xf32>
    %458 = vector.multi_reduction <add>, %457, %cst_165 [1] : vector<16x32xf32> to vector<16xf32>
    %459 = vector.shape_cast %458 : vector<16xf32> to vector<16x1xf32>
    %cst_166 = arith.constant 3.200000e+01 : f32
    %460 = vector.broadcast %cst_166 : f32 to vector<16x1xf32>
    %461 = arith.divf %459, %460 : vector<16x1xf32>
    %cst_167 = arith.constant 9.99999974E-6 : f32
    %462 = vector.broadcast %cst_167 : f32 to vector<16x1xf32>
    %463 = arith.addf %461, %462 : vector<16x1xf32>
    %464 = math.rsqrt %463 : vector<16x1xf32>
    %465 = vector.broadcast %464 : vector<16x1xf32> to vector<16x32xf32>
    %466 = arith.mulf %456, %465 : vector<16x32xf32>
    %467 = vector.broadcast %2 : vector<1x32xf32> to vector<16x32xf32>
    %468 = arith.mulf %466, %467 : vector<16x32xf32>
    %469 = vector.broadcast %3 : vector<1x32xf32> to vector<16x32xf32>
    %470 = arith.addf %468, %469 : vector<16x32xf32>
    %c0_168 = arith.constant 0 : index
    %c0_169 = arith.constant 0 : index
    %471 = vector.load %arg12[%c0_168, %c0_169] : memref<16x32xf32, #tpu.memory_space<vmem>>, vector<16x32xf32>
    tpu.vector_store %arg12[%c0_168, %c0_169], %470 {strides = array<i32>} : memref<16x32xf32, #tpu.memory_space<vmem>>, vector<16x32xf32>,
    return
  }
  func.func @transform_0(%arg0: i32) -> (i32, i32) {
    %c0_i32 = arith.constant 0 : i32
    %c0_i32_0 = arith.constant 0 : i32
    return %arg0, %c0_i32 : i32, i32
  }
  func.func @transform_1(%arg0: i32) -> (i32, i32) {
    %c0_i32 = arith.constant 0 : i32
    %c0_i32_0 = arith.constant 0 : i32
    return %arg0, %c0_i32 : i32, i32
  }
  func.func @transform_2(%arg0: i32) -> (i32, i32, i32) {
    %c0_i32 = arith.constant 0 : i32
    %c0_i32_0 = arith.constant 0 : i32
    %c0_i32_1 = arith.constant 0 : i32
    return %arg0, %c0_i32, %c0_i32_0 : i32, i32, i32
  }
  func.func @transform_3(%arg0: i32) -> (i32, i32, i32) {
    %c0_i32 = arith.constant 0 : i32
    %c0_i32_0 = arith.constant 0 : i32
    %c0_i32_1 = arith.constant 0 : i32
    return %arg0, %c0_i32, %c0_i32_0 : i32, i32, i32
  }
  func.func @transform_4(%arg0: i32) -> (i32, i32, i32) {
    %c0_i32 = arith.constant 0 : i32
    %c0_i32_0 = arith.constant 0 : i32
    %c0_i32_1 = arith.constant 0 : i32
    %c0_i32_2 = arith.constant 0 : i32
    return %c0_i32, %c0_i32_0, %c0_i32_1 : i32, i32, i32
  }
  func.func @transform_5(%arg0: i32) -> (i32, i32, i32) {
    %c0_i32 = arith.constant 0 : i32
    %c0_i32_0 = arith.constant 0 : i32
    %c0_i32_1 = arith.constant 0 : i32
    %c0_i32_2 = arith.constant 0 : i32
    return %c0_i32, %c0_i32_0, %c0_i32_1 : i32, i32, i32
  }
  func.func @transform_6(%arg0: i32) -> (i32, i32) {
    %c0_i32 = arith.constant 0 : i32
    %c0_i32_0 = arith.constant 0 : i32
    %c0_i32_1 = arith.constant 0 : i32
    return %c0_i32, %c0_i32_0 : i32, i32
  }
  func.func @transform_7(%arg0: i32) -> (i32, i32) {
    %c0_i32 = arith.constant 0 : i32
    %c0_i32_0 = arith.constant 0 : i32
    %c0_i32_1 = arith.constant 0 : i32
    return %c0_i32, %c0_i32_0 : i32, i32
  }
  func.func @transform_8(%arg0: i32) -> (i32, i32) {
    %c0_i32 = arith.constant 0 : i32
    %c0_i32_0 = arith.constant 0 : i32
    %c0_i32_1 = arith.constant 0 : i32
    return %c0_i32, %c0_i32_0 : i32, i32
  }
  func.func @transform_9(%arg0: i32) -> (i32, i32) {
    %c0_i32 = arith.constant 0 : i32
    %c0_i32_0 = arith.constant 0 : i32
    %c0_i32_1 = arith.constant 0 : i32
    return %c0_i32, %c0_i32_0 : i32, i32
  }
  func.func @transform_10(%arg0: i32) -> (i32, i32) {
    %c0_i32 = arith.constant 0 : i32
    %c0_i32_0 = arith.constant 0 : i32
    %c0_i32_1 = arith.constant 0 : i32
    return %c0_i32, %c0_i32_0 : i32, i32
  }
  func.func @transform_11(%arg0: i32) -> (i32, i32) {
    %c0_i32 = arith.constant 0 : i32
    %c0_i32_0 = arith.constant 0 : i32
    return %arg0, %c0_i32 : i32, i32
  }
}

</mosaic_0001>

<bundles_post_ra>
// kernel: tpu_custom_call.1
= control target key start
LH: loop header
LB: loop body
LE: loop exit
PB: predicated region body
PF: predicated region fallthrough
CT: control target
= control target key end

     0   :  { %s5315_s0 = inlined_call_operand.vmem [shape: f32[16,32], index: 0, kind: input, shape index: {}]   ;;  %s5316_s1 = inlined_call_operand.vmem [shape: f32[16,32], index: 1, kind: input, shape index: {}]   ;;  %s5317_s2 = inlined_call_operand.vmem [shape: f32[2,8,8], index: 2, kind: input, shape index: {}]   ;;  %s5318_s3 = inlined_call_operand.vmem [shape: f32[2,8,8], index: 3, kind: input, shape index: {}]   ;;  %s5319_s4 = inlined_call_operand.vmem [shape: bf16[2,32,96], index: 4, kind: input, shape index: {}]   ;;  %s5320_s5 = inlined_call_operand.vmem [shape: bf16[2,32,32], index: 5, kind: input, shape index: {}]   ;;  %s5321_s6 = inlined_call_operand.vmem [shape: f32[2,96], index: 6, kind: input, shape index: {}]   ;;  %s5322_s7 = inlined_call_operand.vmem [shape: f32[5,32], index: 7, kind: input, shape index: {}]   ;;  %s5323_s8 = inlined_call_operand.vmem [shape: bf16[32,2048], index: 8, kind: input, shape index: {}]   ;;  %s5324_s9 = inlined_call_operand.vmem [shape: f32[1,2048], index: 9, kind: input, shape index: {}]   ;;  %s5325_s10 = inlined_call_operand.vmem [shape: bf16[2048,32], index: 10, kind: input, shape index: {}]   ;;  %s5326_s11 = inlined_call_operand.hbm [shape: f32[16,32], index: 11, kind: output, shape index: {}]  }
   0x1   :  { %v3873_v0 = vld [vmem:[%s5319_s4 + $0x8] sm:$0xff]  ;;  %v3872_v1 = vld [vmem:[%s5319_s4] sm:$0xff] }
   0x2   :  { %v4256_v2 = vld [vmem:[%s5315_s0] sm:$0xff]  ;;  %v4261_v3 = vld [vmem:[%s5315_s0 + $0x8] sm:$0xff]  ;;  %76 = vmatpush.bf16.msra.mxu0 %v3873_v0 }
   0x3   :  { %16 = vsyncpa [#allocation4], 0  ;;  %v47_v4 = vpack.c.bf16 %v4261_v3, %v4256_v2  ;;  %vm66_vm0 = vcmask 261120   ;;  %v4057_v5 = vld [vmem:[%s5321_s6] ss:$0 sm:$0xff]  ;;  %s4170_s0 = smov 96  }
   0x4   :  { %s4171_s27 = smov 104   ;;  %s4172_s28 = smov 120   ;;  %vm92_vm1 = vcmask 64512   ;;  %v86_v38 = vld [vmem:[%s5317_s2] sm:$0xff]  ;;  %v3154_v51 = vld [vmem:[%s5317_s2 + $0x8] sm:$0xff]  ;;  %vm129_vm2 = vcmask 1043456  }
   0x5   :  { %s4173_s29 = smov 88   ;;  %s4174_s30 = smov 80   ;;  %vm208_vm3 = vcmask 130112   ;;  %vm270_vm4 = vcmask 195712   ;;  %vm332_vm5 = vcmask 261312  }
   0x6   :  { %77 = vmatpush.bf16.msra.mxu0 %v3872_v1  ;;  %s4175_s12 = smov 72   ;;  %s4176_s13 = smov 112  }
   0x7   :  { %s4177_s14 = smov 56   ;;  %s4178_s19 = smov 64  }
   0x8   :  { %s4179_s2 = smov 48   ;;  %s4180_s20 = smov 40  }
   0x9   :  { %3145 = vmatmul.msk.bf16.vlgmr.msra.gmra.mxu0 %vm66_vm0, %v47_v4  ;;  %s4181_s21 = smov 16   ;;  %s4182_s22 = smov 8  }
   0xa   :  { %s4183_s23 = smov 24  }
  0x86   :  { %v79_v6 = vpop.f32.mrf.mxu0 }
  0x87   :  { %v80_v7 = vadd.f32 %v4057_v5, %v79_v6 }
  0x89   :  { %v84_v8 = vmul.f32 0.35355338, %v80_v7  ;;  %v4269_v9 = vpack.c.bf16 %v80_v7, %v80_v7 }
  0x8b   :  { %v87_v10 = vpack.c.bf16 %v84_v8, %v84_v8  ;;  %90 = vrot.lane.b32.xlu0 %v4269_v9, %s4170_s0 }
  0x8d   :  { %272 = vrot.lane.b32.xlu2 %v87_v10, %s4171_s27  ;;  %148 = vrot.lane.b32.xlu1 %v87_v10, %s4172_s28 }
  0x8e   :  { %v81_v11 = vpop.f32.mrf.mxu0 }
  0x8f   :  { %v82_v12 = vadd.f32 %v4057_v5, %v81_v11 }
  0x91   :  { %v85_v13 = vmul.f32 0.35355338, %v82_v12  ;;  %v4281_v14 = vpack.c.bf16 %v82_v12, %v82_v12 }
  0x93   :  { %150 = vrot.lane.b32.xlu0 %v4269_v9, %s4173_s29  ;;  %v336_v15 = vpack.c.bf16 %v85_v13, %v85_v13 }
  0x95   :  { %212 = vrot.lane.b32.xlu2 %v4269_v9, %s4174_s30  ;;  %274 = vrot.lane.b32.xlu1 %v4269_v9, %s4175_s12 }
  0x9b   :  { %397 = vrot.lane.b32.xlu0 %v4281_v14, %s4173_s29 }
  0x9d   :  { %395 = vrot.lane.b32.xlu2 %v336_v15, %s4172_s28  ;;  %210 = vrot.lane.b32.xlu1 %v87_v10, %s4176_s13 }
  0xa3   :  { %339 = vrot.lane.b32.xlu0 %v4281_v14, %s4170_s0 }
  0xa5   :  { %517 = vrot.lane.b32.xlu2 %v336_v15, %s4171_s27  ;;  %519 = vrot.lane.b32.xlu1 %v4281_v14, %s4175_s12 }
  0xab   :  { %458 = vrot.lane.b32.xlu0 %v4281_v14, %s4174_s30 }
  0xad   :  { %456 = vrot.lane.b32.xlu1 %v336_v15, %s4176_s13 }
  0xb5   :  { %183 = vrot.lane.b32.xlu1 %v4269_v9, %s4177_s14 }
  0xe7   :  { %v273_v16 = vpop.permute.xlu2 %272 }
  0xef   :  { %v213_v17 = vpop.permute.xlu2 %212 }
  0xf0   :  { %v218_v18 = vsel %vm92_vm1, %v213_v17, 0 }
  0xf1   :  { %227 = vmatpush.bf16.xpose.msrb.mxu0 %v218_v18 }
  0xf7   :  { %v396_v35 = vpop.permute.xlu2 %395 }
  0xfd   :  { %v91_v19 = vpop.permute.xlu0 %90 }
  0xfe   :  { %v97_v20 = vsel %vm92_vm1, %v91_v19, 0 }
  0xff   :  { %106 = vmatpush.bf16.xpose.msra.mxu1 %v97_v20  ;;  %v149_v21 = vpop.permute.xlu1 %148  ;;  %v518_v37 = vpop.permute.xlu2 %517 }
 0x105   :  { %v151_v22 = vpop.permute.xlu0 %150 }
 0x106   :  { %3146 = vmatmul.msk.bf16.vlgmr.msra.gmra.mxu1 %vm92_vm1, %v87_v10  ;;  %v156_v23 = vsel %vm92_vm1, %v151_v22, 0 }
 0x107   :  { %165 = vmatpush.bf16.xpose.msra.mxu3 %v156_v23  ;;  %v275_v24 = vpop.permute.xlu1 %274 }
 0x108   :  { %v280_v25 = vsel %vm92_vm1, %v275_v24, 0 }
 0x10d   :  { %v398_v26 = vpop.permute.xlu0 %397 }
 0x10e   :  { %v403_v27 = vsel %vm92_vm1, %v398_v26, 0  ;;  %3148 = vmatmul.msk.bf16.vlgmr.msra.gmra.mxu3 %vm92_vm1, %v149_v21 }
 0x10f   :  { %289 = vmatpush.bf16.xpose.msrb.mxu3 %v280_v25  ;;  %v211_v28 = vpop.permute.xlu1 %210 }
 0x110   :  { %3150 = vmatmul.msk.bf16.vlgmr.msrb.gmra.mxu0 %vm92_vm1, %v211_v28 }
 0x115   :  { %v340_v29 = vpop.permute.xlu0 %339 }
 0x116   :  { %v345_v30 = vsel %vm92_vm1, %v340_v29, 0 }
 0x117   :  { %412 = vmatpush.bf16.xpose.msra.mxu3 %v403_v27  ;;  %354 = vmatpush.bf16.xpose.msra.mxu0 %v345_v30  ;;  %v520_v31 = vpop.permute.xlu1 %519 }
 0x118   :  { %v525_v33 = vsel %vm92_vm1, %v520_v31, 0 }
 0x11d   :  { %v459_v32 = vpop.permute.xlu0 %458 }
 0x11e   :  { %v464_v34 = vsel %vm92_vm1, %v459_v32, 0  ;;  %3152 = vmatmul.msk.bf16.vlgmr.msrb.gmra.mxu3 %vm92_vm1, %v273_v16 }
 0x11f   :  { %534 = vmatpush.bf16.xpose.msrb.mxu3 %v525_v33  ;;  %473 = vmatpush.bf16.xpose.msrb.mxu0 %v464_v34  ;;  %v457_v36 = vpop.permute.xlu1 %456 }
 0x120   :  { %3155 = vmatmul.msk.bf16.vlgmr.msra.gmra.mxu0 %vm92_vm1, %v336_v15 }
 0x127   :  { %v184_v22 = vpop.permute.xlu1 %183 }
 0x128   :  { %v189_v26 = vsel %vm129_vm2, %v184_v22, 0 }
 0x12e   :  { %3157 = vmatmul.msk.bf16.vlgmr.msra.gmra.mxu3 %vm92_vm1, %v396_v35 }
 0x130   :  { %3159 = vmatmul.msk.bf16.vlgmr.msrb.gmra.mxu0 %vm92_vm1, %v457_v36 }
 0x13e   :  { %3161 = vmatmul.msk.bf16.vlgmr.msrb.gmra.mxu3 %vm92_vm1, %v518_v37 }
 0x183   :  { %v108_v39 = vpop.f32.mrf.mxu1 }
 0x184   :  { %v109_v40 = vadd.f32 %v108_v39, %v86_v38 }
 0x186   :  { %v112_v41 = vsel %vm92_vm1, %v109_v40, -inf }
 0x187   :  { %113 = vmax.xlane.f32.xlu2 %v112_v41 }
 0x18b   :  { %v110_v42 = vpop.f32.mrf.mxu1 }
 0x18d   :  { %v229_v43 = vpop.f32.mrf.mxu0 }
 0x18e   :  { %v230_v44 = vadd.f32 %v229_v43, %v86_v38 }
 0x190   :  { %v233_v45 = vsel %vm92_vm1, %v230_v44, -inf }
 0x191   :  { %v167_v46 = vpop.f32.mrf.mxu3  ;;  %234 = vmax.xlane.f32.xlu2 %v233_v45 }
 0x192   :  { %v168_v47 = vadd.f32 %v167_v46, %v86_v38 }
 0x194   :  { %v171_v48 = vsel %vm92_vm1, %v168_v47, -inf }
 0x195   :  { %172 = vmax.xlane.f32.xlu0 %v171_v48  ;;  %v231_v49 = vpop.f32.mrf.mxu0 }
 0x199   :  { %v169_v50 = vpop.f32.mrf.mxu3 }
 0x19d   :  { %v356_v52 = vpop.f32.mrf.mxu0 }
 0x19e   :  { %v4322_v53 = vadd.f32 %v3154_v51, %v356_v52 }
 0x1a0   :  { %v360_v54 = vsel %vm92_vm1, %v4322_v53, -inf }
 0x1a1   :  { %v291_v55 = vpop.f32.mrf.mxu3  ;;  %361 = vmax.xlane.f32.xlu1 %v360_v54 }
 0x1a2   :  { %v4326_v56 = vadd.f32 %v291_v55, %v86_v38 }
 0x1a4   :  { %v295_v58 = vsel %vm92_vm1, %v4326_v56, -inf }
 0x1a5   :  { %v358_v57 = vpop.f32.mrf.mxu0 }
 0x1a9   :  { %v293_v59 = vpop.f32.mrf.mxu3  ;;  %296 = vmax.xlane.f32.xlu1 %v295_v58  ;;  %124 = vrot.lane.b32.xlu2 %v4269_v9, %s4178_s19 }
 0x1ad   :  { %v475_v60 = vpop.f32.mrf.mxu0 }
 0x1ae   :  { %v4332_v61 = vadd.f32 %v3154_v51, %v475_v60 }
 0x1b0   :  { %v479_v62 = vsel %vm92_vm1, %v4332_v61, -inf }
 0x1b1   :  { %v414_v63 = vpop.f32.mrf.mxu3  ;;  %480 = vmax.xlane.f32.xlu0 %v479_v62 }
 0x1b2   :  { %v415_v8 = vadd.f32 %v3154_v51, %v414_v63 }
 0x1b4   :  { %v418_v10 = vsel %vm92_vm1, %v415_v8, -inf }
 0x1b5   :  { %v477_v0 = vpop.f32.mrf.mxu0 }
 0x1b9   :  { %v416_v1 = vpop.f32.mrf.mxu3 }
 0x1c1   :  { %v536_v4 = vpop.f32.mrf.mxu3 }
 0x1c2   :  { %v537_v5 = vadd.f32 %v3154_v51, %v536_v4  ;;  %245 = vrot.lane.b32.xlu1 %v4269_v9, %s4179_s2 }
 0x1c4   :  { %v540_v6 = vsel %vm92_vm1, %v537_v5, -inf }
 0x1c5   :  { %541 = vmax.xlane.f32.xlu0 %v540_v6 }
 0x1c9   :  { %v538_v7 = vpop.f32.mrf.mxu3 }
 0x1d2   :  { %419 = vmax.xlane.f32.xlu2 %v418_v10 }
 0x1fa   :  { %v114_v11 = vpop.xlane.xlu2 %113 }
 0x1fb   :  { %v115_v12 = vsub.f32 %v109_v40, %v114_v11 }
 0x1fd   :  { %v116_v13 = vmul.f32 1.442695, %v115_v12 }
 0x1ff   :  { %4064 = vpow2.f32 %v116_v13 }
 0x204   :  { %v235_v15 = vpop.xlane.xlu2 %234 }
 0x205   :  { %v4340_v16 = vpop.eup %4064  ;;  %v236_v17 = vsub.f32 %v230_v44, %v235_v15 }
 0x206   :  { %v118_v18 = vsel %vm92_vm1, %v4340_v16, 0.0 }
 0x207   :  { %v237_v19 = vmul.f32 1.442695, %v236_v17  ;;  %119 = vadd.xlane.f32.xlu0 %v118_v18 }
 0x208   :  { %v173_v20 = vpop.xlane.xlu0 %172 }
 0x209   :  { %4066 = vpow2.f32 %v237_v19  ;;  %v174_v21 = vsub.f32 %v168_v47, %v173_v20 }
 0x20b   :  { %v175_v23 = vmul.f32 1.442695, %v174_v21 }
 0x20c   :  { %v125_v24 = vpop.permute.xlu2 %124 }
 0x20d   :  { %4068 = vpow2.f32 %v175_v23  ;;  %v131_v25 = vsel %vm129_vm2, %v125_v24, 0 }
 0x20e   :  { %140 = vmatpush.bf16.msra.mxu2 %v131_v25 }
 0x20f   :  { %v4067_v27 = vpop.eup %4066 }
 0x210   :  { %v239_v28 = vsel %vm92_vm1, %v4067_v27, 0.0 }
 0x211   :  { %240 = vadd.xlane.f32.xlu2 %v239_v28 }
 0x212   :  { %198 = vmatpush.bf16.msrb.mxu2 %v189_v26 }
 0x213   :  { %v4347_v29 = vpop.eup %4068 }
 0x214   :  { %v177_v30 = vsel %vm92_vm1, %v4347_v29, 0.0  ;;  %v362_v31 = vpop.xlane.xlu1 %361 }
 0x215   :  { %178 = vadd.xlane.f32.xlu1 %v177_v30  ;;  %v363_v33 = vsub.f32 %v4322_v53, %v362_v31 }
 0x217   :  { %v364_v36 = vmul.f32 1.442695, %v363_v33 }
 0x219   :  { %4070 = vpow2.f32 %v364_v36 }
 0x21b   :  { %307 = vrot.lane.b32.xlu0 %v4269_v9, %s4180_s20 }
 0x21c   :  { %v297_v32 = vpop.xlane.xlu1 %296 }
 0x21d   :  { %v298_v38 = vsub.f32 %v4326_v56, %v297_v32 }
 0x21f   :  { %v299_v9 = vmul.f32 1.442695, %v298_v38  ;;  %v4071_v41 = vpop.eup %4070 }
 0x220   :  { %v366_v44 = vsel %vm92_vm1, %v4071_v41, 0.0 }
 0x221   :  { %4072 = vpow2.f32 %v299_v9 }
 0x224   :  { %v481_v37 = vpop.xlane.xlu0 %480 }
 0x225   :  { %v482_v39 = vsub.f32 %v4332_v61, %v481_v37 }
 0x227   :  { %v483_v43 = vmul.f32 1.442695, %v482_v39  ;;  %v4073_v48 = vpop.eup %4072 }
 0x228   :  { %v301_v50 = vsel %vm92_vm1, %v4073_v48, 0.0 }
 0x229   :  { %430 = vrot.lane.b32.xlu2 %v4281_v14, %s4177_s14  ;;  %4074 = vpow2.f32 %v483_v43 }
 0x22e   :  { %372 = vrot.lane.b32.xlu1 %v4281_v14, %s4178_s19 }
 0x22f   :  { %v4363_v51 = vpop.eup %4074 }
 0x230   :  { %v485_v53 = vsel %vm92_vm1, %v4363_v51, 0.0 }
 0x234   :  { %v246_v34 = vpop.permute.xlu1 %245 }
 0x235   :  { %v251_v35 = vsel %vm129_vm2, %v246_v34, 0 }
 0x236   :  { %260 = vmatpush.bf16.msrb.mxu1 %v251_v35 }
 0x238   :  { %v542_v40 = vpop.xlane.xlu0 %541 }
 0x239   :  { %v543_v42 = vsub.f32 %v537_v5, %v542_v40 }
 0x23b   :  { %v544_v47 = vmul.f32 1.442695, %v543_v42 }
 0x23d   :  { %4076 = vpow2.f32 %v544_v47 }
 0x243   :  { %v4365_v52 = vpop.eup %4076 }
 0x244   :  { %v546_v55 = vsel %vm92_vm1, %v4365_v52, 0.0 }
 0x245   :  { %367 = vadd.xlane.f32.xlu0 %v366_v44  ;;  %v420_v45 = vpop.xlane.xlu2 %419 }
 0x246   :  { %v421_v46 = vsub.f32 %v415_v8, %v420_v45 }
 0x248   :  { %v422_v49 = vmul.f32 1.442695, %v421_v46 }
 0x24a   :  { %4078 = vpow2.f32 %v422_v49 }
 0x24d   :  { %302 = vadd.xlane.f32.xlu0 %v301_v50 }
 0x250   :  { %v4079_v54 = vpop.eup %4078 }
 0x251   :  { %v424_v56 = vsel %vm92_vm1, %v4079_v54, 0.0 }
 0x252   :  { %486 = vadd.xlane.f32.xlu2 %v485_v53 }
 0x255   :  { %547 = vadd.xlane.f32.xlu0 %v546_v55 }
 0x258   :  { %425 = vadd.xlane.f32.xlu1 %v424_v56  ;;  %v3875_v56 = vld [vmem:[%s5320_s5 + $0x8] sm:$0xff] }
 0x259   :  { %608 = vmatpush.bf16.msra.mxu0 %v3875_v56 }
 0x269   :  { %552 = vrot.lane.b32.xlu0 %v4281_v14, %s4180_s20 }
 0x271   :  { %491 = vrot.lane.b32.xlu1 %v4281_v14, %s4179_s2 }
 0x27a   :  { %v120_v57 = vpop.xlane.xlu0 %119 }
 0x27b   :  { %4080 = vrcp.f32 %v120_v57  ;;  %v3874_v57 = vld [vmem:[%s5320_s5] sm:$0xff] }
 0x27c   :  { %609 = vmatpush.bf16.msra.mxu0 %v3874_v57 }
 0x281   :  { %v4081_v58 = vpop.eup %4080 }
 0x282   :  { %v122_v59 = vmul.f32 %v4081_v58, %v4340_v16 }
 0x284   :  { %v241_v60 = vpop.xlane.xlu2 %240  ;;  %v123_v61 = vpack.c.bf16 %v122_v59, %v122_v59 }
 0x285   :  { %4082 = vrcp.f32 %v241_v60 }
 0x286   :  { %3147 = vmatmul.msk.bf16.vlgmr.msra.gmra.mxu2 %vm92_vm1, %v123_v61 }
 0x288   :  { %v179_v62 = vpop.xlane.xlu1 %178 }
 0x289   :  { %4084 = vrcp.f32 %v179_v62 }
 0x28b   :  { %v4083_v63 = vpop.eup %4082 }
 0x28c   :  { %v243_v0 = vmul.f32 %v4083_v63, %v4067_v27  ;;  %v431_v7 = vpop.permute.xlu2 %430 }
 0x28d   :  { %v308_v1 = vpop.permute.xlu0 %307  ;;  %v436_v10 = vsel %vm129_vm2, %v431_v7, 0 }
 0x28e   :  { %v313_v4 = vsel %vm129_vm2, %v308_v1, 0  ;;  %v244_v5 = vpack.c.bf16 %v243_v0, %v243_v0  ;;  %v4058_v0 = vld [vmem:[%s5322_s7 + $0x2] ss:$0 sm:$0xff] }
 0x28f   :  { %v4085_v6 = vpop.eup %4084  ;;  %322 = vmatpush.bf16.msra.mxu2 %v313_v4 }
 0x290   :  { %v181_v14 = vmul.f32 %v4085_v6, %v4347_v29  ;;  %3151 = vmatmul.msk.bf16.vlgmr.msrb.gmra.mxu1 %vm92_vm1, %v244_v5 }
 0x292   :  { %v182_v8 = vpack.c.bf16 %v181_v14, %v181_v14 }
 0x296   :  { %3149 = vmatmul.msk.bf16.vlgmr.msrb.gmra.mxu2 %vm92_vm1, %v182_v8 }
 0x297   :  { %445 = vmatpush.bf16.msrb.mxu2 %v436_v10 }
 0x2a0   :  { %v373_v11 = vpop.permute.xlu1 %372 }
 0x2a1   :  { %v378_v12 = vsel %vm129_vm2, %v373_v11, 0  ;;  %v4184_v11 = vmov 32.0  }
 0x2a2   :  { %387 = vmatpush.bf16.msra.mxu1 %v378_v12 }
 0x2b8   :  { %v368_v13 = vpop.xlane.xlu0 %367 }
 0x2b9   :  { %4086 = vrcp.f32 %v368_v13 }
 0x2bf   :  { %v4087_v15 = vpop.eup %4086 }
 0x2c0   :  { %v370_v16 = vmul.f32 %v4087_v15, %v4071_v41  ;;  %v303_v17 = vpop.xlane.xlu0 %302  ;;  %v3877_v15 = vld [vmem:[%s5319_s4 + $0x18] sm:$0xff] }
 0x2c1   :  { %4088 = vrcp.f32 %v303_v17 }
 0x2c2   :  { %v371_v18 = vpack.c.bf16 %v370_v16, %v370_v16 }
 0x2c4   :  { %3156 = vmatmul.msk.bf16.vlgmr.msra.gmra.mxu1 %vm92_vm1, %v371_v18 }
 0x2c5   :  { %v487_v25 = vpop.xlane.xlu2 %486 }
 0x2c7   :  { %v4089_v19 = vpop.eup %4088 }
 0x2c8   :  { %v305_v20 = vmul.f32 %v4089_v19, %v4073_v48  ;;  %v548_v24 = vpop.xlane.xlu0 %547 }
 0x2ca   :  { %v306_v21 = vpack.c.bf16 %v305_v20, %v305_v20 }
 0x2cb   :  { %v426_v22 = vpop.xlane.xlu1 %425 }
 0x2cc   :  { %3153 = vmatmul.msk.bf16.vlgmr.msra.gmra.mxu2 %vm92_vm1, %v306_v21  ;;  %4090 = vrcp.f32 %v426_v22 }
 0x2cd   :  { %4092 = vrcp.f32 %v487_v25 }
 0x2ce   :  { %4094 = vrcp.f32 %v548_v24 }
 0x2cf   :  { %4096 = vrcp.f32 %v4184_v11 }
 0x2d2   :  { %v4091_v23 = vpop.eup %4090 }
 0x2d3   :  { %v428_v26 = vmul.f32 %v4091_v23, %v4079_v54  ;;  %v4093_v30 = vpop.eup %4092 }
 0x2d4   :  { %v489_v31 = vmul.f32 %v4093_v30, %v4363_v51  ;;  %v4095_v32 = vpop.eup %4094 }
 0x2d5   :  { %v429_v27 = vpack.c.bf16 %v428_v26, %v428_v26  ;;  %v550_v36 = vmul.f32 %v4095_v32, %v4365_v52  ;;  %v4097_v12 = vpop.eup %4096 }
 0x2d6   :  { %v490_v35 = vpack.c.bf16 %v489_v31, %v489_v31  ;;  %v625_v13 = vmul.f32 32.0, %v4097_v12  ;;  %vm629_vm6 = vweird.f32 %v4097_v12 }
 0x2d7   :  { %v551_v37 = vpack.c.bf16 %v550_v36, %v550_v36 }
 0x2d8   :  { %v626_v16 = vsub.f32 1.0, %v625_v13 }
 0x2db   :  { %v553_v28 = vpop.permute.xlu0 %552 }
 0x2dc   :  { %v558_v29 = vsel %vm129_vm2, %v553_v28, 0  ;;  %3158 = vmatmul.msk.bf16.vlgmr.msrb.gmra.mxu2 %vm92_vm1, %v429_v27 }
 0x2dd   :  { %567 = vmatpush.bf16.msra.mxu2 %v558_v29 }
 0x2e3   :  { %v492_v33 = vpop.permute.xlu1 %491 }
 0x2e4   :  { %v497_v34 = vsel %vm129_vm2, %v492_v33, 0  ;;  %v4061_v33 = vld [vmem:[%s5321_s6 + $0x1] ss:$0 sm:$0xff]  ;;  %s3125_s6 = sshll.u32 %s5326_s11, 4  ;;  %s3126_s6 = int_to_ptr.hbm [resolvable:$true] %s3125_s6 }
 0x2e5   :  { %506 = vmatpush.bf16.msrb.mxu1 %v497_v34 }
 0x2e8   :  { %3160 = vmatmul.msk.bf16.vlgmr.msrb.gmra.mxu1 %vm92_vm1, %v490_v35 }
 0x2e9   :  { %704 = vmatpush.bf16.msra.mxu1 %v3877_v15 }
 0x2ec   :  { %3162 = vmatmul.msk.bf16.vlgmr.msra.gmra.mxu2 %vm92_vm1, %v551_v37 }
 0x309   :  { %v142_v38 = vpop.f32.mrf.mxu2 }
 0x30a   :  { %146 = vst.msk [vmem:[#allocation2] sm:$0xff] %vm92_vm1, %v142_v38 }
 0x30d   :  { %v262_v9 = vpop.f32.mrf.mxu1 }
 0x30e   :  { %267 = vrot.lane.b32.xlu0 %v262_v9, %s4181_s21 }
 0x311   :  { %v144_v39 = vpop.f32.mrf.mxu2 }
 0x315   :  { %v264_v40 = vpop.f32.mrf.mxu1 }
 0x319   :  { %v200_v41 = vpop.f32.mrf.mxu2 }
 0x31a   :  { %205 = vrot.lane.b32.xlu0 %v200_v41, %s4182_s22 }
 0x321   :  { %v202_v42 = vpop.f32.mrf.mxu2 }
 0x341   :  { %v389_v43 = vpop.f32.mrf.mxu1 }
 0x342   :  { %393 = vst.msk [vmem:[#allocation2 + $0x8] sm:$0xff] %vm92_vm1, %v389_v43 }
 0x349   :  { %v391_v44 = vpop.f32.mrf.mxu1 }
 0x34f   :  { %v324_v45 = vpop.f32.mrf.mxu2 }
 0x350   :  { %329 = vrot.lane.b32.xlu2 %v324_v45, %s4183_s23 }
 0x357   :  { %v326_v46 = vpop.f32.mrf.mxu2 }
 0x35f   :  { %v447_v47 = vpop.f32.mrf.mxu2 }
 0x360   :  { %452 = vrot.lane.b32.xlu1 %v447_v47, %s4182_s22 }
 0x365   :  { %v508_v48 = vpop.f32.mrf.mxu1 }
 0x367   :  { %v449_v49 = vpop.f32.mrf.mxu2 }
 0x368   :  { %513 = vrot.lane.b32.xlu1 %v508_v48, %s4181_s21  ;;  %v4444_v48 = vld [vmem:[%s5322_s7] ss:$0 sm:$0xff] }
 0x36d   :  { %v510_v50 = vpop.f32.mrf.mxu1 }
 0x36f   :  { %v569_v51 = vpop.f32.mrf.mxu2 }
 0x370   :  { %574 = vrot.lane.b32.xlu0 %v569_v51, %s4183_s23  ;;  %v42_v51 = vld [vmem:[%s5316_s1] sm:$0xff] }
 0x377   :  { %v571_v52 = vpop.f32.mrf.mxu2 }
 0x378   :  { %v43_v52 = vld [vmem:[%s5316_s1 + $0x8] sm:$0xff] }
 0x380   :  { %v268_v53 = vpop.permute.xlu0 %267 }
 0x38c   :  { %v206_v54 = vpop.permute.xlu0 %205 }
 0x38d   :  { %209 = vst.msk [vmem:[#allocation2] sm:$0xff] %vm208_vm3, %v206_v54  ;;  %v4455_v54 = vld [vmem:[%s5322_s7 + $0x1] ss:$0 sm:$0xff] }
 0x38e   :  { %271 = vst.msk [vmem:[#allocation2] sm:$0xff] %vm270_vm4, %v268_v53 }
 0x3aa   :  { %v330_v55 = vpop.permute.xlu2 %329 }
 0x3ab   :  { %333 = vst.msk [vmem:[#allocation2] sm:$0xff] %vm332_vm5, %v330_v55 }
 0x3b2   :  { %v578_v61 = vld [vmem:[#allocation2] sm:$0xff] }
 0x3d2   :  { %v453_v58 = vpop.permute.xlu1 %452 }
 0x3d3   :  { %455 = vst.msk [vmem:[#allocation2 + $0x8] sm:$0xff] %vm208_vm3, %v453_v58  ;;  %v712_v58 = vpack.c.bf16 %v43_v52, %v42_v51 }
 0x3da   :  { %v514_v59 = vpop.permute.xlu1 %513 }
 0x3db   :  { %516 = vst.msk [vmem:[#allocation2 + $0x8] sm:$0xff] %vm270_vm4, %v514_v59 }
 0x3e2   :  { %v575_v60 = vpop.permute.xlu0 %574 }
 0x3e3   :  { %577 = vst.msk [vmem:[#allocation2 + $0x8] sm:$0xff] %vm332_vm5, %v575_v60 }
 0x3ea   :  { %v579_v62 = vld [vmem:[#allocation2 + $0x8] sm:$0xff] }
 0x3eb   :  { %v580_v63 = vpack.c.bf16 %v579_v62, %v578_v61 }
 0x3ed   :  { %3171 = vmatmul.msk.bf16.vlgmr.msra.gmra.mxu0 %vm66_vm0, %v580_v63 }
 0x46a   :  { %v611_v1 = vpop.f32.mrf.mxu0 }
 0x46b   :  { %v612_v4 = vadd.f32 %v4058_v0, %v611_v1 }
 0x46d   :  { %v616_v5 = vadd.f32 %v612_v4, %v4256_v2  ;;  %v3876_v2 = vld [vmem:[%s5319_s4 + $0x10] sm:$0xff] }
 0x46e   :  { %705 = vmatpush.bf16.msra.mxu1 %v3876_v2 }
 0x46f   :  { %v618_v6 = vsel %vm66_vm0, %v616_v5, 0.0 }
 0x470   :  { %619 = vadd.xlane.f32.xlu1 %v618_v6 }
 0x472   :  { %v613_v14 = vpop.f32.mrf.mxu0 }
 0x473   :  { %v614_v7 = vadd.f32 %v4058_v0, %v613_v14 }
 0x475   :  { %v617_v8 = vadd.f32 %v614_v7, %v4261_v3  ;;  %v627_v3 = vmul.f32 %v4097_v12, %v626_v16 }
 0x477   :  { %v621_v10 = vsel %vm66_vm0, %v617_v8, 0.0  ;;  %v628_v17 = vadd.f32 %v4097_v12, %v627_v3 }
 0x478   :  { %622 = vadd.xlane.f32.xlu0 %v621_v10 }
 0x479   :  { %v4428_v18 = vsel %vm629_vm6, %v4097_v12, %v628_v17 }
 0x48c   :  { %715 = vrot.lane.b32.xlu0 %v3877_v15, %s4170_s0 }
 0x4e3   :  { %v620_v19 = vpop.xlane.xlu1 %619 }
 0x4e4   :  { %v631_v20 = vmul.f32 %v4428_v18, %v620_v19 }
 0x4e6   :  { %v633_v21 = vsub.f32 %v616_v5, %v631_v20 }
 0x4e8   :  { %v635_v22 = vmul.f32 %v633_v21, %v633_v21 }
 0x4ea   :  { %v637_v23 = vsel %vm66_vm0, %v635_v22, 0.0 }
 0x4eb   :  { %v623_v24 = vpop.xlane.xlu0 %622  ;;  %638 = vadd.xlane.f32.xlu2 %v637_v23 }
 0x4ec   :  { %v632_v25 = vmul.f32 %v4428_v18, %v623_v24 }
 0x4ee   :  { %v634_v26 = vsub.f32 %v617_v8, %v632_v25 }
 0x4f0   :  { %v636_v27 = vmul.f32 %v634_v26, %v634_v26 }
 0x4f2   :  { %v640_v28 = vsel %vm66_vm0, %v636_v27, 0.0 }
 0x4f3   :  { %641 = vadd.xlane.f32.xlu1 %v640_v28 }
 0x4fe   :  { %v716_v29 = vpop.permute.xlu0 %715 }
 0x4ff   :  { %732 = vmatpush.bf16.msra.mxu3 %v716_v29 }
 0x503   :  { %720 = vrot.lane.b32.xlu2 %v4061_v33, %s4170_s0 }
 0x50c   :  { %713 = vrot.lane.b32.xlu1 %v3876_v2, %s4170_s0 }
 0x55e   :  { %v639_v30 = vpop.xlane.xlu2 %638 }
 0x55f   :  { %v643_v31 = vmul.f32 %v639_v30, %v4428_v18 }
 0x561   :  { %v645_v32 = vadd.f32 1e-05, %v643_v31 }
 0x563   :  { %4098 = vrsqrt.f32 %v645_v32  ;;  %vm653_vm8 = vweird.f32 %v645_v32 }
 0x566   :  { %v642_v34 = vpop.xlane.xlu1 %641  ;;  %v721_v1 = vpop.permute.xlu2 %720 }
 0x567   :  { %v644_v35 = vmul.f32 %v642_v34, %v4428_v18  ;;  %v742_v34 = vld [vmem:[%s5318_s3] sm:$0xff] }
 0x569   :  { %v4099_v36 = vpop.eup %4098  ;;  %v646_v37 = vadd.f32 1e-05, %v644_v35 }
 0x56a   :  { %v648_v38 = vmul.f32 %v4099_v36, %v645_v32  ;;  %vm654_vm7 = vweird.f32 %v4099_v36 }
 0x56b   :  { %4100 = vrsqrt.f32 %v646_v37  ;;  %vm655_vm9 = vmor %vm653_vm8, %vm654_vm7  ;;  %vm663_vm11 = vweird.f32 %v646_v37 }
 0x56c   :  { %v649_v9 = vmul.f32 %v4099_v36, %v648_v38 }
 0x56e   :  { %v650_v39 = vmul.f32 0.5, %v649_v9 }
 0x570   :  { %v651_v40 = vsub.f32 1.5, %v650_v39 }
 0x571   :  { %v4101_v41 = vpop.eup %4100 }
 0x572   :  { %v652_v42 = vmul.f32 %v4099_v36, %v651_v40  ;;  %v658_v43 = vmul.f32 %v4101_v41, %v646_v37  ;;  %vm664_vm10 = vweird.f32 %v4101_v41 }
 0x573   :  { %vm665_vm12 = vmor %vm663_vm11, %vm664_vm10 }
 0x574   :  { %v659_v44 = vmul.f32 %v4101_v41, %v658_v43  ;;  %v656_v45 = vsel %vm655_vm9, %v4099_v36, %v652_v42 }
 0x575   :  { %v667_v49 = vmul.f32 %v656_v45, %v633_v21 }
 0x576   :  { %v660_v46 = vmul.f32 0.5, %v659_v44 }
 0x577   :  { %v670_v55 = vmul.f32 %v4444_v48, %v667_v49 }
 0x578   :  { %v661_v47 = vsub.f32 1.5, %v660_v46 }
 0x579   :  { %v4460_v60 = vadd.f32 %v4455_v54, %v670_v55 }
 0x57a   :  { %v662_v50 = vmul.f32 %v4101_v41, %v661_v47 }
 0x57c   :  { %v666_v53 = vsel %vm665_vm12, %v4101_v41, %v662_v50 }
 0x57d   :  { %v668_v56 = vmul.f32 %v666_v53, %v634_v26 }
 0x57e   :  { %v714_v57 = vpop.permute.xlu1 %713 }
 0x57f   :  { %v671_v59 = vmul.f32 %v4444_v48, %v668_v56  ;;  %733 = vmatpush.bf16.msra.mxu3 %v714_v57 }
 0x581   :  { %v4463_v61 = vadd.f32 %v4455_v54, %v671_v59 }
 0x582   :  { %3185 = vmatmul.msk.bf16.vlgmr.msra.gmra.mxu3 %vm66_vm0, %v712_v58 }
 0x583   :  { %v675_v62 = vpack.c.bf16 %v4463_v61, %v4460_v60 }
 0x585   :  { %3184 = vmatmul.msk.bf16.vlgmr.msra.gmra.mxu1 %vm66_vm0, %v675_v62 }
 0x602   :  { %v707_v63 = vpop.f32.mrf.mxu1 }
 0x603   :  { %v708_v0 = vadd.f32 %v4061_v33, %v707_v63  ;;  %v3194_v63 = vld [vmem:[%s5318_s3 + $0x8] sm:$0xff] }
 0x605   :  { %v740_v4 = vmul.f32 0.35355338, %v708_v0  ;;  %v735_v5 = vpop.f32.mrf.mxu3 }
 0x606   :  { %v736_v6 = vadd.f32 %v735_v5, %v721_v1 }
 0x607   :  { %v743_v14 = vpack.c.bf16 %v740_v4, %v740_v4 }
 0x608   :  { %v4469_v7 = vpack.c.bf16 %v736_v6, %v736_v6 }
 0x609   :  { %922 = vrot.lane.b32.xlu2 %v743_v14, %s4171_s27  ;;  %800 = vrot.lane.b32.xlu1 %v743_v14, %s4172_s28 }
 0x60a   :  { %802 = vrot.lane.b32.xlu0 %v4469_v7, %s4172_s28  ;;  %v749_v8 = vsel %vm92_vm1, %v4469_v7, 0  ;;  %v709_v10 = vpop.f32.mrf.mxu1 }
 0x60b   :  { %758 = vmatpush.bf16.xpose.msrb.mxu2 %v749_v8  ;;  %v710_v13 = vadd.f32 %v4061_v33, %v709_v10 }
 0x60d   :  { %v737_v11 = vpop.f32.mrf.mxu3  ;;  %v741_v16 = vmul.f32 0.35355338, %v710_v13 }
 0x60e   :  { %v738_v12 = vadd.f32 %v737_v11, %v721_v1 }
 0x60f   :  { %v985_v2 = vpack.c.bf16 %v741_v16, %v741_v16 }
 0x610   :  { %v4477_v15 = vpack.c.bf16 %v738_v12, %v738_v12 }
 0x611   :  { %924 = vrot.lane.b32.xlu1 %v4469_v7, %s4171_s27 }
 0x612   :  { %1105 = vrot.lane.b32.xlu2 %v4477_v15, %s4176_s13  ;;  %863 = vrot.lane.b32.xlu0 %v4469_v7, %s4176_s13  ;;  %v991_v25 = vsel %vm92_vm1, %v4477_v15, 0 }
 0x613   :  { %3186 = vmatmul.msk.bf16.vlgmr.msrb.gmra.mxu2 %vm92_vm1, %v743_v14 }
 0x619   :  { %1044 = vrot.lane.b32.xlu1 %v4477_v15, %s4172_s28 }
 0x61a   :  { %1164 = vrot.lane.b32.xlu2 %v985_v2, %s4171_s27  ;;  %861 = vrot.lane.b32.xlu0 %v743_v14, %s4176_s13 }
 0x621   :  { %1166 = vrot.lane.b32.xlu1 %v4477_v15, %s4171_s27 }
 0x622   :  { %1042 = vrot.lane.b32.xlu0 %v985_v2, %s4172_s28 }
 0x62a   :  { %1103 = vrot.lane.b32.xlu0 %v985_v2, %s4176_s13 }
 0x632   :  { %835 = vrot.lane.b32.xlu0 %v4469_v7, %s4173_s29 }
 0x663   :  { %v923_v20 = vpop.permute.xlu2 %922 }
 0x66c   :  { %v1106_v26 = vpop.permute.xlu2 %1105 }
 0x66d   :  { %v1111_v30 = vsel %vm92_vm1, %v1106_v26, 0 }
 0x674   :  { %v1165_v41 = vpop.permute.xlu2 %1164 }
 0x67b   :  { %v801_v3 = vpop.permute.xlu1 %800 }
 0x67c   :  { %v803_v17 = vpop.permute.xlu0 %802 }
 0x67d   :  { %v808_v19 = vsel %vm92_vm1, %v803_v17, 0 }
 0x67e   :  { %817 = vmatpush.bf16.xpose.msrb.mxu1 %v808_v19 }
 0x683   :  { %v925_v21 = vpop.permute.xlu1 %924 }
 0x684   :  { %v930_v22 = vsel %vm92_vm1, %v925_v21, 0  ;;  %v864_v23 = vpop.permute.xlu0 %863 }
 0x685   :  { %v869_v24 = vsel %vm92_vm1, %v864_v23, 0  ;;  %3188 = vmatmul.msk.bf16.vlgmr.msrb.gmra.mxu1 %vm92_vm1, %v801_v3 }
 0x686   :  { %939 = vmatpush.bf16.xpose.msra.mxu1 %v930_v22  ;;  %878 = vmatpush.bf16.xpose.msra.mxu2 %v869_v24 }
 0x68b   :  { %v1045_v27 = vpop.permute.xlu1 %1044 }
 0x68c   :  { %v1050_v28 = vsel %vm92_vm1, %v1045_v27, 0  ;;  %v862_v29 = vpop.permute.xlu0 %861 }
 0x68d   :  { %3190 = vmatmul.msk.bf16.vlgmr.msra.gmra.mxu2 %vm92_vm1, %v862_v29 }
 0x68e   :  { %1000 = vmatpush.bf16.xpose.msrb.mxu2 %v991_v25  ;;  %1059 = vmatpush.bf16.xpose.msrb.mxu1 %v1050_v28 }
 0x693   :  { %v1167_v31 = vpop.permute.xlu1 %1166 }
 0x694   :  { %v1172_v32 = vsel %vm92_vm1, %v1167_v31, 0  ;;  %v1043_v33 = vpop.permute.xlu0 %1042 }
 0x695   :  { %3192 = vmatmul.msk.bf16.vlgmr.msra.gmra.mxu1 %vm92_vm1, %v923_v20 }
 0x696   :  { %1120 = vmatpush.bf16.xpose.msra.mxu2 %v1111_v30  ;;  %v760_v35 = vpop.f32.mrf.mxu2  ;;  %1181 = vmatpush.bf16.xpose.msra.mxu1 %v1172_v32 }
 0x697   :  { %v761_v36 = vadd.f32 %v760_v35, %v742_v34 }
 0x699   :  { %v764_v37 = vsel %vm92_vm1, %v761_v36, -inf }
 0x69a   :  { %765 = vmax.xlane.f32.xlu0 %v764_v37 }
 0x69c   :  { %v1104_v38 = vpop.permute.xlu0 %1103 }
 0x69d   :  { %3195 = vmatmul.msk.bf16.vlgmr.msrb.gmra.mxu2 %vm92_vm1, %v985_v2 }
 0x69e   :  { %v762_v9 = vpop.f32.mrf.mxu2 }
 0x6a4   :  { %v836_v39 = vpop.permute.xlu0 %835 }
 0x6a5   :  { %v841_v40 = vsel %vm129_vm2, %v836_v39, 0  ;;  %3197 = vmatmul.msk.bf16.vlgmr.msrb.gmra.mxu1 %vm92_vm1, %v1043_v33 }
 0x6a6   :  { %850 = vmatpush.bf16.msrb.mxu3 %v841_v40 }
 0x6ad   :  { %3199 = vmatmul.msk.bf16.vlgmr.msra.gmra.mxu2 %vm92_vm1, %v1104_v38 }
 0x6b5   :  { %3201 = vmatmul.msk.bf16.vlgmr.msra.gmra.mxu1 %vm92_vm1, %v1165_v41 }
 0x702   :  { %v819_v42 = vpop.f32.mrf.mxu1 }
 0x703   :  { %v820_v43 = vadd.f32 %v819_v42, %v742_v34 }
 0x705   :  { %v823_v44 = vsel %vm92_vm1, %v820_v43, -inf }
 0x706   :  { %824 = vmax.xlane.f32.xlu1 %v823_v44 }
 0x70a   :  { %v821_v45 = vpop.f32.mrf.mxu1 }
 0x70d   :  { %v766_v46 = vpop.xlane.xlu0 %765 }
 0x70e   :  { %v767_v47 = vsub.f32 %v761_v36, %v766_v46 }
 0x710   :  { %v768_v49 = vmul.f32 1.442695, %v767_v47  ;;  %v880_v50 = vpop.f32.mrf.mxu2 }
 0x711   :  { %v881_v51 = vadd.f32 %v880_v50, %v742_v34 }
 0x712   :  { %4102 = vpow2.f32 %v768_v49  ;;  %v941_v52 = vpop.f32.mrf.mxu1 }
 0x713   :  { %v942_v53 = vadd.f32 %v941_v52, %v742_v34  ;;  %v884_v55 = vsel %vm92_vm1, %v881_v51, -inf }
 0x714   :  { %885 = vmax.xlane.f32.xlu1 %v884_v55 }
 0x715   :  { %v945_v56 = vsel %vm92_vm1, %v942_v53, -inf }
 0x716   :  { %946 = vmax.xlane.f32.xlu2 %v945_v56 }
 0x718   :  { %v4519_v57 = vpop.eup %4102  ;;  %v882_v58 = vpop.f32.mrf.mxu2 }
 0x719   :  { %v770_v62 = vsel %vm92_vm1, %v4519_v57, 0.0 }
 0x71a   :  { %v943_v59 = vpop.f32.mrf.mxu1 }
 0x71c   :  { %771 = vadd.xlane.f32.xlu1 %v770_v62 }
 0x720   :  { %v1002_v0 = vpop.f32.mrf.mxu2 }
 0x721   :  { %v4526_v1 = vadd.f32 %v3194_v63, %v1002_v0 }
 0x722   :  { %v1061_v4 = vpop.f32.mrf.mxu1 }
 0x723   :  { %v1062_v5 = vadd.f32 %v3194_v63, %v1061_v4  ;;  %v1006_v6 = vsel %vm92_vm1, %v4526_v1, -inf }
 0x724   :  { %1007 = vmax.xlane.f32.xlu2 %v1006_v6 }
 0x725   :  { %v1065_v14 = vsel %vm92_vm1, %v1062_v5, -inf }
 0x726   :  { %1066 = vmax.xlane.f32.xlu0 %v1065_v14 }
 0x728   :  { %v1004_v8 = vpop.f32.mrf.mxu2 }
 0x72a   :  { %v1063_v10 = vpop.f32.mrf.mxu1 }
 0x730   :  { %v1122_v11 = vpop.f32.mrf.mxu2 }
 0x731   :  { %v1123_v12 = vadd.f32 %v3194_v63, %v1122_v11 }
 0x732   :  { %v1183_v13 = vpop.f32.mrf.mxu1 }
 0x733   :  { %v4531_v16 = vadd.f32 %v3194_v63, %v1183_v13  ;;  %v1126_v2 = vsel %vm92_vm1, %v1123_v12, -inf }
 0x734   :  { %1127 = vmax.xlane.f32.xlu2 %v1126_v2 }
 0x735   :  { %v1187_v3 = vsel %vm92_vm1, %v4531_v16, -inf }
 0x736   :  { %1188 = vmax.xlane.f32.xlu1 %v1187_v3 }
 0x738   :  { %v1124_v17 = vpop.f32.mrf.mxu2 }
 0x73a   :  { %v1185_v19 = vpop.f32.mrf.mxu1 }
 0x74c   :  { %777 = vrot.lane.b32.xlu2 %v4469_v7, %s4170_s0 }
 0x74f   :  { %896 = vrot.lane.b32.xlu1 %v4469_v7, %s4174_s30 }
 0x757   :  { %1077 = vrot.lane.b32.xlu1 %v4477_v15, %s4173_s29 }
 0x779   :  { %v825_v20 = vpop.xlane.xlu1 %824 }
 0x77a   :  { %v826_v21 = vsub.f32 %v820_v43, %v825_v20 }
 0x77c   :  { %v827_v22 = vmul.f32 1.442695, %v826_v21 }
 0x77e   :  { %4104 = vpow2.f32 %v827_v22 }
 0x784   :  { %v4542_v23 = vpop.eup %4104 }
 0x785   :  { %v829_v24 = vsel %vm92_vm1, %v4542_v23, 0.0 }
 0x786   :  { %830 = vadd.xlane.f32.xlu0 %v829_v24 }
 0x787   :  { %v886_v25 = vpop.xlane.xlu1 %885 }
 0x788   :  { %v887_v26 = vsub.f32 %v881_v51, %v886_v25 }
 0x789   :  { %v947_v27 = vpop.xlane.xlu2 %946 }
 0x78a   :  { %v888_v28 = vmul.f32 1.442695, %v887_v26  ;;  %v948_v29 = vsub.f32 %v942_v53, %v947_v27 }
 0x78c   :  { %4106 = vpow2.f32 %v888_v28  ;;  %v949_v30 = vmul.f32 1.442695, %v948_v29 }
 0x78e   :  { %4108 = vpow2.f32 %v949_v30 }
 0x78f   :  { %v772_v9 = vpop.xlane.xlu1 %771 }
 0x792   :  { %v4546_v31 = vpop.eup %4106 }
 0x793   :  { %v890_v32 = vsel %vm92_vm1, %v4546_v31, 0.0 }
 0x794   :  { %891 = vadd.xlane.f32.xlu1 %v890_v32  ;;  %v4550_v33 = vpop.eup %4108 }
 0x795   :  { %v951_v36 = vsel %vm92_vm1, %v4550_v33, 0.0 }
 0x797   :  { %v1008_v38 = vpop.xlane.xlu2 %1007 }
 0x798   :  { %v1009_v50 = vsub.f32 %v4526_v1, %v1008_v38 }
 0x799   :  { %v1067_v34 = vpop.xlane.xlu0 %1066 }
 0x79a   :  { %v1068_v35 = vsub.f32 %v1062_v5, %v1067_v34  ;;  %957 = vrot.lane.b32.xlu0 %v4469_v7, %s4175_s12  ;;  %v1010_v52 = vmul.f32 1.442695, %v1009_v50 }
 0x79c   :  { %v1069_v37 = vmul.f32 1.442695, %v1068_v35  ;;  %952 = vadd.xlane.f32.xlu1 %v951_v36 }
 0x79e   :  { %4110 = vpow2.f32 %v1069_v37 }
 0x79f   :  { %4112 = vrcp.f32 %v772_v9 }
 0x7a4   :  { %v4556_v39 = vpop.eup %4110 }
 0x7a5   :  { %v1071_v40 = vsel %vm92_vm1, %v4556_v39, 0.0  ;;  %v4113_v44 = vpop.eup %4112 }
 0x7a6   :  { %1072 = vadd.xlane.f32.xlu2 %v1071_v40  ;;  %v774_v7 = vmul.f32 %v4113_v44, %v4519_v57 }
 0x7a7   :  { %v1128_v41 = vpop.xlane.xlu2 %1127 }
 0x7a8   :  { %v1129_v42 = vsub.f32 %v1123_v12, %v1128_v41  ;;  %v775_v49 = vpack.c.bf16 %v774_v7, %v774_v7 }
 0x7a9   :  { %v1189_v53 = vpop.xlane.xlu1 %1188 }
 0x7aa   :  { %v1130_v43 = vmul.f32 1.442695, %v1129_v42  ;;  %v1190_v59 = vsub.f32 %v4531_v16, %v1189_v53 }
 0x7ac   :  { %4114 = vpow2.f32 %v1130_v43  ;;  %v1191_v62 = vmul.f32 1.442695, %v1190_v59 }
 0x7ad   :  { %4116 = vpow2.f32 %v1010_v52 }
 0x7ae   :  { %4118 = vpow2.f32 %v1191_v62 }
 0x7af   :  { %v778_v45 = vpop.permute.xlu2 %777 }
 0x7b0   :  { %v783_v46 = vsel %vm129_vm2, %v778_v45, 0 }
 0x7b1   :  { %792 = vmatpush.bf16.msrb.mxu0 %v783_v46 }
 0x7b2   :  { %v4562_v47 = vpop.eup %4114 }
 0x7b3   :  { %v1132_v51 = vsel %vm92_vm1, %v4562_v47, 0.0  ;;  %v4117_v55 = vpop.eup %4116 }
 0x7b4   :  { %1133 = vadd.xlane.f32.xlu2 %v1132_v51  ;;  %3187 = vmatmul.msk.bf16.vlgmr.msrb.gmra.mxu0 %vm92_vm1, %v775_v49  ;;  %v1012_v58 = vsel %vm92_vm1, %v4117_v55, 0.0  ;;  %v4119_v63 = vpop.eup %4118 }
 0x7b5   :  { %1019 = vrot.lane.b32.xlu1 %v4477_v15, %s4170_s0  ;;  %v1193_v0 = vsel %vm92_vm1, %v4119_v63, 0.0 }
 0x7c1   :  { %v897_v56 = vpop.permute.xlu1 %896 }
 0x7c2   :  { %v902_v57 = vsel %vm129_vm2, %v897_v56, 0 }
 0x7c3   :  { %911 = vmatpush.bf16.msra.mxu0 %v902_v57 }
 0x7c4   :  { %1013 = vadd.xlane.f32.xlu0 %v1012_v58 }
 0x7c9   :  { %v1078_v4 = vpop.permute.xlu1 %1077 }
 0x7cc   :  { %1138 = vrot.lane.b32.xlu2 %v4477_v15, %s4174_s30 }
 0x7d8   :  { %1199 = vrot.lane.b32.xlu0 %v4477_v15, %s4175_s12  ;;  %v1083_v15 = vsel %vm129_vm2, %v1078_v4, 0 }
 0x7df   :  { %1194 = vadd.xlane.f32.xlu1 %v1193_v0  ;;  %v3879_v0 = vld [vmem:[%s5320_s5 + $0x18] sm:$0xff] }
 0x7e0   :  { %1256 = vmatpush.bf16.msrb.mxu2 %v3879_v0  ;;  %v3907_v0 = vld [vmem:[%s5323_s8 + $0xd4] sm:$0xf0] }
 0x7f9   :  { %v831_v1 = vpop.xlane.xlu0 %830 }
 0x7fa   :  { %4120 = vrcp.f32 %v831_v1  ;;  %v3878_v1 = vld [vmem:[%s5320_s5 + $0x10] sm:$0xff] }
 0x7fb   :  { %1257 = vmatpush.bf16.msrb.mxu2 %v3878_v1 }
 0x800   :  { %v4121_v5 = vpop.eup %4120 }
 0x801   :  { %v833_v6 = vmul.f32 %v4121_v5, %v4542_v23 }
 0x803   :  { %v834_v14 = vpack.c.bf16 %v833_v6, %v833_v6 }
 0x805   :  { %3189 = vmatmul.msk.bf16.vlgmr.msrb.gmra.mxu3 %vm92_vm1, %v834_v14 }
 0x807   :  { %v892_v8 = vpop.xlane.xlu1 %891 }
 0x808   :  { %4122 = vrcp.f32 %v892_v8 }
 0x80c   :  { %v958_v10 = vpop.permute.xlu0 %957 }
 0x80d   :  { %v963_v11 = vsel %vm129_vm2, %v958_v10, 0  ;;  %v4062_v10 = vld [vmem:[%s5322_s7 + $0x3] ss:$0 sm:$0xff] }
 0x80e   :  { %v4123_v12 = vpop.eup %4122  ;;  %972 = vmatpush.bf16.msra.mxu3 %v963_v11 }
 0x80f   :  { %v894_v13 = vmul.f32 %v4123_v12, %v4546_v31  ;;  %v953_v16 = vpop.xlane.xlu1 %952 }
 0x810   :  { %4124 = vrcp.f32 %v953_v16 }
 0x811   :  { %v895_v2 = vpack.c.bf16 %v894_v13, %v894_v13 }
 0x812   :  { %1092 = vmatpush.bf16.msrb.mxu3 %v1083_v15 }
 0x813   :  { %3191 = vmatmul.msk.bf16.vlgmr.msra.gmra.mxu0 %vm92_vm1, %v895_v2 }
 0x816   :  { %v4125_v3 = vpop.eup %4124 }
 0x817   :  { %v955_v17 = vmul.f32 %v4125_v3, %v4550_v33 }
 0x819   :  { %v956_v19 = vpack.c.bf16 %v955_v17, %v955_v17  ;;  %v1073_v20 = vpop.xlane.xlu2 %1072 }
 0x81a   :  { %4126 = vrcp.f32 %v1073_v20 }
 0x81b   :  { %3193 = vmatmul.msk.bf16.vlgmr.msra.gmra.mxu3 %vm92_vm1, %v956_v19 }
 0x820   :  { %v4127_v21 = vpop.eup %4126 }
 0x821   :  { %v1075_v22 = vmul.f32 %v4127_v21, %v4556_v39 }
 0x823   :  { %v1076_v26 = vpack.c.bf16 %v1075_v22, %v1075_v22 }
 0x827   :  { %v1134_v23 = vpop.xlane.xlu2 %1133  ;;  %v1020_v24 = vpop.permute.xlu1 %1019 }
 0x828   :  { %v1025_v25 = vsel %vm129_vm2, %v1020_v24, 0 }
 0x829   :  { %1034 = vmatpush.bf16.msrb.mxu0 %v1025_v25 }
 0x82b   :  { %3198 = vmatmul.msk.bf16.vlgmr.msrb.gmra.mxu3 %vm92_vm1, %v1076_v26 }
 0x82f   :  { %v1139_v27 = vpop.permute.xlu2 %1138 }
 0x830   :  { %v1144_v28 = vsel %vm129_vm2, %v1139_v27, 0  ;;  %v3282_v27 = vld [vmem:[%s5323_s8 + $0x80] sm:$0xf] }
 0x831   :  { %v794_v29 = vpop.f32.mrf.mxu0  ;;  %1153 = vmatpush.bf16.msra.mxu0 %v1144_v28  ;;  %v3904_v28 = vld [vmem:[%s5323_s8 + $0xbc] sm:$0xf0] }
 0x832   :  { %798 = vst.msk [vmem:[#allocation2] sm:$0xff] %vm92_vm1, %v794_v29  ;;  %v3896_v29 = vld [vmem:[%s5323_s8 + $0x84] sm:$0xf] }
 0x837   :  { %v1014_v30 = vpop.xlane.xlu0 %1013 }
 0x838   :  { %4128 = vrcp.f32 %v1014_v30  ;;  %v3283_v30 = vor.u32 %v3904_v28, %v3282_v27 }
 0x839   :  { %v796_v31 = vpop.f32.mrf.mxu0  ;;  %4130 = vrcp.f32 %v1134_v23 }
 0x83a   :  { %v3284_v31 = vld [vmem:[%s5323_s8 + $0xc0] sm:$0xf0] }
 0x83e   :  { %v4129_v32 = vpop.eup %4128 }
 0x83f   :  { %v1016_v33 = vmul.f32 %v4129_v32, %v4117_v55  ;;  %v4131_v35 = vpop.eup %4130  ;;  %v3290_v32 = vld [vmem:[%s5323_s8 + $0x88] sm:$0xf] }
 0x840   :  { %v1136_v38 = vmul.f32 %v4131_v35, %v4562_v47  ;;  %v3287_v35 = vor.u32 %v3896_v29, %v3284_v31 }
 0x841   :  { %v1017_v34 = vpack.c.bf16 %v1016_v33, %v1016_v33  ;;  %v3905_v33 = vld [vmem:[%s5323_s8 + $0xc4] sm:$0xf0] }
 0x842   :  { %v1137_v9 = vpack.c.bf16 %v1136_v38, %v1136_v38  ;;  %v3292_v38 = vld [vmem:[%s5323_s8 + $0xc8] sm:$0xf0]  ;;  %1566 = vmatpush.bf16.msrb.mxu1 %v3287_v35 }
 0x843   :  { %3196 = vmatmul.msk.bf16.vlgmr.msrb.gmra.mxu0 %vm92_vm1, %v1017_v34 }
 0x844   :  { %1552 = vmatpush.bf16.msrb.mxu0 %v3283_v30 }
 0x84a   :  { %v1200_v36 = vpop.permute.xlu0 %1199 }
 0x84b   :  { %v1205_v37 = vsel %vm129_vm2, %v1200_v36, 0  ;;  %v3291_v36 = vor.u32 %v3905_v33, %v3290_v32 }
 0x84c   :  { %1214 = vmatpush.bf16.msra.mxu3 %v1205_v37  ;;  %v3897_v37 = vld [vmem:[%s5323_s8 + $0x8c] sm:$0xf] }
 0x850   :  { %1580 = vmatpush.bf16.msrb.mxu3 %v3291_v36 }
 0x852   :  { %v1195_v39 = vpop.xlane.xlu1 %1194 }
 0x853   :  { %4132 = vrcp.f32 %v1195_v39  ;;  %3200 = vmatmul.msk.bf16.vlgmr.msra.gmra.mxu0 %vm92_vm1, %v1137_v9  ;;  %v3295_v39 = vor.u32 %v3897_v37, %v3292_v38 }
 0x855   :  { %1594 = vmatpush.bf16.msra.mxu2 %v3295_v39  ;;  %v3314_v39 = vld [vmem:[%s5323_s8 + $0xa0] sm:$0xf] }
 0x859   :  { %v4133_v40 = vpop.eup %4132 }
 0x85a   :  { %v1197_v41 = vmul.f32 %v4133_v40, %v4119_v63  ;;  %v3218_v40 = vld [vmem:[%s5323_s8] sm:$0xf] }
 0x85c   :  { %v1198_v42 = vpack.c.bf16 %v1197_v41, %v1197_v41  ;;  %v3888_v41 = vld [vmem:[%s5323_s8 + $0x3c] sm:$0xf0] }
 0x85e   :  { %3202 = vmatmul.msk.bf16.vlgmr.msra.gmra.mxu3 %vm92_vm1, %v1198_v42  ;;  %v3880_v42 = vld [vmem:[%s5323_s8 + $0x4] sm:$0xf] }
 0x888   :  { %v852_v43 = vpop.f32.mrf.mxu3 }
 0x889   :  { %857 = vrot.lane.b32.xlu0 %v852_v43, %s4182_s22 }
 0x890   :  { %v854_v44 = vpop.f32.mrf.mxu3  ;;  %v913_v7 = vpop.f32.mrf.mxu0 }
 0x891   :  { %918 = vrot.lane.b32.xlu2 %v913_v7, %s4181_s21  ;;  %v3219_v44 = vor.u32 %v3888_v41, %v3218_v40  ;;  %v3220_v7 = vld [vmem:[%s5323_s8 + $0x40] sm:$0xf0]  ;;  %v3908_v40 = vld [vmem:[%s5323_s8 + $0xdc] sm:$0xf0] }
 0x892   :  { %v3316_v41 = vld [vmem:[%s5323_s8 + $0xe0] sm:$0xf0] }
 0x893   :  { %1553 = vmatpush.bf16.msrb.mxu0 %v3219_v44  ;;  %v3901_v44 = vld [vmem:[%s5323_s8 + $0xac] sm:$0xf] }
 0x898   :  { %v915_v45 = vpop.f32.mrf.mxu0 }
 0x899   :  { %v3226_v45 = vld [vmem:[%s5323_s8 + $0x8] sm:$0xf] }
 0x89e   :  { %v974_v46 = vpop.f32.mrf.mxu3 }
 0x89f   :  { %979 = vrot.lane.b32.xlu1 %v974_v46, %s4183_s23  ;;  %v3223_v46 = vor.u32 %v3880_v42, %v3220_v7  ;;  %v3324_v7 = vld [vmem:[%s5323_s8 + $0xe8] sm:$0xf0] }
 0x8a1   :  { %1567 = vmatpush.bf16.msrb.mxu1 %v3223_v46  ;;  %v3315_v46 = vor.u32 %v3908_v40, %v3314_v39  ;;  %v3916_v39 = vld [vmem:[%s5325_s10 + $0x20] sm:$0xff] }
 0x8a2   :  { %v3924_v40 = vld [vmem:[%s5325_s10 + $0x60] sm:$0xff] }
 0x8a6   :  { %v976_v47 = vpop.f32.mrf.mxu3 }
 0x8a7   :  { %v3889_v47 = vld [vmem:[%s5323_s8 + $0x44] sm:$0xf0] }
 0x8ae   :  { %v1094_v49 = vpop.f32.mrf.mxu3 }
 0x8af   :  { %1099 = vrot.lane.b32.xlu0 %v1094_v49, %s4182_s22  ;;  %v3881_v49 = vld [vmem:[%s5323_s8 + $0xc] sm:$0xf] }
 0x8b6   :  { %v1096_v50 = vpop.f32.mrf.mxu3 }
 0x8b7   :  { %v3228_v50 = vld [vmem:[%s5323_s8 + $0x48] sm:$0xf0] }
 0x8c0   :  { %v1036_v51 = vpop.f32.mrf.mxu0 }
 0x8c1   :  { %1040 = vst.msk [vmem:[#allocation2 + $0x8] sm:$0xff] %vm92_vm1, %v1036_v51  ;;  %v3227_v51 = vor.u32 %v3889_v47, %v3226_v45 }
 0x8c3   :  { %1581 = vmatpush.bf16.msrb.mxu3 %v3227_v51  ;;  %v3327_v51 = vor.u32 %v3901_v44, %v3324_v7  ;;  %v3931_v44 = vld [vmem:[%s5325_s10 + $0x98] sm:$0xff] }
 0x8c4   :  { %v3939_v7 = vld [vmem:[%s5325_s10 + $0xd8] sm:$0xff] }
 0x8c8   :  { %v1038_v52 = vpop.f32.mrf.mxu0 }
 0x8c9   :  { %v3231_v52 = vor.u32 %v3881_v49, %v3228_v50  ;;  %v3892_v49 = vld [vmem:[%s5323_s8 + $0x5c] sm:$0xf0] }
 0x8cb   :  { %1595 = vmatpush.bf16.msra.mxu2 %v3231_v52  ;;  %v3884_v52 = vld [vmem:[%s5323_s8 + $0x24] sm:$0xf] }
 0x8d0   :  { %v1155_v53 = vpop.f32.mrf.mxu0 }
 0x8d1   :  { %1160 = vrot.lane.b32.xlu0 %v1155_v53, %s4181_s21 }
 0x8d8   :  { %v1157_v55 = vpop.f32.mrf.mxu0 }
 0x8d9   :  { %v3298_v55 = vld [vmem:[%s5323_s8 + $0x90] sm:$0xf] }
 0x8e1   :  { %v1216_v56 = vpop.f32.mrf.mxu3 }
 0x8e2   :  { %1221 = vrot.lane.b32.xlu2 %v1216_v56, %s4183_s23  ;;  %v3906_v56 = vld [vmem:[%s5323_s8 + $0xcc] sm:$0xf0] }
 0x8e9   :  { %v1218_v57 = vpop.f32.mrf.mxu3 }
 0x8ea   :  { %v3898_v57 = vld [vmem:[%s5323_s8 + $0x94] sm:$0xf] }
 0x8eb   :  { %v919_v59 = vpop.permute.xlu2 %918 }
 0x8fb   :  { %v858_v58 = vpop.permute.xlu0 %857 }
 0x8fc   :  { %860 = vst.msk [vmem:[#allocation2] sm:$0xff] %vm208_vm3, %v858_v58 }
 0x8fd   :  { %921 = vst.msk [vmem:[#allocation2] sm:$0xff] %vm270_vm4, %v919_v59  ;;  %v3299_v59 = vor.u32 %v3906_v56, %v3298_v55  ;;  %v3258_v55 = vld [vmem:[%s5323_s8 + $0x28] sm:$0xf] }
 0x8fe   :  { %v3893_v56 = vld [vmem:[%s5323_s8 + $0x64] sm:$0xf0] }
 0x8ff   :  { %1608 = vmatpush.bf16.msra.mxu0 %v3299_v59 }
 0x911   :  { %v980_v62 = vpop.permute.xlu1 %979 }
 0x912   :  { %982 = vst.msk [vmem:[#allocation2] sm:$0xff] %vm332_vm5, %v980_v62  ;;  %v3300_v62 = vld [vmem:[%s5323_s8 + $0xd0] sm:$0xf0] }
 0x913   :  { %v3303_v1 = vor.u32 %v3898_v57, %v3300_v62  ;;  %v3885_v57 = vld [vmem:[%s5323_s8 + $0x2c] sm:$0xf] }
 0x915   :  { %1622 = vmatpush.bf16.msra.mxu1 %v3303_v1  ;;  %v3330_v1 = vld [vmem:[%s5323_s8 + $0xb0] sm:$0xf] }
 0x919   :  { %v1225_v6 = vld [vmem:[#allocation2] sm:$0xff] }
 0x921   :  { %v1100_v63 = vpop.permute.xlu0 %1099 }
 0x922   :  { %1102 = vst.msk [vmem:[#allocation2 + $0x8] sm:$0xff] %vm208_vm3, %v1100_v63  ;;  %v3306_v63 = vld [vmem:[%s5323_s8 + $0x98] sm:$0xf] }
 0x93c   :  { %v1222_v5 = vpop.permute.xlu2 %1221 }
 0x943   :  { %v1161_v4 = vpop.permute.xlu0 %1160 }
 0x944   :  { %1163 = vst.msk [vmem:[#allocation2 + $0x8] sm:$0xff] %vm270_vm4, %v1161_v4  ;;  %v3307_v4 = vor.u32 %v3907_v0, %v3306_v63  ;;  %v3259_v63 = vor.u32 %v3893_v56, %v3258_v55  ;;  %v3920_v55 = vld [vmem:[%s5325_s10 + $0x40] sm:$0xff]  ;;  %v3951_v56 = vld [vmem:[%s5325_s10 + $0x138] sm:$0xff] }
 0x945   :  { %1224 = vst.msk [vmem:[#allocation2 + $0x8] sm:$0xff] %vm332_vm5, %v1222_v5  ;;  %v3899_v5 = vld [vmem:[%s5323_s8 + $0x9c] sm:$0xf] }
 0x946   :  { %1636 = vmatpush.bf16.msra.mxu3 %v3307_v4  ;;  %v3910_v4 = vld [vmem:[%s5323_s8 + $0xec] sm:$0xf0] }
 0x94c   :  { %v1226_v14 = vld [vmem:[#allocation2 + $0x8] sm:$0xff] }
 0x94d   :  { %v1227_v8 = vpack.c.bf16 %v1226_v14, %v1225_v6  ;;  %v3308_v6 = vld [vmem:[%s5323_s8 + $0xd8] sm:$0xf0]  ;;  %v3234_v14 = vld [vmem:[%s5323_s8 + $0x10] sm:$0xf] }
 0x94f   :  { %3215 = vmatmul.msk.bf16.vlgmr.msrb.gmra.mxu2 %vm66_vm0, %v1227_v8 }
 0x9d2   :  { %v1259_v11 = vpop.f32.mrf.mxu2 }
 0x9d3   :  { %v1260_v12 = vadd.f32 %v4062_v10, %v1259_v11  ;;  %v3311_v11 = vor.u32 %v3899_v5, %v3308_v6  ;;  %v3902_v5 = vld [vmem:[%s5323_s8 + $0xb4] sm:$0xf] }
 0x9d4   :  { %v3332_v6 = vld [vmem:[%s5323_s8 + $0xf0] sm:$0xf0] }
 0x9d5   :  { %v1264_v15 = vadd.f32 %v1260_v12, %v4460_v60  ;;  %v3890_v12 = vld [vmem:[%s5323_s8 + $0x4c] sm:$0xf0]  ;;  %1650 = vmatpush.bf16.msrb.mxu2 %v3311_v11  ;;  %v3340_v11 = vld [vmem:[%s5323_s8 + $0xf8] sm:$0xf0] }
 0x9d7   :  { %v1266_v13 = vsel %vm66_vm0, %v1264_v15, 0.0 }
 0x9d8   :  { %1267 = vadd.xlane.f32.xlu0 %v1266_v13 }
 0x9da   :  { %v1261_v16 = vpop.f32.mrf.mxu2 }
 0x9db   :  { %v1262_v2 = vadd.f32 %v4062_v10, %v1261_v16  ;;  %v3235_v16 = vor.u32 %v3890_v12, %v3234_v14  ;;  %v3338_v14 = vld [vmem:[%s5323_s8 + $0xb8] sm:$0xf]  ;;  %v3331_v12 = vor.u32 %v3910_v4, %v3330_v1  ;;  %v3958_v1 = vld [vmem:[%s5325_s10 + $0x170] sm:$0xff] }
 0x9dc   :  { %v3966_v4 = vld [vmem:[%s5325_s10 + $0x1b0] sm:$0xff] }
 0x9dd   :  { %v1265_v3 = vadd.f32 %v1262_v2, %v4463_v61  ;;  %v3236_v2 = vld [vmem:[%s5323_s8 + $0x50] sm:$0xf0]  ;;  %1609 = vmatpush.bf16.msra.mxu0 %v3235_v16  ;;  %v3894_v16 = vld [vmem:[%s5323_s8 + $0x6c] sm:$0xf0] }
 0x9df   :  { %v1269_v17 = vsel %vm66_vm0, %v1265_v3, 0.0 }
 0x9e0   :  { %1270 = vadd.xlane.f32.xlu2 %v1269_v17  ;;  %v3891_v17 = vld [vmem:[%s5323_s8 + $0x54] sm:$0xf0] }
 0xa4b   :  { %v1268_v19 = vpop.xlane.xlu0 %1267 }
 0xa4c   :  { %v1272_v20 = vmul.f32 %v1268_v19, %v4428_v18 }
 0xa4e   :  { %v4624_v21 = vsub.f32 %v1264_v15, %v1272_v20  ;;  %v3882_v15 = vld [vmem:[%s5323_s8 + $0x14] sm:$0xf] }
 0xa4f   :  { %v3239_v19 = vor.u32 %v3882_v15, %v3236_v2  ;;  %v3335_v15 = vor.u32 %v3902_v5, %v3332_v6  ;;  %v3974_v5 = vld [vmem:[%s5325_s10 + $0x1f0] sm:$0xff]  ;;  %v3949_v6 = vld [vmem:[%s5325_s10 + $0x128] sm:$0xff] }
 0xa50   :  { %v1276_v22 = vmul.f32 %v4624_v21, %v4624_v21 }
 0xa51   :  { %1623 = vmatpush.bf16.msra.mxu1 %v3239_v19  ;;  %v3268_v19 = vld [vmem:[%s5323_s8 + $0x70] sm:$0xf0] }
 0xa52   :  { %v1278_v60 = vsel %vm66_vm0, %v1276_v22, 0.0  ;;  %v3883_v22 = vld [vmem:[%s5323_s8 + $0x1c] sm:$0xf] }
 0xa53   :  { %v1271_v23 = vpop.xlane.xlu2 %1270  ;;  %1279 = vadd.xlane.f32.xlu1 %v1278_v60  ;;  %v3244_v60 = vld [vmem:[%s5323_s8 + $0x58] sm:$0xf0] }
 0xa54   :  { %v1273_v24 = vmul.f32 %v1271_v23, %v4428_v18 }
 0xa56   :  { %v4630_v25 = vsub.f32 %v1265_v3, %v1273_v24  ;;  %v3242_v3 = vld [vmem:[%s5323_s8 + $0x18] sm:$0xf]  ;;  %v3247_v24 = vor.u32 %v3883_v22, %v3244_v60  ;;  %v3887_v60 = vld [vmem:[%s5323_s8 + $0x3c] sm:$0xf] }
 0xa57   :  { %v3243_v20 = vor.u32 %v3891_v17, %v3242_v3  ;;  %v3886_v17 = vld [vmem:[%s5323_s8 + $0x34] sm:$0xf]  ;;  %v3895_v22 = vld [vmem:[%s5323_s8 + $0x74] sm:$0xf0] }
 0xa58   :  { %v1277_v61 = vmul.f32 %v4630_v25, %v4630_v25  ;;  %1651 = vmatpush.bf16.msrb.mxu2 %v3247_v24 }
 0xa59   :  { %1637 = vmatpush.bf16.msra.mxu3 %v3243_v20  ;;  %v3274_v20 = vld [vmem:[%s5323_s8 + $0x38] sm:$0xf] }
 0xa5a   :  { %v1281_v26 = vsel %vm66_vm0, %v1277_v61, 0.0 }
 0xa5b   :  { %1282 = vadd.xlane.f32.xlu2 %v1281_v26 }
 0xac6   :  { %v1280_v34 = vpop.xlane.xlu1 %1279 }
 0xac7   :  { %v1284_v9 = vmul.f32 %v1280_v34, %v4428_v18 }
 0xac9   :  { %v4669_v43 = vadd.f32 1e-05, %v1284_v9 }
 0xacb   :  { %4134 = vrsqrt.f32 %v4669_v43  ;;  %vm1294_vm14 = vweird.f32 %v4669_v43 }
 0xace   :  { %v1283_v53 = vpop.xlane.xlu2 %1282 }
 0xacf   :  { %v1285_v58 = vmul.f32 %v1283_v53, %v4428_v18  ;;  %v3252_v53 = vld [vmem:[%s5323_s8 + $0x60] sm:$0xf0] }
 0xad0   :  { %v3255_v62 = vor.u32 %v3884_v52, %v3252_v53  ;;  %v3937_v52 = vld [vmem:[%s5325_s10 + $0xc8] sm:$0xff]  ;;  %v3912_v53 = vld [vmem:[%s5325_s10] sm:$0xff] }
 0xad1   :  { %v4135_v8 = vpop.eup %4134  ;;  %v1287_v10 = vadd.f32 1e-05, %v1285_v58  ;;  %v3260_v58 = vld [vmem:[%s5323_s8 + $0x68] sm:$0xf0] }
 0xad2   :  { %v1289_v13 = vmul.f32 %v4135_v8, %v4669_v43  ;;  %vm1295_vm13 = vweird.f32 %v4135_v8  ;;  %v3909_v43 = vld [vmem:[%s5323_s8 + $0xe4] sm:$0xf0]  ;;  %v3263_v0 = vor.u32 %v3885_v57, %v3260_v58  ;;  %v3959_v57 = vld [vmem:[%s5325_s10 + $0x178] sm:$0xff]  ;;  %v3928_v58 = vld [vmem:[%s5325_s10 + $0x80] sm:$0xff] }
 0xad3   :  { %4136 = vrsqrt.f32 %v1287_v10  ;;  %vm1296_vm15 = vmor %vm1294_vm14, %vm1295_vm13  ;;  %vm1304_vm2 = vweird.f32 %v1287_v10 }
 0xad4   :  { %v1290_v23 = vmul.f32 %v4135_v8, %v1289_v13  ;;  %v3266_v13 = vld [vmem:[%s5323_s8 + $0x30] sm:$0xf] }
 0xad5   :  { %v3267_v24 = vor.u32 %v3894_v16, %v3266_v13  ;;  %v3955_v13 = vld [vmem:[%s5325_s10 + $0x158] sm:$0xff]  ;;  %v3964_v16 = vld [vmem:[%s5325_s10 + $0x1a0] sm:$0xff] }
 0xad6   :  { %v1291_v61 = vmul.f32 0.5, %v1290_v23  ;;  %v3276_v23 = vld [vmem:[%s5323_s8 + $0x78] sm:$0xf0] }
 0xad8   :  { %v1292_v26 = vsub.f32 1.5, %v1291_v61  ;;  %v3271_v61 = vor.u32 %v3886_v17, %v3268_v19  ;;  %v3954_v17 = vld [vmem:[%s5325_s10 + $0x150] sm:$0xff]  ;;  %v3963_v19 = vld [vmem:[%s5325_s10 + $0x198] sm:$0xff] }
 0xad9   :  { %v4137_v27 = vpop.eup %4136 }
 0xada   :  { %v1293_v28 = vmul.f32 %v4135_v8, %v1292_v26  ;;  %v1299_v29 = vmul.f32 %v4137_v27, %v1287_v10  ;;  %vm1305_vm1 = vweird.f32 %v4137_v27  ;;  %v3903_v10 = vld [vmem:[%s5323_s8 + $0xbc] sm:$0xf]  ;;  %v3275_v26 = vor.u32 %v3895_v22, %v3274_v20  ;;  %v3945_v22 = vld [vmem:[%s5325_s10 + $0x108] sm:$0xff] }
 0xadb   :  { %vm1306_vm3 = vmor %vm1304_vm2, %vm1305_vm1  ;;  %v3343_v3 = vor.u32 %v3903_v10, %v3340_v11  ;;  %v3956_v10 = vld [vmem:[%s5325_s10 + $0x160] sm:$0xff]  ;;  %v3965_v11 = vld [vmem:[%s5325_s10 + $0x1a8] sm:$0xff] }
 0xadc   :  { %v1300_v30 = vmul.f32 %v4137_v27, %v1299_v29  ;;  %v1297_v31 = vsel %vm1296_vm15, %v4135_v8, %v1293_v28  ;;  %v3911_v8 = vld [vmem:[%s5323_s8 + $0xf4] sm:$0xf0] }
 0xadd   :  { %v1308_v34 = vmul.f32 %v1297_v31, %v4624_v21  ;;  %v3900_v21 = vld [vmem:[%s5323_s8 + $0xa4] sm:$0xf]  ;;  %v3339_v2 = vor.u32 %v3911_v8, %v3338_v14  ;;  %v3919_v28 = vld [vmem:[%s5325_s10 + $0x38] sm:$0xff]  ;;  %v3957_v14 = vld [vmem:[%s5325_s10 + $0x168] sm:$0xff] }
 0xade   :  { %v1301_v32 = vmul.f32 0.5, %v1300_v30  ;;  %v3319_v47 = vor.u32 %v3900_v21, %v3316_v41  ;;  %v3927_v29 = vld [vmem:[%s5325_s10 + $0x78] sm:$0xff]  ;;  %v3932_v21 = vld [vmem:[%s5325_s10 + $0xa0] sm:$0xff] }
 0xadf   :  { %v1310_v37 = vmul.f32 %v4444_v48, %v1308_v34  ;;  %v3935_v30 = vld [vmem:[%s5325_s10 + $0xb8] sm:$0xff]  ;;  %v3934_v34 = vld [vmem:[%s5325_s10 + $0xb0] sm:$0xff]  ;;  %v3940_v41 = vld [vmem:[%s5325_s10 + $0xe0] sm:$0xff] }
 0xae0   :  { %v1302_v33 = vsub.f32 1.5, %v1301_v32  ;;  %v3943_v31 = vld [vmem:[%s5325_s10 + $0xf8] sm:$0xff]  ;;  %v3918_v32 = vld [vmem:[%s5325_s10 + $0x30] sm:$0xff]  ;;  %v3948_v8 = vld [vmem:[%s5325_s10 + $0x120] sm:$0xff] }
 0xae1   :  { %v3971_v20 = vld [vmem:[%s5325_s10 + $0x1d8] sm:$0xff] }
 0xae2   :  { %v1303_v35 = vmul.f32 %v4137_v27, %v1302_v33  ;;  %v3926_v33 = vld [vmem:[%s5325_s10 + $0x70] sm:$0xff] }
 0xae4   :  { %v1307_v36 = vsel %vm1306_vm3, %v4137_v27, %v1303_v35  ;;  %v3279_v27 = vor.u32 %v3887_v60, %v3276_v23  ;;  %v3942_v35 = vld [vmem:[%s5325_s10 + $0xf0] sm:$0xff]  ;;  %v3953_v60 = vld [vmem:[%s5325_s10 + $0x148] sm:$0xff] }
 0xae5   :  { %v1309_v38 = vmul.f32 %v1307_v36, %v4630_v25  ;;  %v4758_v25 = vadd.f32 %v4455_v54, %v1310_v37  ;;  %v3917_v36 = vld [vmem:[%s5325_s10 + $0x28] sm:$0xff]  ;;  %v3962_v23 = vld [vmem:[%s5325_s10 + $0x190] sm:$0xff] }
 0xae6   :  { %v3925_v37 = vld [vmem:[%s5325_s10 + $0x68] sm:$0xff] }
 0xae7   :  { %v1311_v9 = vmul.f32 %v4444_v48, %v1309_v38  ;;  %v3322_v48 = vld [vmem:[%s5323_s8 + $0xa8] sm:$0xf] }
 0xae8   :  { %v3323_v50 = vor.u32 %v3909_v43, %v3322_v48  ;;  %v3933_v38 = vld [vmem:[%s5325_s10 + $0xa8] sm:$0xff]  ;;  %v3915_v48 = vld [vmem:[%s5325_s10 + $0x18] sm:$0xff] }
 0xae9   :  { %v4761_v42 = vadd.f32 %v4455_v54, %v1311_v9  ;;  %v3250_v54 = vld [vmem:[%s5323_s8 + $0x20] sm:$0xf]  ;;  %v3941_v9 = vld [vmem:[%s5325_s10 + $0xe8] sm:$0xff]  ;;  %v3923_v43 = vld [vmem:[%s5325_s10 + $0x58] sm:$0xff]  ;;  %s4185_s8 = smov [#allocation3]  }
 0xaea   :  { %v3251_v59 = vor.u32 %v3892_v49, %v3250_v54  ;;  %v3930_v54 = vld [vmem:[%s5325_s10 + $0x90] sm:$0xff]  ;;  %v3913_v49 = vld [vmem:[%s5325_s10 + $0x8] sm:$0xff]  ;;  %s3123_s2 = sshll.u32 %s4185_s8, 4  ;;  %s3124_s2 = int_to_ptr.vmem [resolvable:$true] %s3123_s2 }
 0xaeb   :  { %v4774_v45 = vpack.c.bf16 %v4761_v42, %v4758_v25 }
 0xaed   :  { %3344 = vmatmul.msk.bf16.vlgmr.msrb.gmra.mxu0 %vm66_vm0, %v4774_v45  ;;  %3345 = vmatmul.msk.bf16.vlgmr.msrb.gmra.mxu1 %vm66_vm0, %v4774_v45 }
 0xaee   :  { %3346 = vmatmul.msk.bf16.vlgmr.msrb.gmra.mxu3 %vm66_vm0, %v4774_v45  ;;  %3347 = vmatmul.msk.bf16.vlgmr.msra.gmra.mxu2 %vm66_vm0, %v4774_v45 }
 0xaef   :  { %1664 = vmatpush.bf16.msrb.mxu0 %v3315_v46  ;;  %1678 = vmatpush.bf16.msrb.mxu1 %v3319_v47  ;;  %v3914_v46 = vld [vmem:[%s5325_s10 + $0x10] sm:$0xff] }
 0xaf0   :  { %1692 = vmatpush.bf16.msrb.mxu3 %v3323_v50  ;;  %1706 = vmatpush.bf16.msra.mxu2 %v3327_v51  ;;  %v3922_v47 = vld [vmem:[%s5325_s10 + $0x50] sm:$0xff]  ;;  %v3921_v50 = vld [vmem:[%s5325_s10 + $0x48] sm:$0xff] }
 0xaf1   :  { %v3929_v51 = vld [vmem:[%s5325_s10 + $0x88] sm:$0xff] }
 0xaf3   :  { %1665 = vmatpush.bf16.msrb.mxu0 %v3251_v59  ;;  %1679 = vmatpush.bf16.msrb.mxu1 %v3255_v62  ;;  %v3936_v59 = vld [vmem:[%s5325_s10 + $0xc0] sm:$0xff]  ;;  %v3967_v62 = vld [vmem:[%s5325_s10 + $0x1b8] sm:$0xff] }
 0xaf4   :  { %1693 = vmatpush.bf16.msrb.mxu3 %v3259_v63  ;;  %1707 = vmatpush.bf16.msra.mxu2 %v3263_v0  ;;  %v3975_v63 = vld [vmem:[%s5325_s10 + $0x1f8] sm:$0xff]  ;;  %v3950_v0 = vld [vmem:[%s5325_s10 + $0x130] sm:$0xff] }
 0xafd   :  { %3348 = vmatmul.msk.bf16.vlgmr.msra.gmra.mxu0 %vm66_vm0, %v4774_v45  ;;  %3349 = vmatmul.msk.bf16.vlgmr.msra.gmra.mxu1 %vm66_vm0, %v4774_v45 }
 0xafe   :  { %3350 = vmatmul.msk.bf16.vlgmr.msra.gmra.mxu3 %vm66_vm0, %v4774_v45  ;;  %3351 = vmatmul.msk.bf16.vlgmr.msrb.gmra.mxu2 %vm66_vm0, %v4774_v45 }
 0xaff   :  { %1720 = vmatpush.bf16.msra.mxu0 %v3331_v12  ;;  %1734 = vmatpush.bf16.msra.mxu1 %v3335_v15  ;;  %v3973_v12 = vld [vmem:[%s5325_s10 + $0x1e8] sm:$0xff]  ;;  %v3947_v15 = vld [vmem:[%s5325_s10 + $0x118] sm:$0xff] }
 0xb00   :  { %1748 = vmatpush.bf16.msra.mxu3 %v3339_v2  ;;  %1762 = vmatpush.bf16.msrb.mxu2 %v3343_v3  ;;  %v3972_v2 = vld [vmem:[%s5325_s10 + $0x1e0] sm:$0xff]  ;;  %v3946_v3 = vld [vmem:[%s5325_s10 + $0x110] sm:$0xff] }
 0xb03   :  { %1721 = vmatpush.bf16.msra.mxu0 %v3267_v24  ;;  %1735 = vmatpush.bf16.msra.mxu1 %v3271_v61  ;;  %v3970_v24 = vld [vmem:[%s5325_s10 + $0x1d0] sm:$0xff]  ;;  %v3944_v61 = vld [vmem:[%s5325_s10 + $0x100] sm:$0xff] }
 0xb04   :  { %1749 = vmatpush.bf16.msra.mxu3 %v3275_v26  ;;  %1763 = vmatpush.bf16.msrb.mxu2 %v3279_v27  ;;  %v3952_v26 = vld [vmem:[%s5325_s10 + $0x140] sm:$0xff]  ;;  %v3961_v27 = vld [vmem:[%s5325_s10 + $0x188] sm:$0xff] }
 0xb0d   :  { %3352 = vmatmul.msk.bf16.vlgmr.msrb.gmra.mxu0 %vm66_vm0, %v4774_v45  ;;  %3353 = vmatmul.msk.bf16.vlgmr.msrb.gmra.mxu1 %vm66_vm0, %v4774_v45 }
 0xb0e   :  { %3354 = vmatmul.msk.bf16.vlgmr.msrb.gmra.mxu3 %vm66_vm0, %v4774_v45  ;;  %3355 = vmatmul.msk.bf16.vlgmr.msra.gmra.mxu2 %vm66_vm0, %v4774_v45 }
 0xb0f   :  { %2843 = vmatpush.bf16.msrb.mxu0 %v3919_v28  ;;  %2857 = vmatpush.bf16.msrb.mxu1 %v3927_v29  ;;  %v3969_v28 = vld [vmem:[%s5325_s10 + $0x1c8] sm:$0xff]  ;;  %v3960_v29 = vld [vmem:[%s5325_s10 + $0x180] sm:$0xff] }
 0xb10   :  { %2871 = vmatpush.bf16.msrb.mxu3 %v3935_v30  ;;  %2885 = vmatpush.bf16.msra.mxu2 %v3943_v31  ;;  %v3968_v30 = vld [vmem:[%s5325_s10 + $0x1c0] sm:$0xff] }
 0xb11   :  { %v5075_v31 = vld [vmem:[%s5324_s9] sm:$0xff] }
 0xb13   :  { %2844 = vmatpush.bf16.msrb.mxu0 %v3918_v32  ;;  %2858 = vmatpush.bf16.msrb.mxu1 %v3926_v33 }
 0xb14   :  { %2872 = vmatpush.bf16.msrb.mxu3 %v3934_v34  ;;  %2886 = vmatpush.bf16.msra.mxu2 %v3942_v35  ;;  %v1351_v34 = vperm.slane %v5075_v31, 0  ;;  %v1352_v35 = vperm.slane %v5075_v31, 1 }
 0xb17   :  { %2845 = vmatpush.bf16.msrb.mxu0 %v3917_v36  ;;  %2859 = vmatpush.bf16.msrb.mxu1 %v3925_v37 }
 0xb18   :  { %2873 = vmatpush.bf16.msrb.mxu3 %v3933_v38  ;;  %2887 = vmatpush.bf16.msra.mxu2 %v3941_v9 }
 0xb1b   :  { %2846 = vmatpush.bf16.msrb.mxu0 %v3916_v39  ;;  %2860 = vmatpush.bf16.msrb.mxu1 %v3924_v40 }
 0xb1c   :  { %2874 = vmatpush.bf16.msrb.mxu3 %v3932_v21  ;;  %2888 = vmatpush.bf16.msra.mxu2 %v3940_v41 }
 0xb1d   :  { %3356 = vmatmul.msk.bf16.vlgmr.msra.gmra.mxu0 %vm66_vm0, %v4774_v45  ;;  %3357 = vmatmul.msk.bf16.vlgmr.msra.gmra.mxu1 %vm66_vm0, %v4774_v45 }
 0xb1e   :  { %3358 = vmatmul.msk.bf16.vlgmr.msra.gmra.mxu3 %vm66_vm0, %v4774_v45  ;;  %3359 = vmatmul.msk.bf16.vlgmr.msrb.gmra.mxu2 %vm66_vm0, %v4774_v45  ;;  %v3938_v45 = vld [vmem:[%s5325_s10 + $0xd0] sm:$0xff] }
 0xb1f   :  { %2847 = vmatpush.bf16.msrb.mxu0 %v3915_v48  ;;  %2861 = vmatpush.bf16.msrb.mxu1 %v3923_v43  ;;  %v1353_v48 = vperm.slane %v5075_v31, 2  ;;  %v1354_v43 = vperm.slane %v5075_v31, 3 }
 0xb20   :  { %2875 = vmatpush.bf16.msrb.mxu3 %v3931_v44  ;;  %2889 = vmatpush.bf16.msra.mxu2 %v3939_v7 }
 0xb23   :  { %2848 = vmatpush.bf16.msrb.mxu0 %v3914_v46  ;;  %2862 = vmatpush.bf16.msrb.mxu1 %v3922_v47 }
 0xb24   :  { %2876 = vmatpush.bf16.msrb.mxu3 %v3930_v54  ;;  %2890 = vmatpush.bf16.msra.mxu2 %v3938_v45  ;;  %v3983_v54 = vld [vmem:[%s5325_s10 + $0x238] sm:$0xff] }
 0xb25   :  { %v3991_v45 = vld [vmem:[%s5325_s10 + $0x278] sm:$0xff] }
 0xb27   :  { %2849 = vmatpush.bf16.msrb.mxu0 %v3913_v49  ;;  %2863 = vmatpush.bf16.msrb.mxu1 %v3921_v50 }
 0xb28   :  { %2877 = vmatpush.bf16.msrb.mxu3 %v3929_v51  ;;  %2891 = vmatpush.bf16.msra.mxu2 %v3937_v52 }
 0xb2b   :  { %2850 = vmatpush.bf16.msrb.mxu0 %v3912_v53  ;;  %2864 = vmatpush.bf16.msrb.mxu1 %v3920_v55 }
 0xb2c   :  { %2878 = vmatpush.bf16.msrb.mxu3 %v3928_v58  ;;  %2892 = vmatpush.bf16.msra.mxu2 %v3936_v59 }
 0xb2f   :  { %2899 = vmatpush.bf16.msra.mxu0 %v3951_v56  ;;  %2913 = vmatpush.bf16.msra.mxu1 %v3959_v57 }
 0xb30   :  { %2927 = vmatpush.bf16.msra.mxu3 %v3967_v62  ;;  %2941 = vmatpush.bf16.msrb.mxu2 %v3975_v63  ;;  %v3982_v62 = vld [vmem:[%s5325_s10 + $0x230] sm:$0xff] }
 0xb31   :  { %v3990_v63 = vld [vmem:[%s5325_s10 + $0x270] sm:$0xff] }
 0xb33   :  { %2900 = vmatpush.bf16.msra.mxu0 %v3950_v0  ;;  %2914 = vmatpush.bf16.msra.mxu1 %v3958_v1 }
 0xb34   :  { %2928 = vmatpush.bf16.msra.mxu3 %v3966_v4  ;;  %2942 = vmatpush.bf16.msrb.mxu2 %v3974_v5 }
 0xb37   :  { %2901 = vmatpush.bf16.msra.mxu0 %v3949_v6  ;;  %2915 = vmatpush.bf16.msra.mxu1 %v3957_v14  ;;  %v1355_v6 = vperm.slane %v5075_v31, 4  ;;  %v1356_v14 = vperm.slane %v5075_v31, 5 }
 0xb38   :  { %2929 = vmatpush.bf16.msra.mxu3 %v3965_v11  ;;  %2943 = vmatpush.bf16.msrb.mxu2 %v3973_v12 }
 0xb3b   :  { %2902 = vmatpush.bf16.msra.mxu0 %v3948_v8  ;;  %2916 = vmatpush.bf16.msra.mxu1 %v3956_v10  ;;  %v3999_v8 = vld [vmem:[%s5325_s10 + $0x2b8] sm:$0xff] }
 0xb3c   :  { %2930 = vmatpush.bf16.msra.mxu3 %v3964_v16  ;;  %2944 = vmatpush.bf16.msrb.mxu2 %v3972_v2  ;;  %v4007_v10 = vld [vmem:[%s5325_s10 + $0x2f8] sm:$0xff] }
 0xb3f   :  { %2903 = vmatpush.bf16.msra.mxu0 %v3947_v15  ;;  %2917 = vmatpush.bf16.msra.mxu1 %v3955_v13  ;;  %v3981_v15 = vld [vmem:[%s5325_s10 + $0x228] sm:$0xff] }
 0xb40   :  { %2931 = vmatpush.bf16.msra.mxu3 %v3963_v19  ;;  %2945 = vmatpush.bf16.msrb.mxu2 %v3971_v20  ;;  %v3989_v13 = vld [vmem:[%s5325_s10 + $0x268] sm:$0xff]  ;;  %v3998_v19 = vld [vmem:[%s5325_s10 + $0x2b0] sm:$0xff] }
 0xb41   :  { %v4006_v20 = vld [vmem:[%s5325_s10 + $0x2f0] sm:$0xff] }
 0xb43   :  { %2904 = vmatpush.bf16.msra.mxu0 %v3946_v3  ;;  %2918 = vmatpush.bf16.msra.mxu1 %v3954_v17 }
 0xb44   :  { %2932 = vmatpush.bf16.msra.mxu3 %v3962_v23  ;;  %2946 = vmatpush.bf16.msrb.mxu2 %v3970_v24  ;;  %v3980_v23 = vld [vmem:[%s5325_s10 + $0x220] sm:$0xff] }
 0xb45   :  { %v3988_v24 = vld [vmem:[%s5325_s10 + $0x260] sm:$0xff] }
 0xb47   :  { %2905 = vmatpush.bf16.msra.mxu0 %v3945_v22  ;;  %2919 = vmatpush.bf16.msra.mxu1 %v3953_v60 }
 0xb48   :  { %2933 = vmatpush.bf16.msra.mxu3 %v3961_v27  ;;  %2947 = vmatpush.bf16.msrb.mxu2 %v3969_v28  ;;  %v1357_v27 = vperm.slane %v5075_v31, 6  ;;  %v1358_v28 = vperm.slane %v5075_v31, 7  ;;  %v3979_v31 = vld [vmem:[%s5325_s10 + $0x218] sm:$0xff] }
 0xb4b   :  { %2906 = vmatpush.bf16.msra.mxu0 %v3944_v61  ;;  %2920 = vmatpush.bf16.msra.mxu1 %v3952_v26 }
 0xb4c   :  { %2934 = vmatpush.bf16.msra.mxu3 %v3960_v29  ;;  %2948 = vmatpush.bf16.msrb.mxu2 %v3968_v30 }
 0xb6a   :  { %v1555_v32 = vpop.f32.mrf.mxu0  ;;  %v1569_v33 = vpop.f32.mrf.mxu1 }
 0xb6b   :  { %v1556_v36 = vadd.f32 %v1555_v32, %v1351_v34  ;;  %v1570_v37 = vadd.f32 %v1569_v33, %v1352_v35 }
 0xb6d   :  { %v1770_v44 = vmax.f32 %v1556_v36, 0.0  ;;  %v1771_v7 = vmax.f32 %v1570_v37, 0.0 }
 0xb71   :  { %v1583_v38 = vpop.f32.mrf.mxu3  ;;  %v1597_v9 = vpop.f32.mrf.mxu2 }
 0xb72   :  { %v1557_v39 = vpop.f32.mrf.mxu0  ;;  %v1571_v40 = vpop.f32.mrf.mxu1  ;;  %v1584_v51 = vadd.f32 %v1583_v38, %v1353_v48  ;;  %v1598_v52 = vadd.f32 %v1597_v9, %v1354_v43  ;;  %v3987_v38 = vld [vmem:[%s5325_s10 + $0x258] sm:$0xff] }
 0xb73   :  { %v1558_v21 = vadd.f32 %v1557_v39, %v1351_v34  ;;  %v1572_v41 = vadd.f32 %v1571_v40, %v1352_v35  ;;  %v3997_v34 = vld [vmem:[%s5325_s10 + $0x2a8] sm:$0xff] }
 0xb74   :  { %v1772_v0 = vmax.f32 %v1584_v51, 0.0  ;;  %v1773_v1 = vmax.f32 %v1598_v52, 0.0  ;;  %v4005_v35 = vld [vmem:[%s5325_s10 + $0x2e8] sm:$0xff] }
 0xb75   :  { %v1786_v46 = vmax.f32 %v1558_v21, 0.0  ;;  %v1787_v47 = vmax.f32 %v1572_v41, 0.0  ;;  %v3996_v41 = vld [vmem:[%s5325_s10 + $0x2a0] sm:$0xff] }
 0xb77   :  { %v1802_v49 = vpack.c.bf16 %v1786_v46, %v1770_v44  ;;  %v1803_v50 = vpack.c.bf16 %v1787_v47, %v1771_v7  ;;  %v5142_v7 = vld [vmem:[%s5324_s9 + $0x8] sm:$0xff] }
 0xb79   :  { %v1585_v53 = vpop.f32.mrf.mxu3  ;;  %v1599_v55 = vpop.f32.mrf.mxu2  ;;  %2851 = vmatmul.bf16.vlgmr.msrb.gmra.mxu0 %v1802_v49  ;;  %2865 = vmatmul.bf16.vlgmr.msrb.gmra.mxu1 %v1803_v50 }
 0xb7a   :  { %v1586_v56 = vadd.f32 %v1585_v53, %v1353_v48  ;;  %v1600_v57 = vadd.f32 %v1599_v55, %v1354_v43  ;;  %2955 = vmatpush.bf16.msrb.mxu0 %v3983_v54  ;;  %2969 = vmatpush.bf16.msrb.mxu1 %v3991_v45  ;;  %v1611_v58 = vpop.f32.mrf.mxu0  ;;  %v1625_v59 = vpop.f32.mrf.mxu1  ;;  %v4004_v48 = vld [vmem:[%s5325_s10 + $0x2e0] sm:$0xff]  ;;  %v3978_v54 = vld [vmem:[%s5325_s10 + $0x210] sm:$0xff]  ;;  %v1359_v53 = vperm.slane %v5142_v7, 0  ;;  %v1360_v55 = vperm.slane %v5142_v7, 1 }
 0xb7b   :  { %v1612_v16 = vadd.f32 %v1611_v58, %v1355_v6  ;;  %v1626_v2 = vadd.f32 %v1625_v59, %v1356_v14  ;;  %v3986_v45 = vld [vmem:[%s5325_s10 + $0x250] sm:$0xff] }
 0xb7c   :  { %v1788_v4 = vmax.f32 %v1586_v56, 0.0  ;;  %v1789_v5 = vmax.f32 %v1600_v57, 0.0  ;;  %v3995_v56 = vld [vmem:[%s5325_s10 + $0x298] sm:$0xff] }
 0xb7d   :  { %v1774_v29 = vmax.f32 %v1612_v16, 0.0  ;;  %v1775_v30 = vmax.f32 %v1626_v2, 0.0  ;;  %v4003_v57 = vld [vmem:[%s5325_s10 + $0x2d8] sm:$0xff]  ;;  %v1361_v16 = vperm.slane %v5142_v7, 2  ;;  %v1362_v2 = vperm.slane %v5142_v7, 3 }
 0xb7e   :  { %v1804_v11 = vpack.c.bf16 %v1788_v4, %v1772_v0  ;;  %v1805_v12 = vpack.c.bf16 %v1789_v5, %v1773_v1  ;;  %2956 = vmatpush.bf16.msrb.mxu0 %v3982_v62  ;;  %2970 = vmatpush.bf16.msrb.mxu1 %v3990_v63  ;;  %v3977_v62 = vld [vmem:[%s5325_s10 + $0x208] sm:$0xff] }
 0xb7f   :  { %v3985_v63 = vld [vmem:[%s5325_s10 + $0x248] sm:$0xff] }
 0xb80   :  { %2879 = vmatmul.bf16.vlgmr.msrb.gmra.mxu3 %v1804_v11  ;;  %2893 = vmatmul.bf16.vlgmr.msra.gmra.mxu2 %v1805_v12 }
 0xb81   :  { %2983 = vmatpush.bf16.msrb.mxu3 %v3999_v8  ;;  %2997 = vmatpush.bf16.msra.mxu2 %v4007_v10  ;;  %v1639_v3 = vpop.f32.mrf.mxu3  ;;  %v1653_v17 = vpop.f32.mrf.mxu2 }
 0xb82   :  { %2957 = vmatpush.bf16.msrb.mxu0 %v3981_v15  ;;  %2971 = vmatpush.bf16.msrb.mxu1 %v3989_v13  ;;  %v1613_v22 = vpop.f32.mrf.mxu0  ;;  %v1627_v60 = vpop.f32.mrf.mxu1  ;;  %v1640_v9 = vadd.f32 %v1639_v3, %v1357_v27  ;;  %v1654_v39 = vadd.f32 %v1653_v17, %v1358_v28  ;;  %v3976_v15 = vld [vmem:[%s5325_s10 + $0x200] sm:$0xff]  ;;  %v4015_v3 = vld [vmem:[%s5325_s10 + $0x338] sm:$0xff] }
 0xb83   :  { %v1614_v61 = vadd.f32 %v1613_v22, %v1355_v6  ;;  %v1628_v26 = vadd.f32 %v1627_v60, %v1356_v14  ;;  %v3994_v6 = vld [vmem:[%s5325_s10 + $0x290] sm:$0xff]  ;;  %v3984_v13 = vld [vmem:[%s5325_s10 + $0x240] sm:$0xff]  ;;  %v4023_v17 = vld [vmem:[%s5325_s10 + $0x378] sm:$0xff] }
 0xb84   :  { %v1776_v49 = vmax.f32 %v1640_v9, 0.0  ;;  %v1777_v50 = vmax.f32 %v1654_v39, 0.0  ;;  %v4002_v14 = vld [vmem:[%s5325_s10 + $0x2d0] sm:$0xff] }
 0xb85   :  { %v1790_v32 = vmax.f32 %v1614_v61, 0.0  ;;  %v1791_v33 = vmax.f32 %v1628_v26, 0.0  ;;  %2984 = vmatpush.bf16.msrb.mxu3 %v3998_v19  ;;  %2998 = vmatpush.bf16.msra.mxu2 %v4006_v20 }
 0xb86   :  { %2958 = vmatpush.bf16.msrb.mxu0 %v3980_v23  ;;  %2972 = vmatpush.bf16.msrb.mxu1 %v3988_v24  ;;  %v3993_v23 = vld [vmem:[%s5325_s10 + $0x288] sm:$0xff] }
 0xb87   :  { %v1806_v36 = vpack.c.bf16 %v1790_v32, %v1774_v29  ;;  %v1807_v37 = vpack.c.bf16 %v1791_v33, %v1775_v30  ;;  %v4001_v24 = vld [vmem:[%s5325_s10 + $0x2c8] sm:$0xff]  ;;  %v4014_v29 = vld [vmem:[%s5325_s10 + $0x330] sm:$0xff] }
 0xb88   :  { %v4022_v30 = vld [vmem:[%s5325_s10 + $0x370] sm:$0xff] }
 0xb89   :  { %2985 = vmatpush.bf16.msrb.mxu3 %v3997_v34  ;;  %2999 = vmatpush.bf16.msra.mxu2 %v4005_v35  ;;  %v1641_v40 = vpop.f32.mrf.mxu3  ;;  %v1655_v21 = vpop.f32.mrf.mxu2  ;;  %v3992_v34 = vld [vmem:[%s5325_s10 + $0x280] sm:$0xff] }
 0xb8a   :  { %v1642_v43 = vadd.f32 %v1641_v40, %v1357_v27  ;;  %v1656_v44 = vadd.f32 %v1655_v21, %v1358_v28  ;;  %2907 = vmatmul.bf16.vlgmr.msra.gmra.mxu0 %v1806_v36  ;;  %2921 = vmatmul.bf16.vlgmr.msra.gmra.mxu1 %v1807_v37  ;;  %v1667_v46 = vpop.f32.mrf.mxu0  ;;  %v1681_v47 = vpop.f32.mrf.mxu1  ;;  %v4000_v35 = vld [vmem:[%s5325_s10 + $0x2c0] sm:$0xff] }
 0xb8b   :  { %2959 = vmatpush.bf16.msrb.mxu0 %v3979_v31  ;;  %2973 = vmatpush.bf16.msrb.mxu1 %v3987_v38  ;;  %v1668_v0 = vadd.f32 %v1667_v46, %v1359_v53  ;;  %v1682_v1 = vadd.f32 %v1681_v47, %v1360_v55  ;;  %v4031_v31 = vld [vmem:[%s5325_s10 + $0x3b8] sm:$0xff]  ;;  %v4030_v46 = vld [vmem:[%s5325_s10 + $0x3b0] sm:$0xff] }
 0xb8c   :  { %v1792_v51 = vmax.f32 %v1642_v43, 0.0  ;;  %v1793_v52 = vmax.f32 %v1656_v44, 0.0  ;;  %v4039_v38 = vld [vmem:[%s5325_s10 + $0x3f8] sm:$0xff]  ;;  %v4038_v47 = vld [vmem:[%s5325_s10 + $0x3f0] sm:$0xff] }
 0xb8d   :  { %2986 = vmatpush.bf16.msrb.mxu3 %v3996_v41  ;;  %3000 = vmatpush.bf16.msra.mxu2 %v4004_v48  ;;  %v1778_v19 = vmax.f32 %v1668_v0, 0.0  ;;  %v1779_v20 = vmax.f32 %v1682_v1, 0.0  ;;  %v4013_v41 = vld [vmem:[%s5325_s10 + $0x328] sm:$0xff] }
 0xb8e   :  { %v1808_v58 = vpack.c.bf16 %v1792_v51, %v1776_v49  ;;  %v1809_v59 = vpack.c.bf16 %v1793_v52, %v1777_v50  ;;  %v4021_v48 = vld [vmem:[%s5325_s10 + $0x368] sm:$0xff]  ;;  %v4012_v49 = vld [vmem:[%s5325_s10 + $0x320] sm:$0xff] }
 0xb8f   :  { %2960 = vmatpush.bf16.msrb.mxu0 %v3978_v54  ;;  %2974 = vmatpush.bf16.msrb.mxu1 %v3986_v45  ;;  %v4020_v50 = vld [vmem:[%s5325_s10 + $0x360] sm:$0xff]  ;;  %v4029_v51 = vld [vmem:[%s5325_s10 + $0x3a8] sm:$0xff] }
 0xb90   :  { %2935 = vmatmul.bf16.vlgmr.msra.gmra.mxu3 %v1808_v58  ;;  %2949 = vmatmul.bf16.vlgmr.msrb.gmra.mxu2 %v1809_v59  ;;  %v4037_v52 = vld [vmem:[%s5325_s10 + $0x3e8] sm:$0xff]  ;;  %v4028_v58 = vld [vmem:[%s5325_s10 + $0x3a0] sm:$0xff] }
 0xb91   :  { %2987 = vmatpush.bf16.msrb.mxu3 %v3995_v56  ;;  %3001 = vmatpush.bf16.msra.mxu2 %v4003_v57  ;;  %v1695_v4 = vpop.f32.mrf.mxu3  ;;  %v1709_v5 = vpop.f32.mrf.mxu2  ;;  %v4036_v59 = vld [vmem:[%s5325_s10 + $0x3e0] sm:$0xff] }
 0xb92   :  { %v1669_v8 = vpop.f32.mrf.mxu0  ;;  %v1683_v10 = vpop.f32.mrf.mxu1  ;;  %v1696_v27 = vadd.f32 %v1695_v4, %v1361_v16  ;;  %v1710_v28 = vadd.f32 %v1709_v5, %v1362_v2  ;;  %v4027_v4 = vld [vmem:[%s5325_s10 + $0x398] sm:$0xff] }
 0xb93   :  { %2961 = vmatpush.bf16.msrb.mxu0 %v3977_v62  ;;  %2975 = vmatpush.bf16.msrb.mxu1 %v3985_v63  ;;  %v1670_v11 = vadd.f32 %v1669_v8, %v1359_v53  ;;  %v1684_v12 = vadd.f32 %v1683_v10, %v1360_v55  ;;  %v4011_v53 = vld [vmem:[%s5325_s10 + $0x318] sm:$0xff]  ;;  %v4010_v62 = vld [vmem:[%s5325_s10 + $0x310] sm:$0xff]  ;;  %v4009_v8 = vld [vmem:[%s5325_s10 + $0x308] sm:$0xff] }
 0xb94   :  { %v1780_v9 = vmax.f32 %v1696_v27, 0.0  ;;  %v1781_v39 = vmax.f32 %v1710_v28, 0.0  ;;  %v4019_v55 = vld [vmem:[%s5325_s10 + $0x358] sm:$0xff]  ;;  %v4018_v63 = vld [vmem:[%s5325_s10 + $0x350] sm:$0xff]  ;;  %v4017_v10 = vld [vmem:[%s5325_s10 + $0x348] sm:$0xff] }
 0xb95   :  { %v1794_v22 = vmax.f32 %v1670_v11, 0.0  ;;  %v1795_v60 = vmax.f32 %v1684_v12, 0.0  ;;  %2988 = vmatpush.bf16.msrb.mxu3 %v3994_v6  ;;  %3002 = vmatpush.bf16.msra.mxu2 %v4002_v14  ;;  %v4035_v5 = vld [vmem:[%s5325_s10 + $0x3d8] sm:$0xff]  ;;  %v1363_v6 = vperm.slane %v5142_v7, 4  ;;  %v1364_v14 = vperm.slane %v5142_v7, 5 }
 0xb97   :  { %v1810_v61 = vpack.c.bf16 %v1794_v22, %v1778_v19  ;;  %v1811_v26 = vpack.c.bf16 %v1795_v60, %v1779_v20  ;;  %2962 = vmatpush.bf16.msrb.mxu0 %v3976_v15  ;;  %2976 = vmatpush.bf16.msrb.mxu1 %v3984_v13  ;;  %v4026_v15 = vld [vmem:[%s5325_s10 + $0x390] sm:$0xff]  ;;  %v4008_v19 = vld [vmem:[%s5325_s10 + $0x300] sm:$0xff]  ;;  %v1365_v22 = vperm.slane %v5142_v7, 6  ;;  %v1366_v60 = vperm.slane %v5142_v7, 7 }
 0xb98   :  { %v4034_v13 = vld [vmem:[%s5325_s10 + $0x3d0] sm:$0xff]  ;;  %v4016_v20 = vld [vmem:[%s5325_s10 + $0x340] sm:$0xff] }
 0xb99   :  { %2989 = vmatpush.bf16.msrb.mxu3 %v3993_v23  ;;  %3003 = vmatpush.bf16.msra.mxu2 %v4001_v24  ;;  %v1697_v32 = vpop.f32.mrf.mxu3  ;;  %v1711_v33 = vpop.f32.mrf.mxu2 }
 0xb9a   :  { %v1698_v36 = vadd.f32 %v1697_v32, %v1361_v16  ;;  %v1712_v37 = vadd.f32 %v1711_v33, %v1362_v2  ;;  %2963 = vmatmul.bf16.vlgmr.msrb.gmra.mxu0 %v1810_v61  ;;  %2977 = vmatmul.bf16.vlgmr.msrb.gmra.mxu1 %v1811_v26  ;;  %v1723_v54 = vpop.f32.mrf.mxu0  ;;  %v1737_v45 = vpop.f32.mrf.mxu1  ;;  %v4025_v61 = vld [vmem:[%s5325_s10 + $0x388] sm:$0xff] }
 0xb9b   :  { %3011 = vmatpush.bf16.msra.mxu0 %v4015_v3  ;;  %3025 = vmatpush.bf16.msra.mxu1 %v4023_v17  ;;  %v1724_v16 = vadd.f32 %v1723_v54, %v1363_v6  ;;  %v1738_v2 = vadd.f32 %v1737_v45, %v1364_v14  ;;  %v4033_v26 = vld [vmem:[%s5325_s10 + $0x3c8] sm:$0xff] }
 0xb9c   :  { %v1796_v40 = vmax.f32 %v1698_v36, 0.0  ;;  %v1797_v21 = vmax.f32 %v1712_v37, 0.0  ;;  %v4032_v36 = vld [vmem:[%s5325_s10 + $0x3c0] sm:$0xff] }
 0xb9d   :  { %2990 = vmatpush.bf16.msrb.mxu3 %v3992_v34  ;;  %3004 = vmatpush.bf16.msra.mxu2 %v4000_v35  ;;  %v1782_v27 = vmax.f32 %v1724_v16, 0.0  ;;  %v1783_v28 = vmax.f32 %v1738_v2, 0.0  ;;  %v4024_v35 = vld [vmem:[%s5325_s10 + $0x380] sm:$0xff] }
 0xb9e   :  { %v1812_v43 = vpack.c.bf16 %v1796_v40, %v1780_v9  ;;  %v1813_v44 = vpack.c.bf16 %v1797_v21, %v1781_v39 }
 0xb9f   :  { %3012 = vmatpush.bf16.msra.mxu0 %v4014_v29  ;;  %3026 = vmatpush.bf16.msra.mxu1 %v4022_v30 }
 0xba0   :  { %2991 = vmatmul.bf16.vlgmr.msrb.gmra.mxu3 %v1812_v43  ;;  %3005 = vmatmul.bf16.vlgmr.msra.gmra.mxu2 %v1813_v44 }
 0xba1   :  { %3039 = vmatpush.bf16.msra.mxu3 %v4031_v31  ;;  %3053 = vmatpush.bf16.msrb.mxu2 %v4039_v38  ;;  %v1751_v56 = vpop.f32.mrf.mxu3  ;;  %v1765_v57 = vpop.f32.mrf.mxu2 }
 0xba2   :  { %v1725_v0 = vpop.f32.mrf.mxu0  ;;  %v1739_v1 = vpop.f32.mrf.mxu1  ;;  %v1752_v32 = vadd.f32 %v1751_v56, %v1365_v22  ;;  %v1766_v7 = vadd.f32 %v1765_v57, %v1366_v60 }
 0xba3   :  { %3013 = vmatpush.bf16.msra.mxu0 %v4013_v41  ;;  %3027 = vmatpush.bf16.msra.mxu1 %v4021_v48  ;;  %v1726_v11 = vadd.f32 %v1725_v0, %v1363_v6  ;;  %v1740_v12 = vadd.f32 %v1739_v1, %v1364_v14 }
 0xba4   :  { %v1784_v38 = vmax.f32 %v1752_v32, 0.0  ;;  %v1785_v9 = vmax.f32 %v1766_v7, 0.0 }
 0xba5   :  { %3040 = vmatpush.bf16.msra.mxu3 %v4030_v46  ;;  %3054 = vmatpush.bf16.msrb.mxu2 %v4038_v47  ;;  %v1798_v23 = vmax.f32 %v1726_v11, 0.0  ;;  %v1799_v24 = vmax.f32 %v1740_v12, 0.0  ;;  %v4063_v47 = vld [vmem:[%s5322_s7 + $0x4] ss:$0 sm:$0xff] }
 0xba7   :  { %3014 = vmatpush.bf16.msra.mxu0 %v4012_v49  ;;  %3028 = vmatpush.bf16.msra.mxu1 %v4020_v50  ;;  %v1814_v33 = vpack.c.bf16 %v1798_v23, %v1782_v27  ;;  %v1815_v34 = vpack.c.bf16 %v1799_v24, %v1783_v28 }
 0xba9   :  { %3041 = vmatpush.bf16.msra.mxu3 %v4029_v51  ;;  %3055 = vmatpush.bf16.msrb.mxu2 %v4037_v52  ;;  %v1753_v3 = vpop.f32.mrf.mxu3  ;;  %v1767_v17 = vpop.f32.mrf.mxu2 }
 0xbaa   :  { %v1754_v29 = vadd.f32 %v1753_v3, %v1365_v22  ;;  %v1768_v30 = vadd.f32 %v1767_v17, %v1366_v60 }
 0xbab   :  { %3015 = vmatpush.bf16.msra.mxu0 %v4011_v53  ;;  %3029 = vmatpush.bf16.msra.mxu1 %v4019_v55 }
 0xbac   :  { %v1800_v37 = vmax.f32 %v1754_v29, 0.0  ;;  %v1801_v31 = vmax.f32 %v1768_v30, 0.0 }
 0xbad   :  { %3042 = vmatpush.bf16.msra.mxu3 %v4028_v58  ;;  %3056 = vmatpush.bf16.msrb.mxu2 %v4036_v59 }
 0xbae   :  { %v1816_v39 = vpack.c.bf16 %v1800_v37, %v1784_v38  ;;  %v1817_v40 = vpack.c.bf16 %v1801_v31, %v1785_v9 }
 0xbaf   :  { %3016 = vmatpush.bf16.msra.mxu0 %v4010_v62  ;;  %3030 = vmatpush.bf16.msra.mxu1 %v4018_v63 }
 0xbb1   :  { %3043 = vmatpush.bf16.msra.mxu3 %v4027_v4  ;;  %3057 = vmatpush.bf16.msrb.mxu2 %v4035_v5 }
 0xbb3   :  { %3017 = vmatpush.bf16.msra.mxu0 %v4009_v8  ;;  %3031 = vmatpush.bf16.msra.mxu1 %v4017_v10 }
 0xbb5   :  { %3044 = vmatpush.bf16.msra.mxu3 %v4026_v15  ;;  %3058 = vmatpush.bf16.msrb.mxu2 %v4034_v13 }
 0xbb7   :  { %3018 = vmatpush.bf16.msra.mxu0 %v4008_v19  ;;  %3032 = vmatpush.bf16.msra.mxu1 %v4016_v20 }
 0xbb9   :  { %3045 = vmatpush.bf16.msra.mxu3 %v4025_v61  ;;  %3059 = vmatpush.bf16.msrb.mxu2 %v4033_v26 }
 0xbba   :  { %3019 = vmatmul.bf16.vlgmr.msra.gmra.mxu0 %v1814_v33  ;;  %3033 = vmatmul.bf16.vlgmr.msra.gmra.mxu1 %v1815_v34 }
 0xbbd   :  { %3046 = vmatpush.bf16.msra.mxu3 %v4024_v35  ;;  %3060 = vmatpush.bf16.msrb.mxu2 %v4032_v36 }
 0xbc0   :  { %3047 = vmatmul.bf16.vlgmr.msra.gmra.mxu3 %v1816_v39  ;;  %3061 = vmatmul.bf16.vlgmr.msrb.gmra.mxu2 %v1817_v40 }
 0xbf6   :  { %v2852_v21 = vpop.f32.mrf.mxu0  ;;  %v2866_v41 = vpop.f32.mrf.mxu1 }
 0xbf7   :  { %v2853_v50 = vadd.f32 %v4063_v47, %v2852_v21 }
 0xbf9   :  { %v2867_v52 = vadd.f32 %v2866_v41, %v2853_v50 }
 0xbfe   :  { %v2854_v48 = vpop.f32.mrf.mxu0  ;;  %v2868_v46 = vpop.f32.mrf.mxu1 }
 0xbff   :  { %v2855_v58 = vadd.f32 %v4063_v47, %v2854_v48 }
 0xc01   :  { %v2869_v62 = vadd.f32 %v2868_v46, %v2855_v58 }
 0xc03   :  { %v2880_v43 = vpop.f32.mrf.mxu3  ;;  %v2894_v44 = vpop.f32.mrf.mxu2 }
 0xc04   :  { %v2881_v53 = vadd.f32 %v2880_v43, %v2867_v52 }
 0xc06   :  { %v2895_v59 = vadd.f32 %v2894_v44, %v2881_v53 }
 0xc07   :  { %v2908_v54 = vpop.f32.mrf.mxu0  ;;  %v2922_v51 = vpop.f32.mrf.mxu1 }
 0xc08   :  { %v2909_v0 = vadd.f32 %v2908_v54, %v2895_v59 }
 0xc0a   :  { %v2923_v14 = vadd.f32 %v2922_v51, %v2909_v0 }
 0xc0b   :  { %v2882_v45 = vpop.f32.mrf.mxu3  ;;  %v2896_v49 = vpop.f32.mrf.mxu2 }
 0xc0c   :  { %v2883_v1 = vadd.f32 %v2882_v45, %v2869_v62 }
 0xc0e   :  { %v2897_v8 = vadd.f32 %v2896_v49, %v2883_v1 }
 0xc0f   :  { %v2910_v55 = vpop.f32.mrf.mxu0  ;;  %v2924_v63 = vpop.f32.mrf.mxu1 }
 0xc10   :  { %v2911_v11 = vadd.f32 %v2910_v55, %v2897_v8 }
 0xc12   :  { %v2925_v13 = vadd.f32 %v2924_v63, %v2911_v11 }
 0xc13   :  { %v2936_v56 = vpop.f32.mrf.mxu3  ;;  %v2950_v57 = vpop.f32.mrf.mxu2 }
 0xc14   :  { %v2937_v10 = vadd.f32 %v2936_v56, %v2923_v14 }
 0xc16   :  { %v2951_v15 = vadd.f32 %v2950_v57, %v2937_v10 }
 0xc17   :  { %v2964_v4 = vpop.f32.mrf.mxu0  ;;  %v2978_v12 = vpop.f32.mrf.mxu1 }
 0xc18   :  { %v2965_v17 = vadd.f32 %v2964_v4, %v2951_v15 }
 0xc1a   :  { %v2979_v20 = vadd.f32 %v2978_v12, %v2965_v17  ;;  %v4143_v17 = vld [vmem:[%s5322_s7 + $0x1] ss:$0 sm:$0xff] }
 0xc1b   :  { %v2938_v5 = vpop.f32.mrf.mxu3  ;;  %v2952_v6 = vpop.f32.mrf.mxu2 }
 0xc1c   :  { %v2939_v19 = vadd.f32 %v2938_v5, %v2925_v13 }
 0xc1e   :  { %v2953_v22 = vadd.f32 %v2952_v6, %v2939_v19 }
 0xc1f   :  { %v2966_v16 = vpop.f32.mrf.mxu0  ;;  %v2980_v60 = vpop.f32.mrf.mxu1 }
 0xc20   :  { %v2967_v61 = vadd.f32 %v2966_v16, %v2953_v22 }
 0xc22   :  { %v2981_v29 = vadd.f32 %v2980_v60, %v2967_v61 }
 0xc23   :  { %v2992_v2 = vpop.f32.mrf.mxu3  ;;  %v3006_v3 = vpop.f32.mrf.mxu2 }
 0xc24   :  { %v2993_v23 = vadd.f32 %v2992_v2, %v2979_v20 }
 0xc26   :  { %v3007_v28 = vadd.f32 %v3006_v3, %v2993_v23 }
 0xc2b   :  { %v2994_v26 = vpop.f32.mrf.mxu3  ;;  %v3008_v27 = vpop.f32.mrf.mxu2 }
 0xc2c   :  { %v2995_v7 = vadd.f32 %v2994_v26, %v2981_v29 }
 0xc2e   :  { %v3009_v37 = vadd.f32 %v3008_v27, %v2995_v7 }
 0xc37   :  { %v3020_v24 = vpop.f32.mrf.mxu0  ;;  %v3034_v32 = vpop.f32.mrf.mxu1 }
 0xc38   :  { %v3021_v30 = vadd.f32 %v3020_v24, %v3007_v28 }
 0xc3a   :  { %v3035_v33 = vadd.f32 %v3034_v32, %v3021_v30 }
 0xc3f   :  { %v3022_v34 = vpop.f32.mrf.mxu0  ;;  %v3036_v40 = vpop.f32.mrf.mxu1 }
 0xc40   :  { %v3023_v38 = vadd.f32 %v3022_v34, %v3009_v37 }
 0xc42   :  { %v3037_v21 = vadd.f32 %v3036_v40, %v3023_v38 }
 0xc43   :  { %v3048_v35 = vpop.f32.mrf.mxu3  ;;  %v3062_v36 = vpop.f32.mrf.mxu2 }
 0xc44   :  { %v3049_v31 = vadd.f32 %v3048_v35, %v3035_v33 }
 0xc46   :  { %v3063_v9 = vadd.f32 %v3062_v36, %v3049_v31 }
 0xc48   :  { %v3067_v39 = vadd.f32 %v3063_v9, %v4758_v25 }
 0xc4a   :  { %v3069_v41 = vsel %vm66_vm0, %v3067_v39, 0.0 }
 0xc4b   :  { %v3050_v48 = vpop.f32.mrf.mxu3  ;;  %3070 = vadd.xlane.f32.xlu0 %v3069_v41  ;;  %v3064_v44 = vpop.f32.mrf.mxu2 }
 0xc4c   :  { %v3051_v43 = vadd.f32 %v3050_v48, %v3037_v21 }
 0xc4e   :  { %v3065_v46 = vadd.f32 %v3064_v44, %v3051_v43 }
 0xc50   :  { %v3068_v47 = vadd.f32 %v3065_v46, %v4761_v42 }
 0xc52   :  { %v3072_v54 = vsel %vm66_vm0, %v3068_v47, 0.0 }
 0xc53   :  { %3073 = vadd.xlane.f32.xlu2 %v3072_v54 }
 0xcbe   :  { %v3071_v45 = vpop.xlane.xlu0 %3070 }
 0xcbf   :  { %v3075_v49 = vmul.f32 %v3071_v45, %v4428_v18 }
 0xcc1   :  { %v3077_v50 = vsub.f32 %v3067_v39, %v3075_v49 }
 0xcc3   :  { %v3079_v51 = vmul.f32 %v3077_v50, %v3077_v50 }
 0xcc5   :  { %v3081_v25 = vsel %vm66_vm0, %v3079_v51, 0.0 }
 0xcc6   :  { %v3074_v52 = vpop.xlane.xlu2 %3073  ;;  %3082 = vadd.xlane.f32.xlu0 %v3081_v25 }
 0xcc7   :  { %v3076_v53 = vmul.f32 %v3074_v52, %v4428_v18 }
 0xcc9   :  { %v3078_v55 = vsub.f32 %v3068_v47, %v3076_v53 }
 0xccb   :  { %v3080_v56 = vmul.f32 %v3078_v55, %v3078_v55 }
 0xccd   :  { %v3084_v57 = vsel %vm66_vm0, %v3080_v56, 0.0 }
 0xcce   :  { %3085 = vadd.xlane.f32.xlu2 %v3084_v57 }
 0xd39   :  { %v3083_v42 = vpop.xlane.xlu0 %3082 }
 0xd3a   :  { %v3087_v58 = vmul.f32 %v3083_v42, %v4428_v18 }
 0xd3c   :  { %v3089_v59 = vadd.f32 1e-05, %v3087_v58 }
 0xd3e   :  { %4138 = vrsqrt.f32 %v3089_v59  ;;  %vm3097_vm5 = vweird.f32 %v3089_v59 }
 0xd41   :  { %v3086_v62 = vpop.xlane.xlu2 %3085 }
 0xd42   :  { %v3088_v63 = vmul.f32 %v3086_v62, %v4428_v18  ;;  %v4142_v18 = vld [vmem:[%s5322_s7] ss:$0 sm:$0xff]  ;;  %s4186_s7 = smov 128  }
 0xd44   :  { %v4139_v0 = vpop.eup %4138  ;;  %v3090_v1 = vadd.f32 1e-05, %v3088_v63 }
 0xd45   :  { %v3092_v4 = vmul.f32 %v4139_v0, %v3089_v59  ;;  %vm3098_vm4 = vweird.f32 %v4139_v0 }
 0xd46   :  { %4140 = vrsqrt.f32 %v3090_v1  ;;  %vm3099_vm6 = vmor %vm3097_vm5, %vm3098_vm4  ;;  %vm3107_vm8 = vweird.f32 %v3090_v1 }
 0xd47   :  { %v3093_v5 = vmul.f32 %v4139_v0, %v3092_v4 }
 0xd49   :  { %v3094_v6 = vmul.f32 0.5, %v3093_v5 }
 0xd4b   :  { %v3095_v14 = vsub.f32 1.5, %v3094_v6 }
 0xd4c   :  { %v4141_v8 = vpop.eup %4140 }
 0xd4d   :  { %v3096_v10 = vmul.f32 %v4139_v0, %v3095_v14  ;;  %v3102_v11 = vmul.f32 %v4141_v8, %v3090_v1  ;;  %vm3108_vm7 = vweird.f32 %v4141_v8 }
 0xd4e   :  { %vm3109_vm9 = vmor %vm3107_vm8, %vm3108_vm7 }
 0xd4f   :  { %v3100_v12 = vsel %vm3099_vm6, %v4139_v0, %v3096_v10  ;;  %v3103_v15 = vmul.f32 %v4141_v8, %v3102_v11 }
 0xd50   :  { %v3111_v13 = vmul.f32 %v3100_v12, %v3077_v50 }
 0xd51   :  { %v3104_v16 = vmul.f32 0.5, %v3103_v15 }
 0xd52   :  { %v3113_v2 = vmul.f32 %v4142_v18, %v3111_v13 }
 0xd53   :  { %v3105_v3 = vsub.f32 1.5, %v3104_v16 }
 0xd54   :  { %v3115_v19 = vadd.f32 %v4143_v17, %v3113_v2 }
 0xd55   :  { %v3106_v20 = vmul.f32 %v4141_v8, %v3105_v3 }
 0xd56   :  { %3117 = vst.msk [vmem:[#allocation3] sm:$0xff] %vm66_vm0, %v3115_v19 }
 0xd57   :  { %v3110_v22 = vsel %vm3109_vm9, %v4141_v8, %v3106_v20 }
 0xd58   :  { %v3112_v60 = vmul.f32 %v3110_v22, %v3078_v55 }
 0xd5a   :  { %v3114_v23 = vmul.f32 %v4142_v18, %v3112_v60 }
 0xd5c   :  { %v3116_v24 = vadd.f32 %v4143_v17, %v3114_v23 }
 0xd5e   :  { %3118 = vst.msk [vmem:[#allocation3 + $0x8] sm:$0xff] %vm66_vm0, %v3116_v24 }
 0xd5f   :  { %3131 = dma.vmem_to_hbm [thread:$0]  %s3124_s2, 256, %s3126_s6, [#allocation4], %s4186_s7, %s4186_s7, %s4182_s22  }
 0xd60   :  { %4168 = dma.done.wait [#allocation4], 256  }
 0xd61   :  { %4169 = vsyncadd [#allocation4], 4294967040 }
 0xd62   :  { %3136 = vsyncpa [#allocation4], 1 }

</bundles_post_ra>
